<compile_context>
chip_gen: v6e
topology: v6e:2x2x1
jax: 0.10.0
libtpu: 0.0.40
codegen_flags: <defaults>
</compile_context>

<pallas_src>
import functools

import jax
import jax.numpy as jnp
from jax.experimental import pallas as pl
from jax.experimental.pallas import tpu as pltpu

_LANE = 128      # f32 lane width
_SUBLANE = 8     # f32 sublane width


def _rho(x):
    return jnp.clip(x, 0.0, 1.0)


def _rhop(x):
    return ((x >= 0.0) & (x <= 1.0)).astype(x.dtype)


def _round_up(n, m):
    return ((n + m - 1) // m) * m


def _pad2d(x, rows, cols):
    r, c = x.shape
    if r == rows and c == cols:
        return x
    return jnp.pad(x, ((0, rows - r), (0, cols - c)))


def _nbytes(shape, dtype):
    n = 1
    for d in shape:
        n *= int(d)
    return n * jnp.dtype(dtype).itemsize


def make_epcont_kernel(ns, fp, T, dt, no_clamp, compute_dtype):
    """Kernel body. fp[i] = padded width of state layer i (i<ns); fp[ns] = padded data dim."""
    assert ns >= 2, "EPcont needs at least 2 state layers"

    def kernel(*refs):
        idx = 0
        data_ref = refs[idx]; idx += 1
        s_refs = refs[idx:idx + ns]; idx += ns
        m_refs = refs[idx:idx + ns]; idx += ns          # fused mixing matrices M_0..M_{ns-1}
        mdata_ref = refs[idx]; idx += 1                 # W[ns-1].T (data -> last hidden)
        b_refs = refs[idx:idx + ns]; idx += ns
        out_refs = refs[idx:idx + ns]

        B = data_ref.shape[0]

        # Resident, pre-transposed / pre-fused weights (loaded once per grid step).
        M = [m_refs[j][...] for j in range(ns)]
        Mdata = mdata_ref[...]

        def mm(x, w):
            # (B,K) @ (K,N) -> (B,N); rhs contracts on dim 0 (no per-step transpose),
            # f32 accumulation on the MXU.
            return jax.lax.dot_general(x, w, (((1,), (0,)), ((), ())),
                                       preferred_element_type=jnp.float32)

        # ---- loop-invariant work hoisted out of the relaxation loop ----
        rho_data = _rho(data_ref[...]).astype(compute_dtype)
        data_drive = mm(rho_data, Mdata) + jnp.broadcast_to(
            b_refs[ns - 1][...], (B, fp[ns - 1]))
        # Broadcast biases once (JAX does not CSE broadcast_in_dim inside loops).
        b_bc = [jnp.broadcast_to(b_refs[i][...], (B, fp[i])) for i in range(ns - 1)]

        def step(_, s):
            s = list(s)
            rho_s = [_rho(s[j]).astype(compute_dtype) for j in range(ns)]
            # One fused matmul per state layer: forward + feedback contributions
            # share the same LHS rho(s[j]).
            prod = [mm(rho_s[j], M[j]) for j in range(ns)]

            fwd_to = [None] * ns    # fwd_to[i]  = rho(s[i+1]) @ W[i].T
            back_to = [None] * ns   # back_to[i] = rho(s[i-1]) @ W[i-1]
            back_to[1] = prod[0]
            for j in range(1, ns - 1):
                fwd_to[j - 1] = prod[j][:, :fp[j - 1]]        # lane-aligned static slice
                back_to[j + 1] = prod[j][:, fp[j - 1]:]
            fwd_to[ns - 2] = prod[ns - 1]

            dsdt = [None] * ns
            dsdt[0] = -s[0] + fwd_to[0] + b_bc[0]             # output layer: ungated
            for i in range(1, ns - 1):
                dsdt[i] = -s[i] + _rhop(s[i]) * (fwd_to[i] + b_bc[i] + back_to[i])
            dsdt[ns - 1] = -s[ns - 1] + _rhop(s[ns - 1]) * (data_drive + back_to[ns - 1])

            new_s = []
            for i in range(ns):
                si = s[i] + dt * dsdt[i]
                if not no_clamp:
                    si = jnp.clip(si, 0.0, 1.0)
                new_s.append(si)
            return tuple(new_s)

        s0 = tuple(s_refs[i][...] for i in range(ns))
        unroll = True if T <= 16 else 8
        s_final = jax.lax.fori_loop(0, T, step, s0, unroll=unroll)
        for i in range(ns):
            out_refs[i][...] = s_final[i]

    return kernel


@functools.partial(jax.jit, static_argnames=("T", "dt", "size_tab", "no_clamp",
                                             "use_bf16", "batch_tile"))
def epcont_forward(data, s_list, Ws, bs, *, T, dt, size_tab, no_clamp=False,
                   use_bf16=False, batch_tile=None):
    """Runs T steps of EPcont relaxation (method='nograd', beta=0).

    use_bf16:   cast matmul operands to bf16 (f32 accumulation / f32 state).
    batch_tile: if set, tile the batch with a 'parallel' grid axis (v7x).
    """
    ns = len(size_tab) - 1
    B = data.shape[0]
    compute_dtype = jnp.bfloat16 if use_bf16 else jnp.float32

    # Padded (8,128)-aligned dims. fp[ns] is the data dim.
    fp = tuple(_round_up(size_tab[i], _LANE) for i in range(ns + 1))
    if batch_tile is None:
        Bp = _round_up(B, _SUBLANE)
        bt = Bp
    else:
        bt = _round_up(int(batch_tile), _SUBLANE)
        Bp = _round_up(B, bt)
    nb = Bp // bt

    # Zero-pad inputs (padding is exactly inert: padded rows/cols stay 0).
    data_p = _pad2d(data.astype(jnp.float32), Bp, fp[ns])
    s_p = [_pad2d(s_list[i].astype(jnp.float32), Bp, fp[i]) for i in range(ns)]
    Wp = [_pad2d(Ws[i].astype(jnp.float32), fp[i], fp[i + 1]) for i in range(ns)]
    b_p = [_pad2d(bs[i].reshape(1, -1).astype(jnp.float32), 1, fp[i]) for i in range(ns)]

    # Mixing matrices: pre-transpose / fuse once per launch (not per step).
    M = [None] * ns
    M[0] = Wp[0]                                              # feedback into layer 1
    for j in range(1, ns - 1):
        M[j] = jnp.concatenate([Wp[j - 1].T, Wp[j]], axis=1)  # [fwd into j-1 | back into j+1]
    M[ns - 1] = Wp[ns - 2].T                                  # fwd into layer ns-2
    Mdata = Wp[ns - 1].T                                      # data drive into layer ns-1
    M = [m.astype(compute_dtype) for m in M]
    Mdata = Mdata.astype(compute_dtype)

    kernel = make_epcont_kernel(ns, fp, T, dt, no_clamp, compute_dtype)

    inputs = [data_p] + s_p + M + [Mdata] + b_p

    def batch_spec(feat):
        return pl.BlockSpec((bt, feat), lambda i: (i, 0))

    def resident_spec(shape):
        return pl.BlockSpec(shape, lambda i: (0, 0))

    in_specs = ([batch_spec(fp[ns])]
                + [batch_spec(fp[i]) for i in range(ns)]
                + [resident_spec(m.shape) for m in M]
                + [resident_spec(Mdata.shape)]
                + [resident_spec((1, fp[i])) for i in range(ns)])
    out_specs = tuple(batch_spec(fp[i]) for i in range(ns))
    out_shape = tuple(jax.ShapeDtypeStruct((Bp, fp[i]), jnp.float32) for i in range(ns))

    # VMEM budget: resident weights/biases + double-buffered batch tiles +
    # in-kernel temporaries, capped to the chip's capacity with headroom.
    weight_bytes = (sum(_nbytes(m.shape, compute_dtype) for m in M)
                    + _nbytes(Mdata.shape, compute_dtype))
    bias_bytes = sum(_nbytes((1, fp[i]), jnp.float32) for i in range(ns))
    state_tile = sum(_nbytes((bt, fp[i]), jnp.float32) for i in range(ns))
    data_tile = _nbytes((bt, fp[ns]), jnp.float32)
    needed = (weight_bytes + bias_bytes
              + 2 * (data_tile + 2 * state_tile)   # pipeline double-buffering (in+out)
              + 4 * state_tile                     # rho / fused products / dsdt temporaries
              + (4 << 20))                         # headroom
    try:
        cap = int(getattr(pltpu.get_tpu_info(), "vmem_capacity_bytes", 64 << 20))
    except Exception:
        cap = 64 << 20
    vmem_limit = int(min(max(needed, 32 << 20), int(0.8 * cap)))

    outs = pl.pallas_call(
        kernel,
        out_shape=out_shape,
        grid=(nb,),
        in_specs=in_specs,
        out_specs=out_specs,
        compiler_params=pltpu.CompilerParams(
            dimension_semantics=("parallel",),
            vmem_limit_bytes=vmem_limit),
    )(*inputs)

    # Strip padding.
    return tuple(outs[i][:B, :size_tab[i]] for i in range(ns))


def epcont_forward_ref(data, s_list, Ws, bs, *, T, dt, size_tab, no_clamp=False):
    """Pure-JAX reference (mirrors the PyTorch stepper) for correctness check."""
    ns = len(size_tab) - 1
    s = [jnp.asarray(x) for x in s_list]
    for _ in range(T):
        dsdt = [None] * ns
        dsdt[0] = -s[0] + _rho(s[1]) @ Ws[0].T + bs[0]
        for i in range(1, ns - 1):
            dsdt[i] = -s[i] + _rhop(s[i]) * (
                _rho(s[i + 1]) @ Ws[i].T + bs[i] + _rho(s[i - 1]) @ Ws[i - 1])
        dsdt[ns - 1] = -s[ns - 1] + _rhop(s[ns - 1]) * (
            _rho(data) @ Ws[ns - 1].T + bs[ns - 1] + _rho(s[ns - 2]) @ Ws[ns - 2])
        for i in range(ns):
            s[i] = s[i] + dt * dsdt[i]
            if not no_clamp:
                s[i] = jnp.clip(s[i], 0.0, 1.0)
    return s


if __name__ == "__main__":
    # size_tab[0] = output layer, size_tab[-1] = data dim; ns = len(size_tab)-1 state layers.
    size_tab = (8, 16, 32, 64)
    T, dt = 10, 0.2
    ns = len(size_tab) - 1

    key = jax.random.PRNGKey(0)
    keys = jax.random.split(key, 2 * ns + 2)

    # PyTorch-Linear-like uniform(-1/sqrt(fan_in), +) init.
    Ws, bs = [], []
    for i in range(ns):
        out_f, in_f = size_tab[i], size_tab[i + 1]
        bound = 1.0 / (in_f ** 0.5)
        Ws.append(jax.random.uniform(keys[2 * i], (out_f, in_f),
                                     jnp.float32, -bound, bound))
        bs.append(jax.random.uniform(keys[2 * i + 1], (out_f,),
                                     jnp.float32, -bound, bound))
    Ws, bs = tuple(Ws), tuple(bs)

    # Case 1: small batch, gridless single block (v5e/v6e style), exact f32 math.
    batch = 4
    data = jax.random.uniform(keys[-2], (batch, size_tab[-1]), jnp.float32)
    s0 = tuple(jnp.zeros((batch, size_tab[i]), jnp.float32) for i in range(ns))
    out = jax.block_until_ready(
        epcont_forward(data, s0, Ws, bs, T=T, dt=dt, size_tab=size_tab))
    ref = epcont_forward_ref(data, s0, Ws, bs, T=T, dt=dt, size_tab=size_tab)
    for o, r in zip(out, ref):
        assert o.shape == r.shape and o.dtype == jnp.float32
        assert float(jnp.max(jnp.abs(o - r))) < 1e-3, "f32 kernel/reference mismatch"

    # Case 2: larger batch with a parallel batch grid (v7x-style 2-TC sharding), f32.
    batch2 = 16
    data2 = jax.random.uniform(keys[-1], (batch2, size_tab[-1]), jnp.float32)
    s0_2 = tuple(jnp.zeros((batch2, size_tab[i]), jnp.float32) for i in range(ns))
    out2 = jax.block_until_ready(
        epcont_forward(data2, s0_2, Ws, bs, T=T, dt=dt, size_tab=size_tab,
                       batch_tile=8))
    ref2 = epcont_forward_ref(data2, s0_2, Ws, bs, T=T, dt=dt, size_tab=size_tab)
    for o, r in zip(out2, ref2):
        assert float(jnp.max(jnp.abs(o - r))) < 1e-3, "tiled kernel/reference mismatch"

    # Case 3: bf16 matmul operands (native MXU dtype on v6e/v7x), f32 state/accumulate.
    out_bf = jax.block_until_ready(
        epcont_forward(data, s0, Ws, bs, T=T, dt=dt, size_tab=size_tab,
                       use_bf16=True))
    for o, r in zip(out_bf, ref):
        assert float(jnp.max(jnp.abs(o - r))) < 5e-2, "bf16 kernel/reference mismatch"

    print("KERNEL_OK")
</pallas_src>

<mosaic_0001>
module attributes {stable_mosaic.version = 11 : i64} {
  func.func @kernel(%arg0: i32, %arg1: memref<8x128xf32, #tpu.memory_space<vmem>>, %arg2: memref<8x128xf32, #tpu.memory_space<vmem>>, %arg3: memref<8x128xf32, #tpu.memory_space<vmem>>, %arg4: memref<8x128xf32, #tpu.memory_space<vmem>>, %arg5: memref<128x128xf32, #tpu.memory_space<vmem>>, %arg6: memref<128x256xf32, #tpu.memory_space<vmem>>, %arg7: memref<128x128xf32, #tpu.memory_space<vmem>>, %arg8: memref<128x128xf32, #tpu.memory_space<vmem>>, %arg9: memref<1x128xf32, #tpu.memory_space<vmem>>, %arg10: memref<1x128xf32, #tpu.memory_space<vmem>>, %arg11: memref<1x128xf32, #tpu.memory_space<vmem>>, %arg12: memref<8x128xf32, #tpu.memory_space<vmem>>, %arg13: memref<8x128xf32, #tpu.memory_space<vmem>>, %arg14: memref<8x128xf32, #tpu.memory_space<vmem>>) attributes {dimension_semantics = [#tpu.dimension_semantics<parallel>], iteration_bounds = array<i64: 1>, scalar_prefetch = 0 : i64, scratch_operands = 0 : i64, tpu.core_type = #tpu.core_type<tc>, window_params = [{transform_indices = @transform_0, window_bounds = array<i64: 8, 128>}, {transform_indices = @transform_1, window_bounds = array<i64: 8, 128>}, {transform_indices = @transform_2, window_bounds = array<i64: 8, 128>}, {transform_indices = @transform_3, window_bounds = array<i64: 8, 128>}, {pipeline_mode = #tpu.pipeline_mode<synchronous>, transform_indices = @transform_4, window_bounds = array<i64: 128, 128>}, {pipeline_mode = #tpu.pipeline_mode<synchronous>, transform_indices = @transform_5, window_bounds = array<i64: 128, 256>}, {pipeline_mode = #tpu.pipeline_mode<synchronous>, transform_indices = @transform_6, window_bounds = array<i64: 128, 128>}, {pipeline_mode = #tpu.pipeline_mode<synchronous>, transform_indices = @transform_7, window_bounds = array<i64: 128, 128>}, {pipeline_mode = #tpu.pipeline_mode<synchronous>, transform_indices = @transform_8, window_bounds = array<i64: 1, 128>}, {pipeline_mode = #tpu.pipeline_mode<synchronous>, transform_indices = @transform_9, window_bounds = array<i64: 1, 128>}, {pipeline_mode = #tpu.pipeline_mode<synchronous>, transform_indices = @transform_10, window_bounds = array<i64: 1, 128>}, {transform_indices = @transform_11, window_bounds = array<i64: 8, 128>}, {transform_indices = @transform_12, window_bounds = array<i64: 8, 128>}, {transform_indices = @transform_13, window_bounds = array<i64: 8, 128>}]} {
    %c0 = arith.constant 0 : index
    %c0_0 = arith.constant 0 : index
    %0 = vector.load %arg5[%c0, %c0_0] : memref<128x128xf32, #tpu.memory_space<vmem>>, vector<128x128xf32>
    %c0_1 = arith.constant 0 : index
    %c0_2 = arith.constant 0 : index
    %1 = vector.load %arg6[%c0_1, %c0_2] : memref<128x256xf32, #tpu.memory_space<vmem>>, vector<128x256xf32>
    %c0_3 = arith.constant 0 : index
    %c0_4 = arith.constant 0 : index
    %2 = vector.load %arg7[%c0_3, %c0_4] : memref<128x128xf32, #tpu.memory_space<vmem>>, vector<128x128xf32>
    %c0_5 = arith.constant 0 : index
    %c0_6 = arith.constant 0 : index
    %3 = vector.load %arg8[%c0_5, %c0_6] : memref<128x128xf32, #tpu.memory_space<vmem>>, vector<128x128xf32>
    %c0_7 = arith.constant 0 : index
    %c0_8 = arith.constant 0 : index
    %4 = vector.load %arg1[%c0_7, %c0_8] : memref<8x128xf32, #tpu.memory_space<vmem>>, vector<8x128xf32>
    %cst = arith.constant 0.000000e+00 : f32
    %cst_9 = arith.constant 1.000000e+00 : f32
    %5 = vector.broadcast %cst : f32 to vector<8x128xf32>
    %6 = arith.maximumf %5, %4 : vector<8x128xf32>
    %7 = vector.broadcast %cst_9 : f32 to vector<8x128xf32>
    %8 = arith.minimumf %7, %6 : vector<8x128xf32>
    %cst_10 = arith.constant dense<0.000000e+00> : vector<8x128xf32>
    %9 = tpu.matmul %8, %3, %cst_10 {dimension_numbers = #tpu.dot_dimension_numbers<[1], [0], [0], [1], [0, 0, 1, 1], [], []>} : vector<8x128xf32>, vector<128x128xf32>, vector<8x128xf32> -> vector<8x128xf32>
    %c0_11 = arith.constant 0 : index
    %c0_12 = arith.constant 0 : index
    %10 = vector.load %arg11[%c0_11, %c0_12] : memref<1x128xf32, #tpu.memory_space<vmem>>, vector<1x128xf32>
    %11 = vector.shape_cast %10 : vector<1x128xf32> to vector<1x128xf32>
    %12 = vector.broadcast %11 : vector<1x128xf32> to vector<8x128xf32>
    %13 = arith.addf %9, %12 : vector<8x128xf32>
    %c0_13 = arith.constant 0 : index
    %c0_14 = arith.constant 0 : index
    %14 = vector.load %arg9[%c0_13, %c0_14] : memref<1x128xf32, #tpu.memory_space<vmem>>, vector<1x128xf32>
    %15 = vector.shape_cast %14 : vector<1x128xf32> to vector<1x128xf32>
    %16 = vector.broadcast %15 : vector<1x128xf32> to vector<8x128xf32>
    %c0_15 = arith.constant 0 : index
    %c0_16 = arith.constant 0 : index
    %17 = vector.load %arg10[%c0_15, %c0_16] : memref<1x128xf32, #tpu.memory_space<vmem>>, vector<1x128xf32>
    %18 = vector.shape_cast %17 : vector<1x128xf32> to vector<1x128xf32>
    %19 = vector.broadcast %18 : vector<1x128xf32> to vector<8x128xf32>
    %c0_17 = arith.constant 0 : index
    %c0_18 = arith.constant 0 : index
    %20 = vector.load %arg2[%c0_17, %c0_18] : memref<8x128xf32, #tpu.memory_space<vmem>>, vector<8x128xf32>
    %c0_19 = arith.constant 0 : index
    %c0_20 = arith.constant 0 : index
    %21 = vector.load %arg3[%c0_19, %c0_20] : memref<8x128xf32, #tpu.memory_space<vmem>>, vector<8x128xf32>
    %c0_21 = arith.constant 0 : index
    %c0_22 = arith.constant 0 : index
    %22 = vector.load %arg4[%c0_21, %c0_22] : memref<8x128xf32, #tpu.memory_space<vmem>>, vector<8x128xf32>
    %c0_i32 = arith.constant 0 : i32
    %cst_23 = arith.constant 0.000000e+00 : f32
    %cst_24 = arith.constant 1.000000e+00 : f32
    %23 = vector.broadcast %cst_23 : f32 to vector<8x128xf32>
    %24 = arith.maximumf %23, %20 : vector<8x128xf32>
    %25 = vector.broadcast %cst_24 : f32 to vector<8x128xf32>
    %26 = arith.minimumf %25, %24 : vector<8x128xf32>
    %cst_25 = arith.constant 0.000000e+00 : f32
    %cst_26 = arith.constant 1.000000e+00 : f32
    %27 = vector.broadcast %cst_25 : f32 to vector<8x128xf32>
    %28 = arith.maximumf %27, %21 : vector<8x128xf32>
    %29 = vector.broadcast %cst_26 : f32 to vector<8x128xf32>
    %30 = arith.minimumf %29, %28 : vector<8x128xf32>
    %cst_27 = arith.constant 0.000000e+00 : f32
    %cst_28 = arith.constant 1.000000e+00 : f32
    %31 = vector.broadcast %cst_27 : f32 to vector<8x128xf32>
    %32 = arith.maximumf %31, %22 : vector<8x128xf32>
    %33 = vector.broadcast %cst_28 : f32 to vector<8x128xf32>
    %34 = arith.minimumf %33, %32 : vector<8x128xf32>
    %cst_29 = arith.constant dense<0.000000e+00> : vector<8x128xf32>
    %35 = tpu.matmul %26, %0, %cst_29 {dimension_numbers = #tpu.dot_dimension_numbers<[1], [0], [0], [1], [0, 0, 1, 1], [], []>} : vector<8x128xf32>, vector<128x128xf32>, vector<8x128xf32> -> vector<8x128xf32>
    %cst_30 = arith.constant dense<0.000000e+00> : vector<8x256xf32>
    %36 = tpu.matmul %30, %1, %cst_30 {dimension_numbers = #tpu.dot_dimension_numbers<[1], [0], [0], [1], [0, 0, 1, 1], [], []>} : vector<8x128xf32>, vector<128x256xf32>, vector<8x256xf32> -> vector<8x256xf32>
    %cst_31 = arith.constant dense<0.000000e+00> : vector<8x128xf32>
    %37 = tpu.matmul %34, %2, %cst_31 {dimension_numbers = #tpu.dot_dimension_numbers<[1], [0], [0], [1], [0, 0, 1, 1], [], []>} : vector<8x128xf32>, vector<128x128xf32>, vector<8x128xf32> -> vector<8x128xf32>
    %38 = vector.extract_strided_slice %36 {offsets = [0, 0], sizes = [8, 128], strides = [1, 1]} : vector<8x256xf32> to vector<8x128xf32>
    %39 = vector.extract_strided_slice %36 {offsets = [0, 128], sizes = [8, 128], strides = [1, 1]} : vector<8x256xf32> to vector<8x128xf32>
    %cst_32 = arith.constant 0.000000e+00 : f32
    %40 = vector.broadcast %cst_32 : f32 to vector<8x128xf32>
    %41 = arith.subf %40, %20 : vector<8x128xf32>
    %42 = arith.addf %41, %38 : vector<8x128xf32>
    %43 = arith.addf %42, %16 : vector<8x128xf32>
    %cst_33 = arith.constant 0.000000e+00 : f32
    %44 = vector.broadcast %cst_33 : f32 to vector<8x128xf32>
    %45 = arith.subf %44, %21 : vector<8x128xf32>
    %cst_34 = arith.constant 0.000000e+00 : f32
    %46 = vector.broadcast %cst_34 : f32 to vector<8x128xf32>
    %47 = arith.cmpf oge, %21, %46 : vector<8x128xf32>
    %cst_35 = arith.constant 1.000000e+00 : f32
    %48 = vector.broadcast %cst_35 : f32 to vector<8x128xf32>
    %49 = arith.cmpf ole, %21, %48 : vector<8x128xf32>
    %50 = arith.andi %47, %49 : vector<8x128xi1>
    %51 = arith.extui %50 : vector<8x128xi1> to vector<8x128xi32>
    %52 = arith.sitofp %51 : vector<8x128xi32> to vector<8x128xf32>
    %53 = arith.addf %37, %19 : vector<8x128xf32>
    %54 = arith.addf %53, %35 : vector<8x128xf32>
    %55 = arith.mulf %52, %54 : vector<8x128xf32>
    %56 = arith.addf %45, %55 : vector<8x128xf32>
    %cst_36 = arith.constant 0.000000e+00 : f32
    %57 = vector.broadcast %cst_36 : f32 to vector<8x128xf32>
    %58 = arith.subf %57, %22 : vector<8x128xf32>
    %cst_37 = arith.constant 0.000000e+00 : f32
    %59 = vector.broadcast %cst_37 : f32 to vector<8x128xf32>
    %60 = arith.cmpf oge, %22, %59 : vector<8x128xf32>
    %cst_38 = arith.constant 1.000000e+00 : f32
    %61 = vector.broadcast %cst_38 : f32 to vector<8x128xf32>
    %62 = arith.cmpf ole, %22, %61 : vector<8x128xf32>
    %63 = arith.andi %60, %62 : vector<8x128xi1>
    %64 = arith.extui %63 : vector<8x128xi1> to vector<8x128xi32>
    %65 = arith.sitofp %64 : vector<8x128xi32> to vector<8x128xf32>
    %66 = arith.addf %13, %39 : vector<8x128xf32>
    %67 = arith.mulf %65, %66 : vector<8x128xf32>
    %68 = arith.addf %58, %67 : vector<8x128xf32>
    %cst_39 = arith.constant 2.000000e-01 : f32
    %69 = vector.broadcast %cst_39 : f32 to vector<8x128xf32>
    %70 = arith.mulf %69, %43 : vector<8x128xf32>
    %71 = arith.addf %20, %70 : vector<8x128xf32>
    %cst_40 = arith.constant 0.000000e+00 : f32
    %cst_41 = arith.constant 1.000000e+00 : f32
    %72 = vector.broadcast %cst_40 : f32 to vector<8x128xf32>
    %73 = arith.maximumf %72, %71 : vector<8x128xf32>
    %74 = vector.broadcast %cst_41 : f32 to vector<8x128xf32>
    %75 = arith.minimumf %74, %73 : vector<8x128xf32>
    %cst_42 = arith.constant 2.000000e-01 : f32
    %76 = vector.broadcast %cst_42 : f32 to vector<8x128xf32>
    %77 = arith.mulf %76, %56 : vector<8x128xf32>
    %78 = arith.addf %21, %77 : vector<8x128xf32>
    %cst_43 = arith.constant 0.000000e+00 : f32
    %cst_44 = arith.constant 1.000000e+00 : f32
    %79 = vector.broadcast %cst_43 : f32 to vector<8x128xf32>
    %80 = arith.maximumf %79, %78 : vector<8x128xf32>
    %81 = vector.broadcast %cst_44 : f32 to vector<8x128xf32>
    %82 = arith.minimumf %81, %80 : vector<8x128xf32>
    %cst_45 = arith.constant 2.000000e-01 : f32
    %83 = vector.broadcast %cst_45 : f32 to vector<8x128xf32>
    %84 = arith.mulf %83, %68 : vector<8x128xf32>
    %85 = arith.addf %22, %84 : vector<8x128xf32>
    %cst_46 = arith.constant 0.000000e+00 : f32
    %cst_47 = arith.constant 1.000000e+00 : f32
    %86 = vector.broadcast %cst_46 : f32 to vector<8x128xf32>
    %87 = arith.maximumf %86, %85 : vector<8x128xf32>
    %88 = vector.broadcast %cst_47 : f32 to vector<8x128xf32>
    %89 = arith.minimumf %88, %87 : vector<8x128xf32>
    %c1_i32 = arith.constant 1 : i32
    %cst_48 = arith.constant 0.000000e+00 : f32
    %cst_49 = arith.constant 1.000000e+00 : f32
    %90 = vector.broadcast %cst_48 : f32 to vector<8x128xf32>
    %91 = arith.maximumf %90, %75 : vector<8x128xf32>
    %92 = vector.broadcast %cst_49 : f32 to vector<8x128xf32>
    %93 = arith.minimumf %92, %91 : vector<8x128xf32>
    %cst_50 = arith.constant 0.000000e+00 : f32
    %cst_51 = arith.constant 1.000000e+00 : f32
    %94 = vector.broadcast %cst_50 : f32 to vector<8x128xf32>
    %95 = arith.maximumf %94, %82 : vector<8x128xf32>
    %96 = vector.broadcast %cst_51 : f32 to vector<8x128xf32>
    %97 = arith.minimumf %96, %95 : vector<8x128xf32>
    %cst_52 = arith.constant 0.000000e+00 : f32
    %cst_53 = arith.constant 1.000000e+00 : f32
    %98 = vector.broadcast %cst_52 : f32 to vector<8x128xf32>
    %99 = arith.maximumf %98, %89 : vector<8x128xf32>
    %100 = vector.broadcast %cst_53 : f32 to vector<8x128xf32>
    %101 = arith.minimumf %100, %99 : vector<8x128xf32>
    %cst_54 = arith.constant dense<0.000000e+00> : vector<8x128xf32>
    %102 = tpu.matmul %93, %0, %cst_54 {dimension_numbers = #tpu.dot_dimension_numbers<[1], [0], [0], [1], [0, 0, 1, 1], [], []>} : vector<8x128xf32>, vector<128x128xf32>, vector<8x128xf32> -> vector<8x128xf32>
    %cst_55 = arith.constant dense<0.000000e+00> : vector<8x256xf32>
    %103 = tpu.matmul %97, %1, %cst_55 {dimension_numbers = #tpu.dot_dimension_numbers<[1], [0], [0], [1], [0, 0, 1, 1], [], []>} : vector<8x128xf32>, vector<128x256xf32>, vector<8x256xf32> -> vector<8x256xf32>
    %cst_56 = arith.constant dense<0.000000e+00> : vector<8x128xf32>
    %104 = tpu.matmul %101, %2, %cst_56 {dimension_numbers = #tpu.dot_dimension_numbers<[1], [0], [0], [1], [0, 0, 1, 1], [], []>} : vector<8x128xf32>, vector<128x128xf32>, vector<8x128xf32> -> vector<8x128xf32>
    %105 = vector.extract_strided_slice %103 {offsets = [0, 0], sizes = [8, 128], strides = [1, 1]} : vector<8x256xf32> to vector<8x128xf32>
    %106 = vector.extract_strided_slice %103 {offsets = [0, 128], sizes = [8, 128], strides = [1, 1]} : vector<8x256xf32> to vector<8x128xf32>
    %cst_57 = arith.constant 0.000000e+00 : f32
    %107 = vector.broadcast %cst_57 : f32 to vector<8x128xf32>
    %108 = arith.subf %107, %75 : vector<8x128xf32>
    %109 = arith.addf %108, %105 : vector<8x128xf32>
    %110 = arith.addf %109, %16 : vector<8x128xf32>
    %cst_58 = arith.constant 0.000000e+00 : f32
    %111 = vector.broadcast %cst_58 : f32 to vector<8x128xf32>
    %112 = arith.subf %111, %82 : vector<8x128xf32>
    %cst_59 = arith.constant 0.000000e+00 : f32
    %113 = vector.broadcast %cst_59 : f32 to vector<8x128xf32>
    %114 = arith.cmpf oge, %82, %113 : vector<8x128xf32>
    %cst_60 = arith.constant 1.000000e+00 : f32
    %115 = vector.broadcast %cst_60 : f32 to vector<8x128xf32>
    %116 = arith.cmpf ole, %82, %115 : vector<8x128xf32>
    %117 = arith.andi %114, %116 : vector<8x128xi1>
    %118 = arith.extui %117 : vector<8x128xi1> to vector<8x128xi32>
    %119 = arith.sitofp %118 : vector<8x128xi32> to vector<8x128xf32>
    %120 = arith.addf %104, %19 : vector<8x128xf32>
    %121 = arith.addf %120, %102 : vector<8x128xf32>
    %122 = arith.mulf %119, %121 : vector<8x128xf32>
    %123 = arith.addf %112, %122 : vector<8x128xf32>
    %cst_61 = arith.constant 0.000000e+00 : f32
    %124 = vector.broadcast %cst_61 : f32 to vector<8x128xf32>
    %125 = arith.subf %124, %89 : vector<8x128xf32>
    %cst_62 = arith.constant 0.000000e+00 : f32
    %126 = vector.broadcast %cst_62 : f32 to vector<8x128xf32>
    %127 = arith.cmpf oge, %89, %126 : vector<8x128xf32>
    %cst_63 = arith.constant 1.000000e+00 : f32
    %128 = vector.broadcast %cst_63 : f32 to vector<8x128xf32>
    %129 = arith.cmpf ole, %89, %128 : vector<8x128xf32>
    %130 = arith.andi %127, %129 : vector<8x128xi1>
    %131 = arith.extui %130 : vector<8x128xi1> to vector<8x128xi32>
    %132 = arith.sitofp %131 : vector<8x128xi32> to vector<8x128xf32>
    %133 = arith.addf %13, %106 : vector<8x128xf32>
    %134 = arith.mulf %132, %133 : vector<8x128xf32>
    %135 = arith.addf %125, %134 : vector<8x128xf32>
    %cst_64 = arith.constant 2.000000e-01 : f32
    %136 = vector.broadcast %cst_64 : f32 to vector<8x128xf32>
    %137 = arith.mulf %136, %110 : vector<8x128xf32>
    %138 = arith.addf %75, %137 : vector<8x128xf32>
    %cst_65 = arith.constant 0.000000e+00 : f32
    %cst_66 = arith.constant 1.000000e+00 : f32
    %139 = vector.broadcast %cst_65 : f32 to vector<8x128xf32>
    %140 = arith.maximumf %139, %138 : vector<8x128xf32>
    %141 = vector.broadcast %cst_66 : f32 to vector<8x128xf32>
    %142 = arith.minimumf %141, %140 : vector<8x128xf32>
    %cst_67 = arith.constant 2.000000e-01 : f32
    %143 = vector.broadcast %cst_67 : f32 to vector<8x128xf32>
    %144 = arith.mulf %143, %123 : vector<8x128xf32>
    %145 = arith.addf %82, %144 : vector<8x128xf32>
    %cst_68 = arith.constant 0.000000e+00 : f32
    %cst_69 = arith.constant 1.000000e+00 : f32
    %146 = vector.broadcast %cst_68 : f32 to vector<8x128xf32>
    %147 = arith.maximumf %146, %145 : vector<8x128xf32>
    %148 = vector.broadcast %cst_69 : f32 to vector<8x128xf32>
    %149 = arith.minimumf %148, %147 : vector<8x128xf32>
    %cst_70 = arith.constant 2.000000e-01 : f32
    %150 = vector.broadcast %cst_70 : f32 to vector<8x128xf32>
    %151 = arith.mulf %150, %135 : vector<8x128xf32>
    %152 = arith.addf %89, %151 : vector<8x128xf32>
    %cst_71 = arith.constant 0.000000e+00 : f32
    %cst_72 = arith.constant 1.000000e+00 : f32
    %153 = vector.broadcast %cst_71 : f32 to vector<8x128xf32>
    %154 = arith.maximumf %153, %152 : vector<8x128xf32>
    %155 = vector.broadcast %cst_72 : f32 to vector<8x128xf32>
    %156 = arith.minimumf %155, %154 : vector<8x128xf32>
    %c2_i32 = arith.constant 2 : i32
    %cst_73 = arith.constant 0.000000e+00 : f32
    %cst_74 = arith.constant 1.000000e+00 : f32
    %157 = vector.broadcast %cst_73 : f32 to vector<8x128xf32>
    %158 = arith.maximumf %157, %142 : vector<8x128xf32>
    %159 = vector.broadcast %cst_74 : f32 to vector<8x128xf32>
    %160 = arith.minimumf %159, %158 : vector<8x128xf32>
    %cst_75 = arith.constant 0.000000e+00 : f32
    %cst_76 = arith.constant 1.000000e+00 : f32
    %161 = vector.broadcast %cst_75 : f32 to vector<8x128xf32>
    %162 = arith.maximumf %161, %149 : vector<8x128xf32>
    %163 = vector.broadcast %cst_76 : f32 to vector<8x128xf32>
    %164 = arith.minimumf %163, %162 : vector<8x128xf32>
    %cst_77 = arith.constant 0.000000e+00 : f32
    %cst_78 = arith.constant 1.000000e+00 : f32
    %165 = vector.broadcast %cst_77 : f32 to vector<8x128xf32>
    %166 = arith.maximumf %165, %156 : vector<8x128xf32>
    %167 = vector.broadcast %cst_78 : f32 to vector<8x128xf32>
    %168 = arith.minimumf %167, %166 : vector<8x128xf32>
    %cst_79 = arith.constant dense<0.000000e+00> : vector<8x128xf32>
    %169 = tpu.matmul %160, %0, %cst_79 {dimension_numbers = #tpu.dot_dimension_numbers<[1], [0], [0], [1], [0, 0, 1, 1], [], []>} : vector<8x128xf32>, vector<128x128xf32>, vector<8x128xf32> -> vector<8x128xf32>
    %cst_80 = arith.constant dense<0.000000e+00> : vector<8x256xf32>
    %170 = tpu.matmul %164, %1, %cst_80 {dimension_numbers = #tpu.dot_dimension_numbers<[1], [0], [0], [1], [0, 0, 1, 1], [], []>} : vector<8x128xf32>, vector<128x256xf32>, vector<8x256xf32> -> vector<8x256xf32>
    %cst_81 = arith.constant dense<0.000000e+00> : vector<8x128xf32>
    %171 = tpu.matmul %168, %2, %cst_81 {dimension_numbers = #tpu.dot_dimension_numbers<[1], [0], [0], [1], [0, 0, 1, 1], [], []>} : vector<8x128xf32>, vector<128x128xf32>, vector<8x128xf32> -> vector<8x128xf32>
    %172 = vector.extract_strided_slice %170 {offsets = [0, 0], sizes = [8, 128], strides = [1, 1]} : vector<8x256xf32> to vector<8x128xf32>
    %173 = vector.extract_strided_slice %170 {offsets = [0, 128], sizes = [8, 128], strides = [1, 1]} : vector<8x256xf32> to vector<8x128xf32>
    %cst_82 = arith.constant 0.000000e+00 : f32
    %174 = vector.broadcast %cst_82 : f32 to vector<8x128xf32>
    %175 = arith.subf %174, %142 : vector<8x128xf32>
    %176 = arith.addf %175, %172 : vector<8x128xf32>
    %177 = arith.addf %176, %16 : vector<8x128xf32>
    %cst_83 = arith.constant 0.000000e+00 : f32
    %178 = vector.broadcast %cst_83 : f32 to vector<8x128xf32>
    %179 = arith.subf %178, %149 : vector<8x128xf32>
    %cst_84 = arith.constant 0.000000e+00 : f32
    %180 = vector.broadcast %cst_84 : f32 to vector<8x128xf32>
    %181 = arith.cmpf oge, %149, %180 : vector<8x128xf32>
    %cst_85 = arith.constant 1.000000e+00 : f32
    %182 = vector.broadcast %cst_85 : f32 to vector<8x128xf32>
    %183 = arith.cmpf ole, %149, %182 : vector<8x128xf32>
    %184 = arith.andi %181, %183 : vector<8x128xi1>
    %185 = arith.extui %184 : vector<8x128xi1> to vector<8x128xi32>
    %186 = arith.sitofp %185 : vector<8x128xi32> to vector<8x128xf32>
    %187 = arith.addf %171, %19 : vector<8x128xf32>
    %188 = arith.addf %187, %169 : vector<8x128xf32>
    %189 = arith.mulf %186, %188 : vector<8x128xf32>
    %190 = arith.addf %179, %189 : vector<8x128xf32>
    %cst_86 = arith.constant 0.000000e+00 : f32
    %191 = vector.broadcast %cst_86 : f32 to vector<8x128xf32>
    %192 = arith.subf %191, %156 : vector<8x128xf32>
    %cst_87 = arith.constant 0.000000e+00 : f32
    %193 = vector.broadcast %cst_87 : f32 to vector<8x128xf32>
    %194 = arith.cmpf oge, %156, %193 : vector<8x128xf32>
    %cst_88 = arith.constant 1.000000e+00 : f32
    %195 = vector.broadcast %cst_88 : f32 to vector<8x128xf32>
    %196 = arith.cmpf ole, %156, %195 : vector<8x128xf32>
    %197 = arith.andi %194, %196 : vector<8x128xi1>
    %198 = arith.extui %197 : vector<8x128xi1> to vector<8x128xi32>
    %199 = arith.sitofp %198 : vector<8x128xi32> to vector<8x128xf32>
    %200 = arith.addf %13, %173 : vector<8x128xf32>
    %201 = arith.mulf %199, %200 : vector<8x128xf32>
    %202 = arith.addf %192, %201 : vector<8x128xf32>
    %cst_89 = arith.constant 2.000000e-01 : f32
    %203 = vector.broadcast %cst_89 : f32 to vector<8x128xf32>
    %204 = arith.mulf %203, %177 : vector<8x128xf32>
    %205 = arith.addf %142, %204 : vector<8x128xf32>
    %cst_90 = arith.constant 0.000000e+00 : f32
    %cst_91 = arith.constant 1.000000e+00 : f32
    %206 = vector.broadcast %cst_90 : f32 to vector<8x128xf32>
    %207 = arith.maximumf %206, %205 : vector<8x128xf32>
    %208 = vector.broadcast %cst_91 : f32 to vector<8x128xf32>
    %209 = arith.minimumf %208, %207 : vector<8x128xf32>
    %cst_92 = arith.constant 2.000000e-01 : f32
    %210 = vector.broadcast %cst_92 : f32 to vector<8x128xf32>
    %211 = arith.mulf %210, %190 : vector<8x128xf32>
    %212 = arith.addf %149, %211 : vector<8x128xf32>
    %cst_93 = arith.constant 0.000000e+00 : f32
    %cst_94 = arith.constant 1.000000e+00 : f32
    %213 = vector.broadcast %cst_93 : f32 to vector<8x128xf32>
    %214 = arith.maximumf %213, %212 : vector<8x128xf32>
    %215 = vector.broadcast %cst_94 : f32 to vector<8x128xf32>
    %216 = arith.minimumf %215, %214 : vector<8x128xf32>
    %cst_95 = arith.constant 2.000000e-01 : f32
    %217 = vector.broadcast %cst_95 : f32 to vector<8x128xf32>
    %218 = arith.mulf %217, %202 : vector<8x128xf32>
    %219 = arith.addf %156, %218 : vector<8x128xf32>
    %cst_96 = arith.constant 0.000000e+00 : f32
    %cst_97 = arith.constant 1.000000e+00 : f32
    %220 = vector.broadcast %cst_96 : f32 to vector<8x128xf32>
    %221 = arith.maximumf %220, %219 : vector<8x128xf32>
    %222 = vector.broadcast %cst_97 : f32 to vector<8x128xf32>
    %223 = arith.minimumf %222, %221 : vector<8x128xf32>
    %c3_i32 = arith.constant 3 : i32
    %cst_98 = arith.constant 0.000000e+00 : f32
    %cst_99 = arith.constant 1.000000e+00 : f32
    %224 = vector.broadcast %cst_98 : f32 to vector<8x128xf32>
    %225 = arith.maximumf %224, %209 : vector<8x128xf32>
    %226 = vector.broadcast %cst_99 : f32 to vector<8x128xf32>
    %227 = arith.minimumf %226, %225 : vector<8x128xf32>
    %cst_100 = arith.constant 0.000000e+00 : f32
    %cst_101 = arith.constant 1.000000e+00 : f32
    %228 = vector.broadcast %cst_100 : f32 to vector<8x128xf32>
    %229 = arith.maximumf %228, %216 : vector<8x128xf32>
    %230 = vector.broadcast %cst_101 : f32 to vector<8x128xf32>
    %231 = arith.minimumf %230, %229 : vector<8x128xf32>
    %cst_102 = arith.constant 0.000000e+00 : f32
    %cst_103 = arith.constant 1.000000e+00 : f32
    %232 = vector.broadcast %cst_102 : f32 to vector<8x128xf32>
    %233 = arith.maximumf %232, %223 : vector<8x128xf32>
    %234 = vector.broadcast %cst_103 : f32 to vector<8x128xf32>
    %235 = arith.minimumf %234, %233 : vector<8x128xf32>
    %cst_104 = arith.constant dense<0.000000e+00> : vector<8x128xf32>
    %236 = tpu.matmul %227, %0, %cst_104 {dimension_numbers = #tpu.dot_dimension_numbers<[1], [0], [0], [1], [0, 0, 1, 1], [], []>} : vector<8x128xf32>, vector<128x128xf32>, vector<8x128xf32> -> vector<8x128xf32>
    %cst_105 = arith.constant dense<0.000000e+00> : vector<8x256xf32>
    %237 = tpu.matmul %231, %1, %cst_105 {dimension_numbers = #tpu.dot_dimension_numbers<[1], [0], [0], [1], [0, 0, 1, 1], [], []>} : vector<8x128xf32>, vector<128x256xf32>, vector<8x256xf32> -> vector<8x256xf32>
    %cst_106 = arith.constant dense<0.000000e+00> : vector<8x128xf32>
    %238 = tpu.matmul %235, %2, %cst_106 {dimension_numbers = #tpu.dot_dimension_numbers<[1], [0], [0], [1], [0, 0, 1, 1], [], []>} : vector<8x128xf32>, vector<128x128xf32>, vector<8x128xf32> -> vector<8x128xf32>
    %239 = vector.extract_strided_slice %237 {offsets = [0, 0], sizes = [8, 128], strides = [1, 1]} : vector<8x256xf32> to vector<8x128xf32>
    %240 = vector.extract_strided_slice %237 {offsets = [0, 128], sizes = [8, 128], strides = [1, 1]} : vector<8x256xf32> to vector<8x128xf32>
    %cst_107 = arith.constant 0.000000e+00 : f32
    %241 = vector.broadcast %cst_107 : f32 to vector<8x128xf32>
    %242 = arith.subf %241, %209 : vector<8x128xf32>
    %243 = arith.addf %242, %239 : vector<8x128xf32>
    %244 = arith.addf %243, %16 : vector<8x128xf32>
    %cst_108 = arith.constant 0.000000e+00 : f32
    %245 = vector.broadcast %cst_108 : f32 to vector<8x128xf32>
    %246 = arith.subf %245, %216 : vector<8x128xf32>
    %cst_109 = arith.constant 0.000000e+00 : f32
    %247 = vector.broadcast %cst_109 : f32 to vector<8x128xf32>
    %248 = arith.cmpf oge, %216, %247 : vector<8x128xf32>
    %cst_110 = arith.constant 1.000000e+00 : f32
    %249 = vector.broadcast %cst_110 : f32 to vector<8x128xf32>
    %250 = arith.cmpf ole, %216, %249 : vector<8x128xf32>
    %251 = arith.andi %248, %250 : vector<8x128xi1>
    %252 = arith.extui %251 : vector<8x128xi1> to vector<8x128xi32>
    %253 = arith.sitofp %252 : vector<8x128xi32> to vector<8x128xf32>
    %254 = arith.addf %238, %19 : vector<8x128xf32>
    %255 = arith.addf %254, %236 : vector<8x128xf32>
    %256 = arith.mulf %253, %255 : vector<8x128xf32>
    %257 = arith.addf %246, %256 : vector<8x128xf32>
    %cst_111 = arith.constant 0.000000e+00 : f32
    %258 = vector.broadcast %cst_111 : f32 to vector<8x128xf32>
    %259 = arith.subf %258, %223 : vector<8x128xf32>
    %cst_112 = arith.constant 0.000000e+00 : f32
    %260 = vector.broadcast %cst_112 : f32 to vector<8x128xf32>
    %261 = arith.cmpf oge, %223, %260 : vector<8x128xf32>
    %cst_113 = arith.constant 1.000000e+00 : f32
    %262 = vector.broadcast %cst_113 : f32 to vector<8x128xf32>
    %263 = arith.cmpf ole, %223, %262 : vector<8x128xf32>
    %264 = arith.andi %261, %263 : vector<8x128xi1>
    %265 = arith.extui %264 : vector<8x128xi1> to vector<8x128xi32>
    %266 = arith.sitofp %265 : vector<8x128xi32> to vector<8x128xf32>
    %267 = arith.addf %13, %240 : vector<8x128xf32>
    %268 = arith.mulf %266, %267 : vector<8x128xf32>
    %269 = arith.addf %259, %268 : vector<8x128xf32>
    %cst_114 = arith.constant 2.000000e-01 : f32
    %270 = vector.broadcast %cst_114 : f32 to vector<8x128xf32>
    %271 = arith.mulf %270, %244 : vector<8x128xf32>
    %272 = arith.addf %209, %271 : vector<8x128xf32>
    %cst_115 = arith.constant 0.000000e+00 : f32
    %cst_116 = arith.constant 1.000000e+00 : f32
    %273 = vector.broadcast %cst_115 : f32 to vector<8x128xf32>
    %274 = arith.maximumf %273, %272 : vector<8x128xf32>
    %275 = vector.broadcast %cst_116 : f32 to vector<8x128xf32>
    %276 = arith.minimumf %275, %274 : vector<8x128xf32>
    %cst_117 = arith.constant 2.000000e-01 : f32
    %277 = vector.broadcast %cst_117 : f32 to vector<8x128xf32>
    %278 = arith.mulf %277, %257 : vector<8x128xf32>
    %279 = arith.addf %216, %278 : vector<8x128xf32>
    %cst_118 = arith.constant 0.000000e+00 : f32
    %cst_119 = arith.constant 1.000000e+00 : f32
    %280 = vector.broadcast %cst_118 : f32 to vector<8x128xf32>
    %281 = arith.maximumf %280, %279 : vector<8x128xf32>
    %282 = vector.broadcast %cst_119 : f32 to vector<8x128xf32>
    %283 = arith.minimumf %282, %281 : vector<8x128xf32>
    %cst_120 = arith.constant 2.000000e-01 : f32
    %284 = vector.broadcast %cst_120 : f32 to vector<8x128xf32>
    %285 = arith.mulf %284, %269 : vector<8x128xf32>
    %286 = arith.addf %223, %285 : vector<8x128xf32>
    %cst_121 = arith.constant 0.000000e+00 : f32
    %cst_122 = arith.constant 1.000000e+00 : f32
    %287 = vector.broadcast %cst_121 : f32 to vector<8x128xf32>
    %288 = arith.maximumf %287, %286 : vector<8x128xf32>
    %289 = vector.broadcast %cst_122 : f32 to vector<8x128xf32>
    %290 = arith.minimumf %289, %288 : vector<8x128xf32>
    %c4_i32 = arith.constant 4 : i32
    %cst_123 = arith.constant 0.000000e+00 : f32
    %cst_124 = arith.constant 1.000000e+00 : f32
    %291 = vector.broadcast %cst_123 : f32 to vector<8x128xf32>
    %292 = arith.maximumf %291, %276 : vector<8x128xf32>
    %293 = vector.broadcast %cst_124 : f32 to vector<8x128xf32>
    %294 = arith.minimumf %293, %292 : vector<8x128xf32>
    %cst_125 = arith.constant 0.000000e+00 : f32
    %cst_126 = arith.constant 1.000000e+00 : f32
    %295 = vector.broadcast %cst_125 : f32 to vector<8x128xf32>
    %296 = arith.maximumf %295, %283 : vector<8x128xf32>
    %297 = vector.broadcast %cst_126 : f32 to vector<8x128xf32>
    %298 = arith.minimumf %297, %296 : vector<8x128xf32>
    %cst_127 = arith.constant 0.000000e+00 : f32
    %cst_128 = arith.constant 1.000000e+00 : f32
    %299 = vector.broadcast %cst_127 : f32 to vector<8x128xf32>
    %300 = arith.maximumf %299, %290 : vector<8x128xf32>
    %301 = vector.broadcast %cst_128 : f32 to vector<8x128xf32>
    %302 = arith.minimumf %301, %300 : vector<8x128xf32>
    %cst_129 = arith.constant dense<0.000000e+00> : vector<8x128xf32>
    %303 = tpu.matmul %294, %0, %cst_129 {dimension_numbers = #tpu.dot_dimension_numbers<[1], [0], [0], [1], [0, 0, 1, 1], [], []>} : vector<8x128xf32>, vector<128x128xf32>, vector<8x128xf32> -> vector<8x128xf32>
    %cst_130 = arith.constant dense<0.000000e+00> : vector<8x256xf32>
    %304 = tpu.matmul %298, %1, %cst_130 {dimension_numbers = #tpu.dot_dimension_numbers<[1], [0], [0], [1], [0, 0, 1, 1], [], []>} : vector<8x128xf32>, vector<128x256xf32>, vector<8x256xf32> -> vector<8x256xf32>
    %cst_131 = arith.constant dense<0.000000e+00> : vector<8x128xf32>
    %305 = tpu.matmul %302, %2, %cst_131 {dimension_numbers = #tpu.dot_dimension_numbers<[1], [0], [0], [1], [0, 0, 1, 1], [], []>} : vector<8x128xf32>, vector<128x128xf32>, vector<8x128xf32> -> vector<8x128xf32>
    %306 = vector.extract_strided_slice %304 {offsets = [0, 0], sizes = [8, 128], strides = [1, 1]} : vector<8x256xf32> to vector<8x128xf32>
    %307 = vector.extract_strided_slice %304 {offsets = [0, 128], sizes = [8, 128], strides = [1, 1]} : vector<8x256xf32> to vector<8x128xf32>
    %cst_132 = arith.constant 0.000000e+00 : f32
    %308 = vector.broadcast %cst_132 : f32 to vector<8x128xf32>
    %309 = arith.subf %308, %276 : vector<8x128xf32>
    %310 = arith.addf %309, %306 : vector<8x128xf32>
    %311 = arith.addf %310, %16 : vector<8x128xf32>
    %cst_133 = arith.constant 0.000000e+00 : f32
    %312 = vector.broadcast %cst_133 : f32 to vector<8x128xf32>
    %313 = arith.subf %312, %283 : vector<8x128xf32>
    %cst_134 = arith.constant 0.000000e+00 : f32
    %314 = vector.broadcast %cst_134 : f32 to vector<8x128xf32>
    %315 = arith.cmpf oge, %283, %314 : vector<8x128xf32>
    %cst_135 = arith.constant 1.000000e+00 : f32
    %316 = vector.broadcast %cst_135 : f32 to vector<8x128xf32>
    %317 = arith.cmpf ole, %283, %316 : vector<8x128xf32>
    %318 = arith.andi %315, %317 : vector<8x128xi1>
    %319 = arith.extui %318 : vector<8x128xi1> to vector<8x128xi32>
    %320 = arith.sitofp %319 : vector<8x128xi32> to vector<8x128xf32>
    %321 = arith.addf %305, %19 : vector<8x128xf32>
    %322 = arith.addf %321, %303 : vector<8x128xf32>
    %323 = arith.mulf %320, %322 : vector<8x128xf32>
    %324 = arith.addf %313, %323 : vector<8x128xf32>
    %cst_136 = arith.constant 0.000000e+00 : f32
    %325 = vector.broadcast %cst_136 : f32 to vector<8x128xf32>
    %326 = arith.subf %325, %290 : vector<8x128xf32>
    %cst_137 = arith.constant 0.000000e+00 : f32
    %327 = vector.broadcast %cst_137 : f32 to vector<8x128xf32>
    %328 = arith.cmpf oge, %290, %327 : vector<8x128xf32>
    %cst_138 = arith.constant 1.000000e+00 : f32
    %329 = vector.broadcast %cst_138 : f32 to vector<8x128xf32>
    %330 = arith.cmpf ole, %290, %329 : vector<8x128xf32>
    %331 = arith.andi %328, %330 : vector<8x128xi1>
    %332 = arith.extui %331 : vector<8x128xi1> to vector<8x128xi32>
    %333 = arith.sitofp %332 : vector<8x128xi32> to vector<8x128xf32>
    %334 = arith.addf %13, %307 : vector<8x128xf32>
    %335 = arith.mulf %333, %334 : vector<8x128xf32>
    %336 = arith.addf %326, %335 : vector<8x128xf32>
    %cst_139 = arith.constant 2.000000e-01 : f32
    %337 = vector.broadcast %cst_139 : f32 to vector<8x128xf32>
    %338 = arith.mulf %337, %311 : vector<8x128xf32>
    %339 = arith.addf %276, %338 : vector<8x128xf32>
    %cst_140 = arith.constant 0.000000e+00 : f32
    %cst_141 = arith.constant 1.000000e+00 : f32
    %340 = vector.broadcast %cst_140 : f32 to vector<8x128xf32>
    %341 = arith.maximumf %340, %339 : vector<8x128xf32>
    %342 = vector.broadcast %cst_141 : f32 to vector<8x128xf32>
    %343 = arith.minimumf %342, %341 : vector<8x128xf32>
    %cst_142 = arith.constant 2.000000e-01 : f32
    %344 = vector.broadcast %cst_142 : f32 to vector<8x128xf32>
    %345 = arith.mulf %344, %324 : vector<8x128xf32>
    %346 = arith.addf %283, %345 : vector<8x128xf32>
    %cst_143 = arith.constant 0.000000e+00 : f32
    %cst_144 = arith.constant 1.000000e+00 : f32
    %347 = vector.broadcast %cst_143 : f32 to vector<8x128xf32>
    %348 = arith.maximumf %347, %346 : vector<8x128xf32>
    %349 = vector.broadcast %cst_144 : f32 to vector<8x128xf32>
    %350 = arith.minimumf %349, %348 : vector<8x128xf32>
    %cst_145 = arith.constant 2.000000e-01 : f32
    %351 = vector.broadcast %cst_145 : f32 to vector<8x128xf32>
    %352 = arith.mulf %351, %336 : vector<8x128xf32>
    %353 = arith.addf %290, %352 : vector<8x128xf32>
    %cst_146 = arith.constant 0.000000e+00 : f32
    %cst_147 = arith.constant 1.000000e+00 : f32
    %354 = vector.broadcast %cst_146 : f32 to vector<8x128xf32>
    %355 = arith.maximumf %354, %353 : vector<8x128xf32>
    %356 = vector.broadcast %cst_147 : f32 to vector<8x128xf32>
    %357 = arith.minimumf %356, %355 : vector<8x128xf32>
    %c5_i32 = arith.constant 5 : i32
    %cst_148 = arith.constant 0.000000e+00 : f32
    %cst_149 = arith.constant 1.000000e+00 : f32
    %358 = vector.broadcast %cst_148 : f32 to vector<8x128xf32>
    %359 = arith.maximumf %358, %343 : vector<8x128xf32>
    %360 = vector.broadcast %cst_149 : f32 to vector<8x128xf32>
    %361 = arith.minimumf %360, %359 : vector<8x128xf32>
    %cst_150 = arith.constant 0.000000e+00 : f32
    %cst_151 = arith.constant 1.000000e+00 : f32
    %362 = vector.broadcast %cst_150 : f32 to vector<8x128xf32>
    %363 = arith.maximumf %362, %350 : vector<8x128xf32>
    %364 = vector.broadcast %cst_151 : f32 to vector<8x128xf32>
    %365 = arith.minimumf %364, %363 : vector<8x128xf32>
    %cst_152 = arith.constant 0.000000e+00 : f32
    %cst_153 = arith.constant 1.000000e+00 : f32
    %366 = vector.broadcast %cst_152 : f32 to vector<8x128xf32>
    %367 = arith.maximumf %366, %357 : vector<8x128xf32>
    %368 = vector.broadcast %cst_153 : f32 to vector<8x128xf32>
    %369 = arith.minimumf %368, %367 : vector<8x128xf32>
    %cst_154 = arith.constant dense<0.000000e+00> : vector<8x128xf32>
    %370 = tpu.matmul %361, %0, %cst_154 {dimension_numbers = #tpu.dot_dimension_numbers<[1], [0], [0], [1], [0, 0, 1, 1], [], []>} : vector<8x128xf32>, vector<128x128xf32>, vector<8x128xf32> -> vector<8x128xf32>
    %cst_155 = arith.constant dense<0.000000e+00> : vector<8x256xf32>
    %371 = tpu.matmul %365, %1, %cst_155 {dimension_numbers = #tpu.dot_dimension_numbers<[1], [0], [0], [1], [0, 0, 1, 1], [], []>} : vector<8x128xf32>, vector<128x256xf32>, vector<8x256xf32> -> vector<8x256xf32>
    %cst_156 = arith.constant dense<0.000000e+00> : vector<8x128xf32>
    %372 = tpu.matmul %369, %2, %cst_156 {dimension_numbers = #tpu.dot_dimension_numbers<[1], [0], [0], [1], [0, 0, 1, 1], [], []>} : vector<8x128xf32>, vector<128x128xf32>, vector<8x128xf32> -> vector<8x128xf32>
    %373 = vector.extract_strided_slice %371 {offsets = [0, 0], sizes = [8, 128], strides = [1, 1]} : vector<8x256xf32> to vector<8x128xf32>
    %374 = vector.extract_strided_slice %371 {offsets = [0, 128], sizes = [8, 128], strides = [1, 1]} : vector<8x256xf32> to vector<8x128xf32>
    %cst_157 = arith.constant 0.000000e+00 : f32
    %375 = vector.broadcast %cst_157 : f32 to vector<8x128xf32>
    %376 = arith.subf %375, %343 : vector<8x128xf32>
    %377 = arith.addf %376, %373 : vector<8x128xf32>
    %378 = arith.addf %377, %16 : vector<8x128xf32>
    %cst_158 = arith.constant 0.000000e+00 : f32
    %379 = vector.broadcast %cst_158 : f32 to vector<8x128xf32>
    %380 = arith.subf %379, %350 : vector<8x128xf32>
    %cst_159 = arith.constant 0.000000e+00 : f32
    %381 = vector.broadcast %cst_159 : f32 to vector<8x128xf32>
    %382 = arith.cmpf oge, %350, %381 : vector<8x128xf32>
    %cst_160 = arith.constant 1.000000e+00 : f32
    %383 = vector.broadcast %cst_160 : f32 to vector<8x128xf32>
    %384 = arith.cmpf ole, %350, %383 : vector<8x128xf32>
    %385 = arith.andi %382, %384 : vector<8x128xi1>
    %386 = arith.extui %385 : vector<8x128xi1> to vector<8x128xi32>
    %387 = arith.sitofp %386 : vector<8x128xi32> to vector<8x128xf32>
    %388 = arith.addf %372, %19 : vector<8x128xf32>
    %389 = arith.addf %388, %370 : vector<8x128xf32>
    %390 = arith.mulf %387, %389 : vector<8x128xf32>
    %391 = arith.addf %380, %390 : vector<8x128xf32>
    %cst_161 = arith.constant 0.000000e+00 : f32
    %392 = vector.broadcast %cst_161 : f32 to vector<8x128xf32>
    %393 = arith.subf %392, %357 : vector<8x128xf32>
    %cst_162 = arith.constant 0.000000e+00 : f32
    %394 = vector.broadcast %cst_162 : f32 to vector<8x128xf32>
    %395 = arith.cmpf oge, %357, %394 : vector<8x128xf32>
    %cst_163 = arith.constant 1.000000e+00 : f32
    %396 = vector.broadcast %cst_163 : f32 to vector<8x128xf32>
    %397 = arith.cmpf ole, %357, %396 : vector<8x128xf32>
    %398 = arith.andi %395, %397 : vector<8x128xi1>
    %399 = arith.extui %398 : vector<8x128xi1> to vector<8x128xi32>
    %400 = arith.sitofp %399 : vector<8x128xi32> to vector<8x128xf32>
    %401 = arith.addf %13, %374 : vector<8x128xf32>
    %402 = arith.mulf %400, %401 : vector<8x128xf32>
    %403 = arith.addf %393, %402 : vector<8x128xf32>
    %cst_164 = arith.constant 2.000000e-01 : f32
    %404 = vector.broadcast %cst_164 : f32 to vector<8x128xf32>
    %405 = arith.mulf %404, %378 : vector<8x128xf32>
    %406 = arith.addf %343, %405 : vector<8x128xf32>
    %cst_165 = arith.constant 0.000000e+00 : f32
    %cst_166 = arith.constant 1.000000e+00 : f32
    %407 = vector.broadcast %cst_165 : f32 to vector<8x128xf32>
    %408 = arith.maximumf %407, %406 : vector<8x128xf32>
    %409 = vector.broadcast %cst_166 : f32 to vector<8x128xf32>
    %410 = arith.minimumf %409, %408 : vector<8x128xf32>
    %cst_167 = arith.constant 2.000000e-01 : f32
    %411 = vector.broadcast %cst_167 : f32 to vector<8x128xf32>
    %412 = arith.mulf %411, %391 : vector<8x128xf32>
    %413 = arith.addf %350, %412 : vector<8x128xf32>
    %cst_168 = arith.constant 0.000000e+00 : f32
    %cst_169 = arith.constant 1.000000e+00 : f32
    %414 = vector.broadcast %cst_168 : f32 to vector<8x128xf32>
    %415 = arith.maximumf %414, %413 : vector<8x128xf32>
    %416 = vector.broadcast %cst_169 : f32 to vector<8x128xf32>
    %417 = arith.minimumf %416, %415 : vector<8x128xf32>
    %cst_170 = arith.constant 2.000000e-01 : f32
    %418 = vector.broadcast %cst_170 : f32 to vector<8x128xf32>
    %419 = arith.mulf %418, %403 : vector<8x128xf32>
    %420 = arith.addf %357, %419 : vector<8x128xf32>
    %cst_171 = arith.constant 0.000000e+00 : f32
    %cst_172 = arith.constant 1.000000e+00 : f32
    %421 = vector.broadcast %cst_171 : f32 to vector<8x128xf32>
    %422 = arith.maximumf %421, %420 : vector<8x128xf32>
    %423 = vector.broadcast %cst_172 : f32 to vector<8x128xf32>
    %424 = arith.minimumf %423, %422 : vector<8x128xf32>
    %c6_i32 = arith.constant 6 : i32
    %cst_173 = arith.constant 0.000000e+00 : f32
    %cst_174 = arith.constant 1.000000e+00 : f32
    %425 = vector.broadcast %cst_173 : f32 to vector<8x128xf32>
    %426 = arith.maximumf %425, %410 : vector<8x128xf32>
    %427 = vector.broadcast %cst_174 : f32 to vector<8x128xf32>
    %428 = arith.minimumf %427, %426 : vector<8x128xf32>
    %cst_175 = arith.constant 0.000000e+00 : f32
    %cst_176 = arith.constant 1.000000e+00 : f32
    %429 = vector.broadcast %cst_175 : f32 to vector<8x128xf32>
    %430 = arith.maximumf %429, %417 : vector<8x128xf32>
    %431 = vector.broadcast %cst_176 : f32 to vector<8x128xf32>
    %432 = arith.minimumf %431, %430 : vector<8x128xf32>
    %cst_177 = arith.constant 0.000000e+00 : f32
    %cst_178 = arith.constant 1.000000e+00 : f32
    %433 = vector.broadcast %cst_177 : f32 to vector<8x128xf32>
    %434 = arith.maximumf %433, %424 : vector<8x128xf32>
    %435 = vector.broadcast %cst_178 : f32 to vector<8x128xf32>
    %436 = arith.minimumf %435, %434 : vector<8x128xf32>
    %cst_179 = arith.constant dense<0.000000e+00> : vector<8x128xf32>
    %437 = tpu.matmul %428, %0, %cst_179 {dimension_numbers = #tpu.dot_dimension_numbers<[1], [0], [0], [1], [0, 0, 1, 1], [], []>} : vector<8x128xf32>, vector<128x128xf32>, vector<8x128xf32> -> vector<8x128xf32>
    %cst_180 = arith.constant dense<0.000000e+00> : vector<8x256xf32>
    %438 = tpu.matmul %432, %1, %cst_180 {dimension_numbers = #tpu.dot_dimension_numbers<[1], [0], [0], [1], [0, 0, 1, 1], [], []>} : vector<8x128xf32>, vector<128x256xf32>, vector<8x256xf32> -> vector<8x256xf32>
    %cst_181 = arith.constant dense<0.000000e+00> : vector<8x128xf32>
    %439 = tpu.matmul %436, %2, %cst_181 {dimension_numbers = #tpu.dot_dimension_numbers<[1], [0], [0], [1], [0, 0, 1, 1], [], []>} : vector<8x128xf32>, vector<128x128xf32>, vector<8x128xf32> -> vector<8x128xf32>
    %440 = vector.extract_strided_slice %438 {offsets = [0, 0], sizes = [8, 128], strides = [1, 1]} : vector<8x256xf32> to vector<8x128xf32>
    %441 = vector.extract_strided_slice %438 {offsets = [0, 128], sizes = [8, 128], strides = [1, 1]} : vector<8x256xf32> to vector<8x128xf32>
    %cst_182 = arith.constant 0.000000e+00 : f32
    %442 = vector.broadcast %cst_182 : f32 to vector<8x128xf32>
    %443 = arith.subf %442, %410 : vector<8x128xf32>
    %444 = arith.addf %443, %440 : vector<8x128xf32>
    %445 = arith.addf %444, %16 : vector<8x128xf32>
    %cst_183 = arith.constant 0.000000e+00 : f32
    %446 = vector.broadcast %cst_183 : f32 to vector<8x128xf32>
    %447 = arith.subf %446, %417 : vector<8x128xf32>
    %cst_184 = arith.constant 0.000000e+00 : f32
    %448 = vector.broadcast %cst_184 : f32 to vector<8x128xf32>
    %449 = arith.cmpf oge, %417, %448 : vector<8x128xf32>
    %cst_185 = arith.constant 1.000000e+00 : f32
    %450 = vector.broadcast %cst_185 : f32 to vector<8x128xf32>
    %451 = arith.cmpf ole, %417, %450 : vector<8x128xf32>
    %452 = arith.andi %449, %451 : vector<8x128xi1>
    %453 = arith.extui %452 : vector<8x128xi1> to vector<8x128xi32>
    %454 = arith.sitofp %453 : vector<8x128xi32> to vector<8x128xf32>
    %455 = arith.addf %439, %19 : vector<8x128xf32>
    %456 = arith.addf %455, %437 : vector<8x128xf32>
    %457 = arith.mulf %454, %456 : vector<8x128xf32>
    %458 = arith.addf %447, %457 : vector<8x128xf32>
    %cst_186 = arith.constant 0.000000e+00 : f32
    %459 = vector.broadcast %cst_186 : f32 to vector<8x128xf32>
    %460 = arith.subf %459, %424 : vector<8x128xf32>
    %cst_187 = arith.constant 0.000000e+00 : f32
    %461 = vector.broadcast %cst_187 : f32 to vector<8x128xf32>
    %462 = arith.cmpf oge, %424, %461 : vector<8x128xf32>
    %cst_188 = arith.constant 1.000000e+00 : f32
    %463 = vector.broadcast %cst_188 : f32 to vector<8x128xf32>
    %464 = arith.cmpf ole, %424, %463 : vector<8x128xf32>
    %465 = arith.andi %462, %464 : vector<8x128xi1>
    %466 = arith.extui %465 : vector<8x128xi1> to vector<8x128xi32>
    %467 = arith.sitofp %466 : vector<8x128xi32> to vector<8x128xf32>
    %468 = arith.addf %13, %441 : vector<8x128xf32>
    %469 = arith.mulf %467, %468 : vector<8x128xf32>
    %470 = arith.addf %460, %469 : vector<8x128xf32>
    %cst_189 = arith.constant 2.000000e-01 : f32
    %471 = vector.broadcast %cst_189 : f32 to vector<8x128xf32>
    %472 = arith.mulf %471, %445 : vector<8x128xf32>
    %473 = arith.addf %410, %472 : vector<8x128xf32>
    %cst_190 = arith.constant 0.000000e+00 : f32
    %cst_191 = arith.constant 1.000000e+00 : f32
    %474 = vector.broadcast %cst_190 : f32 to vector<8x128xf32>
    %475 = arith.maximumf %474, %473 : vector<8x128xf32>
    %476 = vector.broadcast %cst_191 : f32 to vector<8x128xf32>
    %477 = arith.minimumf %476, %475 : vector<8x128xf32>
    %cst_192 = arith.constant 2.000000e-01 : f32
    %478 = vector.broadcast %cst_192 : f32 to vector<8x128xf32>
    %479 = arith.mulf %478, %458 : vector<8x128xf32>
    %480 = arith.addf %417, %479 : vector<8x128xf32>
    %cst_193 = arith.constant 0.000000e+00 : f32
    %cst_194 = arith.constant 1.000000e+00 : f32
    %481 = vector.broadcast %cst_193 : f32 to vector<8x128xf32>
    %482 = arith.maximumf %481, %480 : vector<8x128xf32>
    %483 = vector.broadcast %cst_194 : f32 to vector<8x128xf32>
    %484 = arith.minimumf %483, %482 : vector<8x128xf32>
    %cst_195 = arith.constant 2.000000e-01 : f32
    %485 = vector.broadcast %cst_195 : f32 to vector<8x128xf32>
    %486 = arith.mulf %485, %470 : vector<8x128xf32>
    %487 = arith.addf %424, %486 : vector<8x128xf32>
    %cst_196 = arith.constant 0.000000e+00 : f32
    %cst_197 = arith.constant 1.000000e+00 : f32
    %488 = vector.broadcast %cst_196 : f32 to vector<8x128xf32>
    %489 = arith.maximumf %488, %487 : vector<8x128xf32>
    %490 = vector.broadcast %cst_197 : f32 to vector<8x128xf32>
    %491 = arith.minimumf %490, %489 : vector<8x128xf32>
    %c7_i32 = arith.constant 7 : i32
    %cst_198 = arith.constant 0.000000e+00 : f32
    %cst_199 = arith.constant 1.000000e+00 : f32
    %492 = vector.broadcast %cst_198 : f32 to vector<8x128xf32>
    %493 = arith.maximumf %492, %477 : vector<8x128xf32>
    %494 = vector.broadcast %cst_199 : f32 to vector<8x128xf32>
    %495 = arith.minimumf %494, %493 : vector<8x128xf32>
    %cst_200 = arith.constant 0.000000e+00 : f32
    %cst_201 = arith.constant 1.000000e+00 : f32
    %496 = vector.broadcast %cst_200 : f32 to vector<8x128xf32>
    %497 = arith.maximumf %496, %484 : vector<8x128xf32>
    %498 = vector.broadcast %cst_201 : f32 to vector<8x128xf32>
    %499 = arith.minimumf %498, %497 : vector<8x128xf32>
    %cst_202 = arith.constant 0.000000e+00 : f32
    %cst_203 = arith.constant 1.000000e+00 : f32
    %500 = vector.broadcast %cst_202 : f32 to vector<8x128xf32>
    %501 = arith.maximumf %500, %491 : vector<8x128xf32>
    %502 = vector.broadcast %cst_203 : f32 to vector<8x128xf32>
    %503 = arith.minimumf %502, %501 : vector<8x128xf32>
    %cst_204 = arith.constant dense<0.000000e+00> : vector<8x128xf32>
    %504 = tpu.matmul %495, %0, %cst_204 {dimension_numbers = #tpu.dot_dimension_numbers<[1], [0], [0], [1], [0, 0, 1, 1], [], []>} : vector<8x128xf32>, vector<128x128xf32>, vector<8x128xf32> -> vector<8x128xf32>
    %cst_205 = arith.constant dense<0.000000e+00> : vector<8x256xf32>
    %505 = tpu.matmul %499, %1, %cst_205 {dimension_numbers = #tpu.dot_dimension_numbers<[1], [0], [0], [1], [0, 0, 1, 1], [], []>} : vector<8x128xf32>, vector<128x256xf32>, vector<8x256xf32> -> vector<8x256xf32>
    %cst_206 = arith.constant dense<0.000000e+00> : vector<8x128xf32>
    %506 = tpu.matmul %503, %2, %cst_206 {dimension_numbers = #tpu.dot_dimension_numbers<[1], [0], [0], [1], [0, 0, 1, 1], [], []>} : vector<8x128xf32>, vector<128x128xf32>, vector<8x128xf32> -> vector<8x128xf32>
    %507 = vector.extract_strided_slice %505 {offsets = [0, 0], sizes = [8, 128], strides = [1, 1]} : vector<8x256xf32> to vector<8x128xf32>
    %508 = vector.extract_strided_slice %505 {offsets = [0, 128], sizes = [8, 128], strides = [1, 1]} : vector<8x256xf32> to vector<8x128xf32>
    %cst_207 = arith.constant 0.000000e+00 : f32
    %509 = vector.broadcast %cst_207 : f32 to vector<8x128xf32>
    %510 = arith.subf %509, %477 : vector<8x128xf32>
    %511 = arith.addf %510, %507 : vector<8x128xf32>
    %512 = arith.addf %511, %16 : vector<8x128xf32>
    %cst_208 = arith.constant 0.000000e+00 : f32
    %513 = vector.broadcast %cst_208 : f32 to vector<8x128xf32>
    %514 = arith.subf %513, %484 : vector<8x128xf32>
    %cst_209 = arith.constant 0.000000e+00 : f32
    %515 = vector.broadcast %cst_209 : f32 to vector<8x128xf32>
    %516 = arith.cmpf oge, %484, %515 : vector<8x128xf32>
    %cst_210 = arith.constant 1.000000e+00 : f32
    %517 = vector.broadcast %cst_210 : f32 to vector<8x128xf32>
    %518 = arith.cmpf ole, %484, %517 : vector<8x128xf32>
    %519 = arith.andi %516, %518 : vector<8x128xi1>
    %520 = arith.extui %519 : vector<8x128xi1> to vector<8x128xi32>
    %521 = arith.sitofp %520 : vector<8x128xi32> to vector<8x128xf32>
    %522 = arith.addf %506, %19 : vector<8x128xf32>
    %523 = arith.addf %522, %504 : vector<8x128xf32>
    %524 = arith.mulf %521, %523 : vector<8x128xf32>
    %525 = arith.addf %514, %524 : vector<8x128xf32>
    %cst_211 = arith.constant 0.000000e+00 : f32
    %526 = vector.broadcast %cst_211 : f32 to vector<8x128xf32>
    %527 = arith.subf %526, %491 : vector<8x128xf32>
    %cst_212 = arith.constant 0.000000e+00 : f32
    %528 = vector.broadcast %cst_212 : f32 to vector<8x128xf32>
    %529 = arith.cmpf oge, %491, %528 : vector<8x128xf32>
    %cst_213 = arith.constant 1.000000e+00 : f32
    %530 = vector.broadcast %cst_213 : f32 to vector<8x128xf32>
    %531 = arith.cmpf ole, %491, %530 : vector<8x128xf32>
    %532 = arith.andi %529, %531 : vector<8x128xi1>
    %533 = arith.extui %532 : vector<8x128xi1> to vector<8x128xi32>
    %534 = arith.sitofp %533 : vector<8x128xi32> to vector<8x128xf32>
    %535 = arith.addf %13, %508 : vector<8x128xf32>
    %536 = arith.mulf %534, %535 : vector<8x128xf32>
    %537 = arith.addf %527, %536 : vector<8x128xf32>
    %cst_214 = arith.constant 2.000000e-01 : f32
    %538 = vector.broadcast %cst_214 : f32 to vector<8x128xf32>
    %539 = arith.mulf %538, %512 : vector<8x128xf32>
    %540 = arith.addf %477, %539 : vector<8x128xf32>
    %cst_215 = arith.constant 0.000000e+00 : f32
    %cst_216 = arith.constant 1.000000e+00 : f32
    %541 = vector.broadcast %cst_215 : f32 to vector<8x128xf32>
    %542 = arith.maximumf %541, %540 : vector<8x128xf32>
    %543 = vector.broadcast %cst_216 : f32 to vector<8x128xf32>
    %544 = arith.minimumf %543, %542 : vector<8x128xf32>
    %cst_217 = arith.constant 2.000000e-01 : f32
    %545 = vector.broadcast %cst_217 : f32 to vector<8x128xf32>
    %546 = arith.mulf %545, %525 : vector<8x128xf32>
    %547 = arith.addf %484, %546 : vector<8x128xf32>
    %cst_218 = arith.constant 0.000000e+00 : f32
    %cst_219 = arith.constant 1.000000e+00 : f32
    %548 = vector.broadcast %cst_218 : f32 to vector<8x128xf32>
    %549 = arith.maximumf %548, %547 : vector<8x128xf32>
    %550 = vector.broadcast %cst_219 : f32 to vector<8x128xf32>
    %551 = arith.minimumf %550, %549 : vector<8x128xf32>
    %cst_220 = arith.constant 2.000000e-01 : f32
    %552 = vector.broadcast %cst_220 : f32 to vector<8x128xf32>
    %553 = arith.mulf %552, %537 : vector<8x128xf32>
    %554 = arith.addf %491, %553 : vector<8x128xf32>
    %cst_221 = arith.constant 0.000000e+00 : f32
    %cst_222 = arith.constant 1.000000e+00 : f32
    %555 = vector.broadcast %cst_221 : f32 to vector<8x128xf32>
    %556 = arith.maximumf %555, %554 : vector<8x128xf32>
    %557 = vector.broadcast %cst_222 : f32 to vector<8x128xf32>
    %558 = arith.minimumf %557, %556 : vector<8x128xf32>
    %c8_i32 = arith.constant 8 : i32
    %cst_223 = arith.constant 0.000000e+00 : f32
    %cst_224 = arith.constant 1.000000e+00 : f32
    %559 = vector.broadcast %cst_223 : f32 to vector<8x128xf32>
    %560 = arith.maximumf %559, %544 : vector<8x128xf32>
    %561 = vector.broadcast %cst_224 : f32 to vector<8x128xf32>
    %562 = arith.minimumf %561, %560 : vector<8x128xf32>
    %cst_225 = arith.constant 0.000000e+00 : f32
    %cst_226 = arith.constant 1.000000e+00 : f32
    %563 = vector.broadcast %cst_225 : f32 to vector<8x128xf32>
    %564 = arith.maximumf %563, %551 : vector<8x128xf32>
    %565 = vector.broadcast %cst_226 : f32 to vector<8x128xf32>
    %566 = arith.minimumf %565, %564 : vector<8x128xf32>
    %cst_227 = arith.constant 0.000000e+00 : f32
    %cst_228 = arith.constant 1.000000e+00 : f32
    %567 = vector.broadcast %cst_227 : f32 to vector<8x128xf32>
    %568 = arith.maximumf %567, %558 : vector<8x128xf32>
    %569 = vector.broadcast %cst_228 : f32 to vector<8x128xf32>
    %570 = arith.minimumf %569, %568 : vector<8x128xf32>
    %cst_229 = arith.constant dense<0.000000e+00> : vector<8x128xf32>
    %571 = tpu.matmul %562, %0, %cst_229 {dimension_numbers = #tpu.dot_dimension_numbers<[1], [0], [0], [1], [0, 0, 1, 1], [], []>} : vector<8x128xf32>, vector<128x128xf32>, vector<8x128xf32> -> vector<8x128xf32>
    %cst_230 = arith.constant dense<0.000000e+00> : vector<8x256xf32>
    %572 = tpu.matmul %566, %1, %cst_230 {dimension_numbers = #tpu.dot_dimension_numbers<[1], [0], [0], [1], [0, 0, 1, 1], [], []>} : vector<8x128xf32>, vector<128x256xf32>, vector<8x256xf32> -> vector<8x256xf32>
    %cst_231 = arith.constant dense<0.000000e+00> : vector<8x128xf32>
    %573 = tpu.matmul %570, %2, %cst_231 {dimension_numbers = #tpu.dot_dimension_numbers<[1], [0], [0], [1], [0, 0, 1, 1], [], []>} : vector<8x128xf32>, vector<128x128xf32>, vector<8x128xf32> -> vector<8x128xf32>
    %574 = vector.extract_strided_slice %572 {offsets = [0, 0], sizes = [8, 128], strides = [1, 1]} : vector<8x256xf32> to vector<8x128xf32>
    %575 = vector.extract_strided_slice %572 {offsets = [0, 128], sizes = [8, 128], strides = [1, 1]} : vector<8x256xf32> to vector<8x128xf32>
    %cst_232 = arith.constant 0.000000e+00 : f32
    %576 = vector.broadcast %cst_232 : f32 to vector<8x128xf32>
    %577 = arith.subf %576, %544 : vector<8x128xf32>
    %578 = arith.addf %577, %574 : vector<8x128xf32>
    %579 = arith.addf %578, %16 : vector<8x128xf32>
    %cst_233 = arith.constant 0.000000e+00 : f32
    %580 = vector.broadcast %cst_233 : f32 to vector<8x128xf32>
    %581 = arith.subf %580, %551 : vector<8x128xf32>
    %cst_234 = arith.constant 0.000000e+00 : f32
    %582 = vector.broadcast %cst_234 : f32 to vector<8x128xf32>
    %583 = arith.cmpf oge, %551, %582 : vector<8x128xf32>
    %cst_235 = arith.constant 1.000000e+00 : f32
    %584 = vector.broadcast %cst_235 : f32 to vector<8x128xf32>
    %585 = arith.cmpf ole, %551, %584 : vector<8x128xf32>
    %586 = arith.andi %583, %585 : vector<8x128xi1>
    %587 = arith.extui %586 : vector<8x128xi1> to vector<8x128xi32>
    %588 = arith.sitofp %587 : vector<8x128xi32> to vector<8x128xf32>
    %589 = arith.addf %573, %19 : vector<8x128xf32>
    %590 = arith.addf %589, %571 : vector<8x128xf32>
    %591 = arith.mulf %588, %590 : vector<8x128xf32>
    %592 = arith.addf %581, %591 : vector<8x128xf32>
    %cst_236 = arith.constant 0.000000e+00 : f32
    %593 = vector.broadcast %cst_236 : f32 to vector<8x128xf32>
    %594 = arith.subf %593, %558 : vector<8x128xf32>
    %cst_237 = arith.constant 0.000000e+00 : f32
    %595 = vector.broadcast %cst_237 : f32 to vector<8x128xf32>
    %596 = arith.cmpf oge, %558, %595 : vector<8x128xf32>
    %cst_238 = arith.constant 1.000000e+00 : f32
    %597 = vector.broadcast %cst_238 : f32 to vector<8x128xf32>
    %598 = arith.cmpf ole, %558, %597 : vector<8x128xf32>
    %599 = arith.andi %596, %598 : vector<8x128xi1>
    %600 = arith.extui %599 : vector<8x128xi1> to vector<8x128xi32>
    %601 = arith.sitofp %600 : vector<8x128xi32> to vector<8x128xf32>
    %602 = arith.addf %13, %575 : vector<8x128xf32>
    %603 = arith.mulf %601, %602 : vector<8x128xf32>
    %604 = arith.addf %594, %603 : vector<8x128xf32>
    %cst_239 = arith.constant 2.000000e-01 : f32
    %605 = vector.broadcast %cst_239 : f32 to vector<8x128xf32>
    %606 = arith.mulf %605, %579 : vector<8x128xf32>
    %607 = arith.addf %544, %606 : vector<8x128xf32>
    %cst_240 = arith.constant 0.000000e+00 : f32
    %cst_241 = arith.constant 1.000000e+00 : f32
    %608 = vector.broadcast %cst_240 : f32 to vector<8x128xf32>
    %609 = arith.maximumf %608, %607 : vector<8x128xf32>
    %610 = vector.broadcast %cst_241 : f32 to vector<8x128xf32>
    %611 = arith.minimumf %610, %609 : vector<8x128xf32>
    %cst_242 = arith.constant 2.000000e-01 : f32
    %612 = vector.broadcast %cst_242 : f32 to vector<8x128xf32>
    %613 = arith.mulf %612, %592 : vector<8x128xf32>
    %614 = arith.addf %551, %613 : vector<8x128xf32>
    %cst_243 = arith.constant 0.000000e+00 : f32
    %cst_244 = arith.constant 1.000000e+00 : f32
    %615 = vector.broadcast %cst_243 : f32 to vector<8x128xf32>
    %616 = arith.maximumf %615, %614 : vector<8x128xf32>
    %617 = vector.broadcast %cst_244 : f32 to vector<8x128xf32>
    %618 = arith.minimumf %617, %616 : vector<8x128xf32>
    %cst_245 = arith.constant 2.000000e-01 : f32
    %619 = vector.broadcast %cst_245 : f32 to vector<8x128xf32>
    %620 = arith.mulf %619, %604 : vector<8x128xf32>
    %621 = arith.addf %558, %620 : vector<8x128xf32>
    %cst_246 = arith.constant 0.000000e+00 : f32
    %cst_247 = arith.constant 1.000000e+00 : f32
    %622 = vector.broadcast %cst_246 : f32 to vector<8x128xf32>
    %623 = arith.maximumf %622, %621 : vector<8x128xf32>
    %624 = vector.broadcast %cst_247 : f32 to vector<8x128xf32>
    %625 = arith.minimumf %624, %623 : vector<8x128xf32>
    %c9_i32 = arith.constant 9 : i32
    %cst_248 = arith.constant 0.000000e+00 : f32
    %cst_249 = arith.constant 1.000000e+00 : f32
    %626 = vector.broadcast %cst_248 : f32 to vector<8x128xf32>
    %627 = arith.maximumf %626, %611 : vector<8x128xf32>
    %628 = vector.broadcast %cst_249 : f32 to vector<8x128xf32>
    %629 = arith.minimumf %628, %627 : vector<8x128xf32>
    %cst_250 = arith.constant 0.000000e+00 : f32
    %cst_251 = arith.constant 1.000000e+00 : f32
    %630 = vector.broadcast %cst_250 : f32 to vector<8x128xf32>
    %631 = arith.maximumf %630, %618 : vector<8x128xf32>
    %632 = vector.broadcast %cst_251 : f32 to vector<8x128xf32>
    %633 = arith.minimumf %632, %631 : vector<8x128xf32>
    %cst_252 = arith.constant 0.000000e+00 : f32
    %cst_253 = arith.constant 1.000000e+00 : f32
    %634 = vector.broadcast %cst_252 : f32 to vector<8x128xf32>
    %635 = arith.maximumf %634, %625 : vector<8x128xf32>
    %636 = vector.broadcast %cst_253 : f32 to vector<8x128xf32>
    %637 = arith.minimumf %636, %635 : vector<8x128xf32>
    %cst_254 = arith.constant dense<0.000000e+00> : vector<8x128xf32>
    %638 = tpu.matmul %629, %0, %cst_254 {dimension_numbers = #tpu.dot_dimension_numbers<[1], [0], [0], [1], [0, 0, 1, 1], [], []>} : vector<8x128xf32>, vector<128x128xf32>, vector<8x128xf32> -> vector<8x128xf32>
    %cst_255 = arith.constant dense<0.000000e+00> : vector<8x256xf32>
    %639 = tpu.matmul %633, %1, %cst_255 {dimension_numbers = #tpu.dot_dimension_numbers<[1], [0], [0], [1], [0, 0, 1, 1], [], []>} : vector<8x128xf32>, vector<128x256xf32>, vector<8x256xf32> -> vector<8x256xf32>
    %cst_256 = arith.constant dense<0.000000e+00> : vector<8x128xf32>
    %640 = tpu.matmul %637, %2, %cst_256 {dimension_numbers = #tpu.dot_dimension_numbers<[1], [0], [0], [1], [0, 0, 1, 1], [], []>} : vector<8x128xf32>, vector<128x128xf32>, vector<8x128xf32> -> vector<8x128xf32>
    %641 = vector.extract_strided_slice %639 {offsets = [0, 0], sizes = [8, 128], strides = [1, 1]} : vector<8x256xf32> to vector<8x128xf32>
    %642 = vector.extract_strided_slice %639 {offsets = [0, 128], sizes = [8, 128], strides = [1, 1]} : vector<8x256xf32> to vector<8x128xf32>
    %cst_257 = arith.constant 0.000000e+00 : f32
    %643 = vector.broadcast %cst_257 : f32 to vector<8x128xf32>
    %644 = arith.subf %643, %611 : vector<8x128xf32>
    %645 = arith.addf %644, %641 : vector<8x128xf32>
    %646 = arith.addf %645, %16 : vector<8x128xf32>
    %cst_258 = arith.constant 0.000000e+00 : f32
    %647 = vector.broadcast %cst_258 : f32 to vector<8x128xf32>
    %648 = arith.subf %647, %618 : vector<8x128xf32>
    %cst_259 = arith.constant 0.000000e+00 : f32
    %649 = vector.broadcast %cst_259 : f32 to vector<8x128xf32>
    %650 = arith.cmpf oge, %618, %649 : vector<8x128xf32>
    %cst_260 = arith.constant 1.000000e+00 : f32
    %651 = vector.broadcast %cst_260 : f32 to vector<8x128xf32>
    %652 = arith.cmpf ole, %618, %651 : vector<8x128xf32>
    %653 = arith.andi %650, %652 : vector<8x128xi1>
    %654 = arith.extui %653 : vector<8x128xi1> to vector<8x128xi32>
    %655 = arith.sitofp %654 : vector<8x128xi32> to vector<8x128xf32>
    %656 = arith.addf %640, %19 : vector<8x128xf32>
    %657 = arith.addf %656, %638 : vector<8x128xf32>
    %658 = arith.mulf %655, %657 : vector<8x128xf32>
    %659 = arith.addf %648, %658 : vector<8x128xf32>
    %cst_261 = arith.constant 0.000000e+00 : f32
    %660 = vector.broadcast %cst_261 : f32 to vector<8x128xf32>
    %661 = arith.subf %660, %625 : vector<8x128xf32>
    %cst_262 = arith.constant 0.000000e+00 : f32
    %662 = vector.broadcast %cst_262 : f32 to vector<8x128xf32>
    %663 = arith.cmpf oge, %625, %662 : vector<8x128xf32>
    %cst_263 = arith.constant 1.000000e+00 : f32
    %664 = vector.broadcast %cst_263 : f32 to vector<8x128xf32>
    %665 = arith.cmpf ole, %625, %664 : vector<8x128xf32>
    %666 = arith.andi %663, %665 : vector<8x128xi1>
    %667 = arith.extui %666 : vector<8x128xi1> to vector<8x128xi32>
    %668 = arith.sitofp %667 : vector<8x128xi32> to vector<8x128xf32>
    %669 = arith.addf %13, %642 : vector<8x128xf32>
    %670 = arith.mulf %668, %669 : vector<8x128xf32>
    %671 = arith.addf %661, %670 : vector<8x128xf32>
    %cst_264 = arith.constant 2.000000e-01 : f32
    %672 = vector.broadcast %cst_264 : f32 to vector<8x128xf32>
    %673 = arith.mulf %672, %646 : vector<8x128xf32>
    %674 = arith.addf %611, %673 : vector<8x128xf32>
    %cst_265 = arith.constant 0.000000e+00 : f32
    %cst_266 = arith.constant 1.000000e+00 : f32
    %675 = vector.broadcast %cst_265 : f32 to vector<8x128xf32>
    %676 = arith.maximumf %675, %674 : vector<8x128xf32>
    %677 = vector.broadcast %cst_266 : f32 to vector<8x128xf32>
    %678 = arith.minimumf %677, %676 : vector<8x128xf32>
    %cst_267 = arith.constant 2.000000e-01 : f32
    %679 = vector.broadcast %cst_267 : f32 to vector<8x128xf32>
    %680 = arith.mulf %679, %659 : vector<8x128xf32>
    %681 = arith.addf %618, %680 : vector<8x128xf32>
    %cst_268 = arith.constant 0.000000e+00 : f32
    %cst_269 = arith.constant 1.000000e+00 : f32
    %682 = vector.broadcast %cst_268 : f32 to vector<8x128xf32>
    %683 = arith.maximumf %682, %681 : vector<8x128xf32>
    %684 = vector.broadcast %cst_269 : f32 to vector<8x128xf32>
    %685 = arith.minimumf %684, %683 : vector<8x128xf32>
    %cst_270 = arith.constant 2.000000e-01 : f32
    %686 = vector.broadcast %cst_270 : f32 to vector<8x128xf32>
    %687 = arith.mulf %686, %671 : vector<8x128xf32>
    %688 = arith.addf %625, %687 : vector<8x128xf32>
    %cst_271 = arith.constant 0.000000e+00 : f32
    %cst_272 = arith.constant 1.000000e+00 : f32
    %689 = vector.broadcast %cst_271 : f32 to vector<8x128xf32>
    %690 = arith.maximumf %689, %688 : vector<8x128xf32>
    %691 = vector.broadcast %cst_272 : f32 to vector<8x128xf32>
    %692 = arith.minimumf %691, %690 : vector<8x128xf32>
    %c0_273 = arith.constant 0 : index
    %c0_274 = arith.constant 0 : index
    %693 = vector.load %arg12[%c0_273, %c0_274] : memref<8x128xf32, #tpu.memory_space<vmem>>, vector<8x128xf32>
    tpu.vector_store %arg12[%c0_273, %c0_274], %678 {strides = array<i32>} : memref<8x128xf32, #tpu.memory_space<vmem>>, vector<8x128xf32>,
    %c0_275 = arith.constant 0 : index
    %c0_276 = arith.constant 0 : index
    %694 = vector.load %arg13[%c0_275, %c0_276] : memref<8x128xf32, #tpu.memory_space<vmem>>, vector<8x128xf32>
    tpu.vector_store %arg13[%c0_275, %c0_276], %685 {strides = array<i32>} : memref<8x128xf32, #tpu.memory_space<vmem>>, vector<8x128xf32>,
    %c0_277 = arith.constant 0 : index
    %c0_278 = arith.constant 0 : index
    %695 = vector.load %arg14[%c0_277, %c0_278] : memref<8x128xf32, #tpu.memory_space<vmem>>, vector<8x128xf32>
    tpu.vector_store %arg14[%c0_277, %c0_278], %692 {strides = array<i32>} : memref<8x128xf32, #tpu.memory_space<vmem>>, vector<8x128xf32>,
    return
  }
  func.func @transform_0(%arg0: i32) -> (i32, i32) {
    %c0_i32 = arith.constant 0 : i32
    %c0_i32_0 = arith.constant 0 : i32
    return %arg0, %c0_i32 : i32, i32
  }
  func.func @transform_1(%arg0: i32) -> (i32, i32) {
    %c0_i32 = arith.constant 0 : i32
    %c0_i32_0 = arith.constant 0 : i32
    return %arg0, %c0_i32 : i32, i32
  }
  func.func @transform_2(%arg0: i32) -> (i32, i32) {
    %c0_i32 = arith.constant 0 : i32
    %c0_i32_0 = arith.constant 0 : i32
    return %arg0, %c0_i32 : i32, i32
  }
  func.func @transform_3(%arg0: i32) -> (i32, i32) {
    %c0_i32 = arith.constant 0 : i32
    %c0_i32_0 = arith.constant 0 : i32
    return %arg0, %c0_i32 : i32, i32
  }
  func.func @transform_4(%arg0: i32) -> (i32, i32) {
    %c0_i32 = arith.constant 0 : i32
    %c0_i32_0 = arith.constant 0 : i32
    %c0_i32_1 = arith.constant 0 : i32
    return %c0_i32, %c0_i32_0 : i32, i32
  }
  func.func @transform_5(%arg0: i32) -> (i32, i32) {
    %c0_i32 = arith.constant 0 : i32
    %c0_i32_0 = arith.constant 0 : i32
    %c0_i32_1 = arith.constant 0 : i32
    return %c0_i32, %c0_i32_0 : i32, i32
  }
  func.func @transform_6(%arg0: i32) -> (i32, i32) {
    %c0_i32 = arith.constant 0 : i32
    %c0_i32_0 = arith.constant 0 : i32
    %c0_i32_1 = arith.constant 0 : i32
    return %c0_i32, %c0_i32_0 : i32, i32
  }
  func.func @transform_7(%arg0: i32) -> (i32, i32) {
    %c0_i32 = arith.constant 0 : i32
    %c0_i32_0 = arith.constant 0 : i32
    %c0_i32_1 = arith.constant 0 : i32
    return %c0_i32, %c0_i32_0 : i32, i32
  }
  func.func @transform_8(%arg0: i32) -> (i32, i32) {
    %c0_i32 = arith.constant 0 : i32
    %c0_i32_0 = arith.constant 0 : i32
    %c0_i32_1 = arith.constant 0 : i32
    return %c0_i32, %c0_i32_0 : i32, i32
  }
  func.func @transform_9(%arg0: i32) -> (i32, i32) {
    %c0_i32 = arith.constant 0 : i32
    %c0_i32_0 = arith.constant 0 : i32
    %c0_i32_1 = arith.constant 0 : i32
    return %c0_i32, %c0_i32_0 : i32, i32
  }
  func.func @transform_10(%arg0: i32) -> (i32, i32) {
    %c0_i32 = arith.constant 0 : i32
    %c0_i32_0 = arith.constant 0 : i32
    %c0_i32_1 = arith.constant 0 : i32
    return %c0_i32, %c0_i32_0 : i32, i32
  }
  func.func @transform_11(%arg0: i32) -> (i32, i32) {
    %c0_i32 = arith.constant 0 : i32
    %c0_i32_0 = arith.constant 0 : i32
    return %arg0, %c0_i32 : i32, i32
  }
  func.func @transform_12(%arg0: i32) -> (i32, i32) {
    %c0_i32 = arith.constant 0 : i32
    %c0_i32_0 = arith.constant 0 : i32
    return %arg0, %c0_i32 : i32, i32
  }
  func.func @transform_13(%arg0: i32) -> (i32, i32) {
    %c0_i32 = arith.constant 0 : i32
    %c0_i32_0 = arith.constant 0 : i32
    return %arg0, %c0_i32 : i32, i32
  }
}

</mosaic_0001>

<bundles_post_ra>
// kernel: epcont_forward.1
= control target key start
LH: loop header
LB: loop body
LE: loop exit
PB: predicated region body
PF: predicated region fallthrough
CT: control target
= control target key end

     0   :  { %v6356_v0 = vmov 0.0   ;;  %vm4010_vm0 = vmmov 0   ;;  %s6342_s7 = inlined_call_operand.vmem [shape: f32[128,128], index: 7, kind: input, shape index: {}]   ;;  %s6343_s4 = inlined_call_operand.vmem [shape: f32[128,128], index: 4, kind: input, shape index: {}]   ;;  %s6344_s0 = inlined_call_operand.vmem [shape: f32[8,128], index: 0, kind: input, shape index: {}]   ;;  %s6345_s1 = inlined_call_operand.vmem [shape: f32[8,128], index: 1, kind: input, shape index: {}]   ;;  %s6346_s5 = inlined_call_operand.vmem [shape: f32[128,256], index: 5, kind: input, shape index: {}]   ;;  %s6347_s6 = inlined_call_operand.vmem [shape: f32[128,128], index: 6, kind: input, shape index: {}]   ;;  %s6348_s2 = inlined_call_operand.vmem [shape: f32[8,128], index: 2, kind: input, shape index: {}]   ;;  %s6349_s3 = inlined_call_operand.vmem [shape: f32[8,128], index: 3, kind: input, shape index: {}]   ;;  %s6350_s9 = inlined_call_operand.vmem [shape: f32[1,128], index: 9, kind: input, shape index: {}]   ;;  %s6351_s8 = inlined_call_operand.vmem [shape: f32[1,128], index: 8, kind: input, shape index: {}]   ;;  %s6352_s10 = inlined_call_operand.vmem [shape: f32[1,128], index: 10, kind: input, shape index: {}]   ;;  %s6353_s11 = inlined_call_operand.vmem [shape: f32[8,128], index: 11, kind: output, shape index: {0}]   ;;  %s6354_s13 = inlined_call_operand.vmem [shape: f32[8,128], index: 13, kind: output, shape index: {2}]   ;;  %s6355_s12 = inlined_call_operand.vmem [shape: f32[8,128], index: 12, kind: output, shape index: {1}]  }
   0x1   :  { %3140 = vmatprep.subr.mxu0 %v6356_v0  ;;  %3175 = vmatprep.subr.mxu1 %v6356_v0  ;;  %v120_v1 = vld [vmem:[%s6342_s7 + $0x78] sm:$0xff]  ;;  %v119_v3 = vld [vmem:[%s6342_s7 + $0x70] sm:$0xff]  ;;  %v118_v5 = vld [vmem:[%s6342_s7 + $0x68] sm:$0xff] }
   0x2   :  { %v4089_v2 = vld [vmem:[%s6343_s4 + $0x78] sm:$0xff]  ;;  %3141 = vmatpush3.msra.mxu0 %v120_v1  ;;  %v4098_v4 = vld [vmem:[%s6343_s4 + $0x70] sm:$0xff]  ;;  %v4108_v6 = vld [vmem:[%s6343_s4 + $0x68] sm:$0xff]  ;;  %3172 = vmatprep.mubr.msk.f32.mxu0 %vm4010_vm0, %v6356_v0 }
   0x3   :  { %3176 = vmatpush3.msra.mxu1 %v4089_v2  ;;  %3142 = vmatprep.subr.mxu0 %v6356_v0  ;;  %v117_v7 = vld [vmem:[%s6342_s7 + $0x60] sm:$0xff]  ;;  %v116_v9 = vld [vmem:[%s6342_s7 + $0x58] sm:$0xff]  ;;  %v115_v11 = vld [vmem:[%s6342_s7 + $0x50] sm:$0xff] }
   0x4   :  { %3177 = vmatprep.subr.mxu1 %v6356_v0  ;;  %3143 = vmatpush3.msra.mxu0 %v119_v3  ;;  %v4119_v8 = vld [vmem:[%s6343_s4 + $0x60] sm:$0xff]  ;;  %v4130_v10 = vld [vmem:[%s6343_s4 + $0x58] sm:$0xff]  ;;  %v4141_v12 = vld [vmem:[%s6343_s4 + $0x50] sm:$0xff] }
   0x5   :  { %3178 = vmatpush3.msra.mxu1 %v4098_v4  ;;  %3144 = vmatprep.subr.mxu0 %v6356_v0  ;;  %v114_v13 = vld [vmem:[%s6342_s7 + $0x48] sm:$0xff]  ;;  %v113_v15 = vld [vmem:[%s6342_s7 + $0x40] sm:$0xff]  ;;  %v112_v17 = vld [vmem:[%s6342_s7 + $0x38] sm:$0xff] }
   0x6   :  { %3179 = vmatprep.subr.mxu1 %v6356_v0  ;;  %3145 = vmatpush3.msra.mxu0 %v118_v5  ;;  %v4152_v14 = vld [vmem:[%s6343_s4 + $0x48] sm:$0xff]  ;;  %v4163_v16 = vld [vmem:[%s6343_s4 + $0x40] sm:$0xff]  ;;  %v4174_v18 = vld [vmem:[%s6343_s4 + $0x38] sm:$0xff] }
   0x7   :  { %3180 = vmatpush3.msra.mxu1 %v4108_v6  ;;  %3146 = vmatprep.subr.mxu0 %v6356_v0  ;;  %v111_v19 = vld [vmem:[%s6342_s7 + $0x30] sm:$0xff]  ;;  %v110_v21 = vld [vmem:[%s6342_s7 + $0x28] sm:$0xff]  ;;  %v109_v23 = vld [vmem:[%s6342_s7 + $0x20] sm:$0xff] }
   0x8   :  { %3181 = vmatprep.subr.mxu1 %v6356_v0  ;;  %3147 = vmatpush3.msra.mxu0 %v117_v7  ;;  %v4185_v20 = vld [vmem:[%s6343_s4 + $0x30] sm:$0xff]  ;;  %v4196_v22 = vld [vmem:[%s6343_s4 + $0x28] sm:$0xff]  ;;  %v4207_v24 = vld [vmem:[%s6343_s4 + $0x20] sm:$0xff] }
   0x9   :  { %3182 = vmatpush3.msra.mxu1 %v4119_v8  ;;  %3148 = vmatprep.subr.mxu0 %v6356_v0  ;;  %v121_v25 = vld [vmem:[%s6344_s0] sm:$0xff]  ;;  %v108_v26 = vld [vmem:[%s6342_s7 + $0x18] sm:$0xff]  ;;  %v107_v29 = vld [vmem:[%s6342_s7 + $0x10] sm:$0xff] }
   0xa   :  { %3183 = vmatprep.subr.mxu1 %v6356_v0  ;;  %3149 = vmatpush3.msra.mxu0 %v116_v9  ;;  %v4221_v27 = vld [vmem:[%s6343_s4 + $0x18] sm:$0xff]  ;;  %v4227_v28 = vld [vmem:[%s6345_s1] sm:$0xff]  ;;  %v4237_v30 = vld [vmem:[%s6343_s4 + $0x10] sm:$0xff]  ;;  %v122_v31 = vmax.f32 %v121_v25, 0.0 }
   0xb   :  { %3184 = vmatpush3.msra.mxu1 %v4130_v10  ;;  %3150 = vmatprep.subr.mxu0 %v6356_v0  ;;  %6469 = vst [vmem:[#allocation2_spill] sm:$0xff] %v4221_v27  ;;  %6470 = vst [vmem:[#allocation3_spill] sm:$0xff] %v4237_v30  ;;  %v106_v32 = vld [vmem:[%s6342_s7 + $0x8] sm:$0xff]  ;;  %v218_v34 = vmax.f32 %v4227_v28, 0.0  ;;  %v105_v35 = vld [vmem:[%s6342_s7] sm:$0xff] }
   0xc   :  { %3185 = vmatprep.subr.mxu1 %v6356_v0  ;;  %3151 = vmatpush3.msra.mxu0 %v115_v11  ;;  %v4248_v33 = vld [vmem:[%s6343_s4 + $0x8] sm:$0xff]  ;;  %v123_v36 = vmin.f32 %v122_v31, 1.0  ;;  %v4261_v37 = vld [vmem:[%s6343_s4] sm:$0xff]  ;;  %v4268_v38 = vld [vmem:[%s6346_s5 + $0xf8] sm:$0xff] }
   0xd   :  { %3186 = vmatpush3.msra.mxu1 %v4141_v12  ;;  %3152 = vmatprep.subr.mxu0 %v6356_v0  ;;  %6471 = vst [vmem:[#allocation4_spill] sm:$0xff] %v4248_v33  ;;  %6472 = vst [vmem:[#allocation5_spill] sm:$0xff] %v4261_v37  ;;  %v219_v39 = vmin.f32 %v218_v34, 1.0  ;;  %v4276_v40 = vld [vmem:[%s6346_s5 + $0xf0] sm:$0xff]  ;;  %v4281_v41 = vld [vmem:[%s6347_s6 + $0x78] sm:$0xff] }
   0xe   :  { %3187 = vmatprep.subr.mxu1 %v6356_v0  ;;  %3153 = vmatpush3.msra.mxu0 %v114_v13  ;;  %v4289_v42 = vld [vmem:[%s6346_s5 + $0xe8] sm:$0xff]  ;;  %v4295_v43 = vld [vmem:[%s6346_s5 + $0xe0] sm:$0xff]  ;;  %v4300_v44 = vld [vmem:[%s6347_s6 + $0x70] sm:$0xff] }
   0xf   :  { %3188 = vmatpush3.msra.mxu1 %v4152_v14  ;;  %3154 = vmatprep.subr.mxu0 %v6356_v0  ;;  %v4307_v45 = vld [vmem:[%s6346_s5 + $0xd8] sm:$0xff]  ;;  %v4314_v46 = vld [vmem:[%s6346_s5 + $0xd0] sm:$0xff]  ;;  %v4319_v47 = vld [vmem:[%s6347_s6 + $0x68] sm:$0xff] }
  0x10   :  { %3189 = vmatprep.subr.mxu1 %v6356_v0  ;;  %3155 = vmatpush3.msra.mxu0 %v113_v15  ;;  %v4326_v48 = vld [vmem:[%s6346_s5 + $0xc8] sm:$0xff]  ;;  %v4333_v49 = vld [vmem:[%s6346_s5 + $0xc0] sm:$0xff]  ;;  %v4345_v51 = vld [vmem:[%s6346_s5 + $0xb8] sm:$0xff] }
  0x11   :  { %3190 = vmatpush3.msra.mxu1 %v4163_v16  ;;  %3156 = vmatprep.subr.mxu0 %v6356_v0  ;;  %v4338_v50 = vld [vmem:[%s6347_s6 + $0x60] sm:$0xff]  ;;  %v4352_v52 = vld [vmem:[%s6346_s5 + $0xb0] sm:$0xff]  ;;  %v4357_v53 = vld [vmem:[%s6347_s6 + $0x58] sm:$0xff] }
  0x12   :  { %3191 = vmatprep.subr.mxu1 %v6356_v0  ;;  %3157 = vmatpush3.msra.mxu0 %v112_v17  ;;  %v4364_v54 = vld [vmem:[%s6346_s5 + $0xa8] sm:$0xff]  ;;  %v4371_v55 = vld [vmem:[%s6346_s5 + $0xa0] sm:$0xff]  ;;  %v4376_v56 = vld [vmem:[%s6347_s6 + $0x50] sm:$0xff] }
  0x13   :  { %3192 = vmatpush3.msra.mxu1 %v4174_v18  ;;  %3158 = vmatprep.subr.mxu0 %v6356_v0  ;;  %v4383_v57 = vld [vmem:[%s6346_s5 + $0x98] sm:$0xff]  ;;  %v4390_v58 = vld [vmem:[%s6346_s5 + $0x90] sm:$0xff]  ;;  %v4395_v59 = vld [vmem:[%s6347_s6 + $0x48] sm:$0xff] }
  0x14   :  { %3193 = vmatprep.subr.mxu1 %v6356_v0  ;;  %3159 = vmatpush3.msra.mxu0 %v111_v19  ;;  %6473 = vst [vmem:[#allocation6_spill] sm:$0xff] %v4395_v59  ;;  %v4402_v60 = vld [vmem:[%s6346_s5 + $0x88] sm:$0xff]  ;;  %v4409_v61 = vld [vmem:[%s6346_s5 + $0x80] sm:$0xff]  ;;  %v4421_v63 = vld [vmem:[%s6346_s5 + $0x78] sm:$0xff] }
  0x15   :  { %3194 = vmatpush3.msra.mxu1 %v4185_v20  ;;  %3160 = vmatprep.subr.mxu0 %v6356_v0  ;;  %v4414_v62 = vld [vmem:[%s6347_s6 + $0x40] sm:$0xff]  ;;  %6475 = vst [vmem:[#allocation8_spill] sm:$0xff] %v4421_v63  ;;  %v4428_v1 = vld [vmem:[%s6346_s5 + $0x70] sm:$0xff]  ;;  %v4433_v3 = vld [vmem:[%s6347_s6 + $0x38] sm:$0xff] }
  0x16   :  { %3195 = vmatprep.subr.mxu1 %v6356_v0  ;;  %3161 = vmatpush3.msra.mxu0 %v110_v21  ;;  %6474 = vst [vmem:[#allocation7_spill] sm:$0xff] %v4414_v62  ;;  %6476 = vst [vmem:[#allocation9_spill] sm:$0xff] %v4428_v1  ;;  %v4440_v5 = vld [vmem:[%s6346_s5 + $0x68] sm:$0xff]  ;;  %v4447_v7 = vld [vmem:[%s6346_s5 + $0x60] sm:$0xff] }
  0x17   :  { %3196 = vmatpush3.msra.mxu1 %v4196_v22  ;;  %3162 = vmatprep.subr.mxu0 %v6356_v0  ;;  %6477 = vst [vmem:[#allocation10_spill] sm:$0xff] %v4433_v3  ;;  %6478 = vst [vmem:[#allocation11_spill] sm:$0xff] %v4440_v5  ;;  %v4452_v9 = vld [vmem:[%s6347_s6 + $0x30] sm:$0xff]  ;;  %v4459_v11 = vld [vmem:[%s6346_s5 + $0x58] sm:$0xff] }
  0x18   :  { %3197 = vmatprep.subr.mxu1 %v6356_v0  ;;  %3163 = vmatpush3.msra.mxu0 %v109_v23  ;;  %6479 = vst [vmem:[#allocation12_spill] sm:$0xff] %v4447_v7  ;;  %6480 = vst [vmem:[#allocation13_spill] sm:$0xff] %v4452_v9  ;;  %v4466_v13 = vld [vmem:[%s6346_s5 + $0x50] sm:$0xff]  ;;  %v4471_v15 = vld [vmem:[%s6347_s6 + $0x28] sm:$0xff] }
  0x19   :  { %3198 = vmatpush3.msra.mxu1 %v4207_v24  ;;  %3164 = vmatprep.subr.mxu0 %v6356_v0  ;;  %6481 = vst [vmem:[#allocation14_spill] sm:$0xff] %v4459_v11  ;;  %6482 = vst [vmem:[#allocation15_spill] sm:$0xff] %v4466_v13  ;;  %v4478_v17 = vld [vmem:[%s6346_s5 + $0x48] sm:$0xff]  ;;  %v4485_v19 = vld [vmem:[%s6346_s5 + $0x40] sm:$0xff] }
  0x1a   :  { %3199 = vmatprep.subr.mxu1 %v6356_v0  ;;  %3165 = vmatpush3.msra.mxu0 %v108_v26  ;;  %6483 = vst [vmem:[#allocation16_spill] sm:$0xff] %v4471_v15  ;;  %6484 = vst [vmem:[#allocation17_spill] sm:$0xff] %v4478_v17  ;;  %v4490_v21 = vld [vmem:[%s6347_s6 + $0x20] sm:$0xff]  ;;  %v4497_v23 = vld [vmem:[%s6346_s5 + $0x38] sm:$0xff] }
  0x1b   :  { %3200 = vmatpush3.msra.mxu1 %v4221_v27  ;;  %3166 = vmatprep.subr.mxu0 %v6356_v0  ;;  %6485 = vst [vmem:[#allocation18_spill] sm:$0xff] %v4485_v19  ;;  %6486 = vst [vmem:[#allocation19_spill] sm:$0xff] %v4490_v21  ;;  %v4502_v25 = vld [vmem:[%s6346_s5 + $0x30] sm:$0xff]  ;;  %v4509_v26 = vld [vmem:[%s6347_s6 + $0x18] sm:$0xff] }
  0x1c   :  { %3201 = vmatprep.subr.mxu1 %v6356_v0  ;;  %3167 = vmatpush3.msra.mxu0 %v107_v29  ;;  %6487 = vst [vmem:[#allocation20_spill] sm:$0xff] %v4497_v23  ;;  %6488 = vst [vmem:[#allocation21_spill] sm:$0xff] %v4502_v25  ;;  %v4514_v29 = vld [vmem:[%s6348_s2] sm:$0xff] }
  0x1d   :  { %3202 = vmatpush3.msra.mxu1 %v4237_v30  ;;  %3168 = vmatprep.subr.mxu0 %v6356_v0  ;;  %6489 = vst [vmem:[#allocation22_spill] sm:$0xff] %v4509_v26  ;;  %v4519_v31 = vld [vmem:[%s6349_s3] sm:$0xff]  ;;  %vm369_vm1 = vcmp.ge.f32.partialorder %v4514_v29, 0.0  ;;  %vm370_vm2 = vcmp.le.f32.partialorder %v4514_v29, 1.0 }
  0x1e   :  { %3203 = vmatprep.subr.mxu1 %v6356_v0  ;;  %3169 = vmatpush3.msra.mxu0 %v106_v32  ;;  %v4526_v32 = vld [vmem:[%s6346_s5 + $0x28] sm:$0xff]  ;;  %v4533_v34 = vld [vmem:[%s6346_s5 + $0x20] sm:$0xff]  ;;  %vm371_vm3 = vmand %vm369_vm1, %vm370_vm2  ;;  %vm448_vm4 = vcmp.ge.f32.partialorder %v4519_v31, 0.0  ;;  %vm449_vm5 = vcmp.le.f32.partialorder %v4519_v31, 1.0 }
  0x1f   :  { %3204 = vmatpush3.msra.mxu1 %v4248_v33  ;;  %3170 = vmatprep.subr.mxu0 %v6356_v0  ;;  %6490 = vst [vmem:[#allocation23_spill] sm:$0xff] %v4526_v32  ;;  %6491 = vst [vmem:[#allocation24_spill] sm:$0xff] %v4533_v34 }
  0x20   :  { %3205 = vmatprep.subr.mxu1 %v6356_v0  ;;  %3171 = vmatpush3.msra.mxu0 %v105_v35  ;;  %v4538_v35 = vld [vmem:[%s6347_s6 + $0x10] sm:$0xff]  ;;  %vm450_vm6 = vmand %vm448_vm4, %vm449_vm5 }
  0x21   :  { %3206 = vmatpush3.msra.mxu1 %v4261_v37  ;;  %3173 = vmatmul.mubr.f32.vlgmr.msra.gmra.mxu0 %v123_v36  ;;  %6492 = vst [vmem:[#allocation25_spill] sm:$0xff] %v4538_v35  ;;  %v4545_v36 = vld [vmem:[%s6346_s5 + $0x18] sm:$0xff] }
  0x22   :  { %3207 = vmatprep.mubr.msk.f32.mxu1 %vm4010_vm0, %v6356_v0  ;;  %294 = vmatprep.subr.mxu0 %v4268_v38  ;;  %6493 = vst [vmem:[#allocation26_spill] sm:$0xff] %v4545_v36 }
  0x23   :  { %3210 = vmatprep.subr.mxu1 %v6356_v0  ;;  %3208 = vmatmul.mubr.f32.vlgmr.msra.gmra.mxu1 %v219_v39  ;;  %v220_v39 = vmax.f32 %v4514_v29, 0.0 }
  0x24   :  { %295 = vmatpush1.msra.mxu0 %v4276_v40  ;;  %3211 = vmatpush3.msra.mxu1 %v4281_v41 }
  0x25   :  { %296 = vmatprep.subr.mxu0 %v4289_v42  ;;  %3212 = vmatprep.subr.mxu1 %v6356_v0 }
  0x26   :  { %297 = vmatpush1.msra.mxu0 %v4295_v43  ;;  %3213 = vmatpush3.msra.mxu1 %v4300_v44 }
  0x27   :  { %298 = vmatprep.subr.mxu0 %v4307_v45  ;;  %3214 = vmatprep.subr.mxu1 %v6356_v0 }
  0x28   :  { %299 = vmatpush1.msra.mxu0 %v4314_v46  ;;  %3215 = vmatpush3.msra.mxu1 %v4319_v47 }
  0x29   :  { %300 = vmatprep.subr.mxu0 %v4326_v48  ;;  %3216 = vmatprep.subr.mxu1 %v6356_v0 }
  0x2a   :  { %301 = vmatpush1.msra.mxu0 %v4333_v49  ;;  %3217 = vmatpush3.msra.mxu1 %v4338_v50 }
  0x2b   :  { %302 = vmatprep.subr.mxu0 %v4345_v51  ;;  %3218 = vmatprep.subr.mxu1 %v6356_v0 }
  0x2c   :  { %303 = vmatpush1.msra.mxu0 %v4352_v52  ;;  %3219 = vmatpush3.msra.mxu1 %v4357_v53 }
  0x2d   :  { %304 = vmatprep.subr.mxu0 %v4364_v54  ;;  %3220 = vmatprep.subr.mxu1 %v6356_v0 }
  0x2e   :  { %305 = vmatpush1.msra.mxu0 %v4371_v55  ;;  %3221 = vmatpush3.msra.mxu1 %v4376_v56 }
  0x2f   :  { %306 = vmatprep.subr.mxu0 %v4383_v57  ;;  %3222 = vmatprep.subr.mxu1 %v6356_v0 }
  0x30   :  { %307 = vmatpush1.msra.mxu0 %v4390_v58  ;;  %3223 = vmatpush3.msra.mxu1 %v4395_v59 }
  0x31   :  { %308 = vmatprep.subr.mxu0 %v4402_v60  ;;  %3224 = vmatprep.subr.mxu1 %v6356_v0 }
  0x32   :  { %309 = vmatpush1.msra.mxu0 %v4409_v61  ;;  %3225 = vmatpush3.msra.mxu1 %v4414_v62  ;;  %v221_v62 = vmin.f32 %v220_v39, 1.0 }
  0x33   :  { %310 = vmatprep.subr.mxu0 %v4421_v63  ;;  %3226 = vmatprep.subr.mxu1 %v6356_v0 }
  0x34   :  { %311 = vmatpush1.msra.mxu0 %v4428_v1  ;;  %3227 = vmatpush3.msra.mxu1 %v4433_v3  ;;  %v4573_v3 = vld [vmem:[%s6346_s5] sm:$0xff] }
  0x35   :  { %312 = vmatprep.subr.mxu0 %v4440_v5  ;;  %3228 = vmatprep.subr.mxu1 %v6356_v0  ;;  %6497 = vst [vmem:[#allocation29_spill] sm:$0xff] %v4573_v3 }
  0x36   :  { %313 = vmatpush1.msra.mxu0 %v4447_v7  ;;  %3229 = vmatpush3.msra.mxu1 %v4452_v9  ;;  %v4566_v9 = vld [vmem:[%s6346_s5 + $0x8] sm:$0xff] }
  0x37   :  { %314 = vmatprep.subr.mxu0 %v4459_v11  ;;  %3230 = vmatprep.subr.mxu1 %v6356_v0  ;;  %6496 = vst [vmem:[#allocation28_spill] sm:$0xff] %v4566_v9 }
  0x38   :  { %315 = vmatpush1.msra.mxu0 %v4466_v13  ;;  %3231 = vmatpush3.msra.mxu1 %v4471_v15  ;;  %v4554_v15 = vld [vmem:[%s6346_s5 + $0x10] sm:$0xff] }
  0x39   :  { %316 = vmatprep.subr.mxu0 %v4478_v17  ;;  %3232 = vmatprep.subr.mxu1 %v6356_v0  ;;  %6495 = vst [vmem:[#allocation27_spill] sm:$0xff] %v4554_v15 }
  0x3a   :  { %317 = vmatpush1.msra.mxu0 %v4485_v19  ;;  %3233 = vmatpush3.msra.mxu1 %v4490_v21  ;;  %v6494_v21 = vmov 0.0  }
  0x3b   :  { %318 = vmatprep.subr.mxu0 %v4497_v23  ;;  %3234 = vmatprep.subr.mxu1 %v6356_v0  ;;  %v222_v0 = vmax.f32 %v4519_v31, 0.0 }
  0x3c   :  { %319 = vmatpush1.msra.mxu0 %v4502_v25  ;;  %3235 = vmatpush3.msra.mxu1 %v4509_v26  ;;  %v4559_v26 = vld [vmem:[%s6347_s6 + $0x8] sm:$0xff] }
  0x3d   :  { %320 = vmatprep.subr.mxu0 %v4526_v32  ;;  %3236 = vmatprep.subr.mxu1 %v6494_v21  ;;  %v223_v59 = vmin.f32 %v222_v0, 1.0 }
  0x3e   :  { %321 = vmatpush1.msra.mxu0 %v4533_v34  ;;  %3237 = vmatpush3.msra.mxu1 %v4538_v35  ;;  %v4580_v35 = vld [vmem:[%s6347_s6] sm:$0xff] }
  0x3f   :  { %322 = vmatprep.subr.mxu0 %v4545_v36  ;;  %3238 = vmatprep.subr.mxu1 %v6494_v21 }
  0x40   :  { %323 = vmatpush1.msra.mxu0 %v4554_v15  ;;  %3239 = vmatpush3.msra.mxu1 %v4559_v26 }
  0x41   :  { %324 = vmatprep.subr.mxu0 %v4566_v9  ;;  %3240 = vmatprep.subr.mxu1 %v6494_v21 }
  0x42   :  { %325 = vmatpush1.msra.mxu0 %v4573_v3  ;;  %358 = vmatprep.mubr.f32.mxu0 %v6494_v21 }
  0x43   :  { %3241 = vmatpush3.msra.mxu1 %v4580_v35  ;;  %3242 = vmatprep.mubr.msk.f32.mxu1 %vm4010_vm0, %v6494_v21 }
  0x44   :  { %359 = vmatmul.mubr.f32.vlgmr.msra.gmra.mxu0 %v221_v62  ;;  %3243 = vmatmul.mubr.f32.vlgmr.msra.gmra.mxu1 %v223_v59 }
  0x45   :  { %3245 = vmatprep.subr.mxu0 %v6494_v21  ;;  %544 = vmatprep.subr.mxu1 %v4268_v38 }
  0x46   :  { %3246 = vmatpush3.msra.mxu0 %v4089_v2  ;;  %545 = vmatpush1.msra.mxu1 %v4276_v40 }
  0x47   :  { %3247 = vmatprep.subr.mxu0 %v6494_v21  ;;  %546 = vmatprep.subr.mxu1 %v4289_v42 }
  0x48   :  { %3248 = vmatpush3.msra.mxu0 %v4098_v4  ;;  %547 = vmatpush1.msra.mxu1 %v4295_v43 }
  0x49   :  { %3249 = vmatprep.subr.mxu0 %v6494_v21  ;;  %548 = vmatprep.subr.mxu1 %v4307_v45 }
  0x4a   :  { %3250 = vmatpush3.msra.mxu0 %v4108_v6  ;;  %549 = vmatpush1.msra.mxu1 %v4314_v46 }
  0x4b   :  { %3251 = vmatprep.subr.mxu0 %v6494_v21  ;;  %550 = vmatprep.subr.mxu1 %v4326_v48 }
  0x4c   :  { %3252 = vmatpush3.msra.mxu0 %v4119_v8  ;;  %551 = vmatpush1.msra.mxu1 %v4333_v49 }
  0x4d   :  { %3253 = vmatprep.subr.mxu0 %v6494_v21  ;;  %552 = vmatprep.subr.mxu1 %v4345_v51 }
  0x4e   :  { %3254 = vmatpush3.msra.mxu0 %v4130_v10  ;;  %553 = vmatpush1.msra.mxu1 %v4352_v52 }
  0x4f   :  { %3255 = vmatprep.subr.mxu0 %v6494_v21  ;;  %554 = vmatprep.subr.mxu1 %v4364_v54 }
  0x50   :  { %3256 = vmatpush3.msra.mxu0 %v4141_v12  ;;  %555 = vmatpush1.msra.mxu1 %v4371_v55 }
  0x51   :  { %3257 = vmatprep.subr.mxu0 %v6494_v21  ;;  %556 = vmatprep.subr.mxu1 %v4383_v57 }
  0x52   :  { %3258 = vmatpush3.msra.mxu0 %v4152_v14  ;;  %557 = vmatpush1.msra.mxu1 %v4390_v58 }
  0x53   :  { %3259 = vmatprep.subr.mxu0 %v6494_v21  ;;  %558 = vmatprep.subr.mxu1 %v4402_v60 }
  0x54   :  { %3260 = vmatpush3.msra.mxu0 %v4163_v16  ;;  %559 = vmatpush1.msra.mxu1 %v4409_v61 }
  0x55   :  { %3261 = vmatprep.subr.mxu0 %v6494_v21  ;;  %560 = vmatprep.subr.mxu1 %v4421_v63 }
  0x56   :  { %3262 = vmatpush3.msra.mxu0 %v4174_v18  ;;  %561 = vmatpush1.msra.mxu1 %v4428_v1 }
  0x57   :  { %3263 = vmatprep.subr.mxu0 %v6494_v21  ;;  %562 = vmatprep.subr.mxu1 %v4440_v5 }
  0x58   :  { %3264 = vmatpush3.msra.mxu0 %v4185_v20  ;;  %563 = vmatpush1.msra.mxu1 %v4447_v7 }
  0x59   :  { %3265 = vmatprep.subr.mxu0 %v6494_v21  ;;  %564 = vmatprep.subr.mxu1 %v4459_v11 }
  0x5a   :  { %3266 = vmatpush3.msra.mxu0 %v4196_v22  ;;  %565 = vmatpush1.msra.mxu1 %v4466_v13 }
  0x5b   :  { %3267 = vmatprep.subr.mxu0 %v6494_v21  ;;  %566 = vmatprep.subr.mxu1 %v4478_v17 }
  0x5c   :  { %3268 = vmatpush3.msra.mxu0 %v4207_v24  ;;  %567 = vmatpush1.msra.mxu1 %v4485_v19  ;;  %v368_v19 = vsub.f32 0.0, %v4514_v29 }
  0x5d   :  { %3269 = vmatprep.subr.mxu0 %v6494_v21  ;;  %568 = vmatprep.subr.mxu1 %v4497_v23 }
  0x5e   :  { %3270 = vmatpush3.msra.mxu0 %v4221_v27  ;;  %569 = vmatpush1.msra.mxu1 %v4502_v25 }
  0x5f   :  { %3271 = vmatprep.subr.mxu0 %v6494_v21  ;;  %570 = vmatprep.subr.mxu1 %v4526_v32  ;;  %v2736_v32 = vsel %vm371_vm3, 1.0, %v6494_v21 }
  0x60   :  { %3272 = vmatpush3.msra.mxu0 %v4237_v30  ;;  %3277 = vmatprep.mubr.msk.f32.mxu0 %vm4010_vm0, %v6494_v21 }
  0x61   :  { %3273 = vmatprep.subr.mxu0 %v6494_v21  ;;  %571 = vmatpush1.msra.mxu1 %v4533_v34 }
  0x62   :  { %3274 = vmatpush3.msra.mxu0 %v4248_v33  ;;  %572 = vmatprep.subr.mxu1 %v4545_v36 }
  0x63   :  { %3275 = vmatprep.subr.mxu0 %v6494_v21  ;;  %573 = vmatpush1.msra.mxu1 %v4554_v15  ;;  %v365_v15 = vsub.f32 0.0, %v4227_v28 }
  0x64   :  { %3276 = vmatpush3.msra.mxu0 %v4261_v37  ;;  %574 = vmatprep.subr.mxu1 %v4566_v9  ;;  %v4664_v9 = vld [vmem:[%s6350_s9] ss:$0 sm:$0xff] }
  0x65   :  { %3280 = vmatprep.subr.mxu0 %v6494_v21  ;;  %575 = vmatpush1.msra.mxu1 %v4573_v3  ;;  %v4669_v3 = vld [vmem:[%s6351_s8] ss:$0 sm:$0xff] }
  0x66   :  { %608 = vmatprep.mubr.f32.mxu1 %v6494_v21  ;;  %3315 = vmatprep.subr.mxu1 %v6494_v21 }
  0xe1   :  { %v197_v0 = vpop.f32.mrf.mxu0 }
  0xe3   :  { %v3174_v59 = vpop.f32.mrf.mxu0  ;;  %v290_v62 = vpop.f32.mrf.mxu1 }
  0xe5   :  { %v3209_v39 = vpop.f32.mrf.mxu1 }
 0x104   :  { %v360_v59 = vpop.f32.mrf.mxu0  ;;  %v440_v36 = vpop.f32.mrf.mxu1 }
 0x105   :  { %v366_v39 = vadd.f32 %v365_v15, %v360_v59  ;;  %v441_v34 = vadd.f32 %v4664_v9, %v440_v36  ;;  %v6509_v36 = vld [vmem:[#allocation11_spill] sm:$0xff] }
 0x106   :  { %v3244_v25 = vpop.f32.mrf.mxu1  ;;  %v6512_v59 = vld [vmem:[#allocation15_spill] sm:$0xff] }
 0x107   :  { %v367_v23 = vadd.f32 %v4669_v3, %v366_v39  ;;  %v444_v17 = vadd.f32 %v441_v34, %v290_v62  ;;  %v6508_v34 = vld [vmem:[#allocation9_spill] sm:$0xff]  ;;  %v6511_v62 = vld [vmem:[#allocation14_spill] sm:$0xff] }
 0x108   :  { %v6513_v39 = vld [vmem:[#allocation17_spill] sm:$0xff] }
 0x109   :  { %v456_v13 = vmul.f32 0.2, %v367_v23  ;;  %v445_v11 = vmul.f32 %v2736_v32, %v444_v17  ;;  %v6507_v32 = vld [vmem:[#allocation8_spill] sm:$0xff] }
 0x10b   :  { %v4676_v7 = vadd.f32 %v456_v13, %v4227_v28  ;;  %v446_v5 = vadd.f32 %v445_v11, %v368_v19  ;;  %v2733_v28 = vld [vmem:[%s6352_s10] ss:$0 sm:$0xff]  ;;  %v6500_v13 = vld [vmem:[#allocation7_spill] sm:$0xff]  ;;  %v6502_v19 = vld [vmem:[#allocation13_spill] sm:$0xff] }
 0x10d   :  { %v2738_v1 = vclamp-gez-f32 %v4676_v7, 1.0  ;;  %v460_v63 = vmul.f32 0.2, %v446_v5  ;;  %v2737_v5 = vsel %vm450_vm6, 1.0, %v6494_v21 }
 0x10f   :  { %v4680_v15 = vadd.f32 %v460_v63, %v4514_v29  ;;  %3278 = vmatmul.mubr.f32.vlgmr.msra.gmra.mxu0 %v2738_v1  ;;  %v362_v63 = vpop.f32.mrf.mxu0  ;;  %v4700_v1 = vadd.f32 %v2733_v28, %v197_v0  ;;  %v6506_v29 = vld [vmem:[#allocation25_spill] sm:$0xff]  ;;  %v6510_v0 = vld [vmem:[#allocation12_spill] sm:$0xff] }
 0x110   :  { %3281 = vmatpush3.msra.mxu0 %v4281_v41  ;;  %3312 = vmatprep.mubr.msk.f32.mxu0 %vm4010_vm0, %v6494_v21  ;;  %v6515_v28 = vld [vmem:[#allocation20_spill] sm:$0xff] }
 0x111   :  { %3282 = vmatprep.subr.mxu0 %v6494_v21  ;;  %v2739_v17 = vclamp-gez-f32 %v4680_v15, 1.0  ;;  %6498 = vst [vmem:[#allocation30_spill] sm:$0xff] %v4700_v1 }
 0x112   :  { %3283 = vmatpush3.msra.mxu0 %v4300_v44 }
 0x113   :  { %3284 = vmatprep.subr.mxu0 %v6494_v21  ;;  %609 = vmatmul.mubr.f32.vlgmr.msra.gmra.mxu1 %v2739_v17  ;;  %v6514_v17 = vld [vmem:[#allocation18_spill] sm:$0xff] }
 0x114   :  { %3285 = vmatpush3.msra.mxu0 %v4319_v47  ;;  %3316 = vmatpush3.msra.mxu1 %v4089_v2  ;;  %v453_v2 = vadd.f32 %v362_v63, %v4700_v1  ;;  %v6516_v63 = vld [vmem:[#allocation21_spill] sm:$0xff] }
 0x115   :  { %3286 = vmatprep.subr.mxu0 %v6494_v21  ;;  %3317 = vmatprep.subr.mxu1 %v6494_v21 }
 0x116   :  { %3287 = vmatpush3.msra.mxu0 %v4338_v50  ;;  %3318 = vmatpush3.msra.mxu1 %v4098_v4  ;;  %v6499_v4 = vld [vmem:[#allocation6_spill] sm:$0xff]  ;;  %v454_v11 = vmul.f32 %v2737_v5, %v453_v2  ;;  %v6517_v2 = vld [vmem:[#allocation23_spill] sm:$0xff]  ;;  %v6518_v5 = vld [vmem:[#allocation24_spill] sm:$0xff] }
 0x117   :  { %3288 = vmatprep.subr.mxu0 %v6494_v21  ;;  %3319 = vmatprep.subr.mxu1 %v6494_v21 }
 0x118   :  { %3289 = vmatpush3.msra.mxu0 %v4357_v53  ;;  %3320 = vmatpush3.msra.mxu1 %v4108_v6  ;;  %v447_v6 = vsub.f32 0.0, %v4519_v31 }
 0x119   :  { %3290 = vmatprep.subr.mxu0 %v6494_v21  ;;  %3321 = vmatprep.subr.mxu1 %v6494_v21 }
 0x11a   :  { %3291 = vmatpush3.msra.mxu0 %v4376_v56  ;;  %3322 = vmatpush3.msra.mxu1 %v4119_v8  ;;  %v6501_v8 = vld [vmem:[#allocation10_spill] sm:$0xff] }
 0x11b   :  { %3292 = vmatprep.subr.mxu0 %v6494_v21  ;;  %3323 = vmatprep.subr.mxu1 %v6494_v21 }
 0x11c   :  { %3293 = vmatpush3.msra.mxu0 %v6499_v4  ;;  %3324 = vmatpush3.msra.mxu1 %v4130_v10  ;;  %v455_v10 = vadd.f32 %v454_v11, %v447_v6  ;;  %v6519_v6 = vld [vmem:[#allocation26_spill] sm:$0xff]  ;;  %v6520_v11 = vld [vmem:[#allocation27_spill] sm:$0xff] }
 0x11d   :  { %3294 = vmatprep.subr.mxu0 %v6494_v21  ;;  %3325 = vmatprep.subr.mxu1 %v6494_v21 }
 0x11e   :  { %3295 = vmatpush3.msra.mxu0 %v6500_v13  ;;  %3326 = vmatpush3.msra.mxu1 %v4141_v12  ;;  %v6503_v12 = vld [vmem:[#allocation16_spill] sm:$0xff]  ;;  %v464_v23 = vmul.f32 0.2, %v455_v10 }
 0x11f   :  { %3296 = vmatprep.subr.mxu0 %v6494_v21  ;;  %3327 = vmatprep.subr.mxu1 %v6494_v21  ;;  %v6521_v10 = vld [vmem:[#allocation28_spill] sm:$0xff] }
 0x120   :  { %3297 = vmatpush3.msra.mxu0 %v6501_v8  ;;  %3328 = vmatpush3.msra.mxu1 %v4152_v14  ;;  %v6504_v14 = vld [vmem:[#allocation19_spill] sm:$0xff]  ;;  %v4742_v25 = vadd.f32 %v464_v23, %v4519_v31  ;;  %v6522_v23 = vld [vmem:[#allocation29_spill] sm:$0xff] }
 0x121   :  { %3298 = vmatprep.subr.mxu0 %v6494_v21  ;;  %3329 = vmatprep.subr.mxu1 %v6494_v21 }
 0x122   :  { %3299 = vmatpush3.msra.mxu0 %v6502_v19  ;;  %3330 = vmatpush3.msra.mxu1 %v4163_v16  ;;  %v6505_v16 = vld [vmem:[#allocation22_spill] sm:$0xff]  ;;  %v2740_v31 = vclamp-gez-f32 %v4742_v25, 1.0 }
 0x123   :  { %3300 = vmatprep.subr.mxu0 %v6494_v21  ;;  %3331 = vmatprep.subr.mxu1 %v6494_v21 }
 0x124   :  { %3301 = vmatpush3.msra.mxu0 %v6503_v12  ;;  %3332 = vmatpush3.msra.mxu1 %v4174_v18 }
 0x125   :  { %3302 = vmatprep.subr.mxu0 %v6494_v21  ;;  %3333 = vmatprep.subr.mxu1 %v6494_v21 }
 0x126   :  { %3303 = vmatpush3.msra.mxu0 %v6504_v14  ;;  %3334 = vmatpush3.msra.mxu1 %v4185_v20 }
 0x127   :  { %3304 = vmatprep.subr.mxu0 %v6494_v21  ;;  %3335 = vmatprep.subr.mxu1 %v6494_v21 }
 0x128   :  { %3305 = vmatpush3.msra.mxu0 %v6505_v16  ;;  %3336 = vmatpush3.msra.mxu1 %v4196_v22 }
 0x129   :  { %3306 = vmatprep.subr.mxu0 %v6494_v21  ;;  %3337 = vmatprep.subr.mxu1 %v6494_v21 }
 0x12a   :  { %3307 = vmatpush3.msra.mxu0 %v6506_v29  ;;  %3338 = vmatpush3.msra.mxu1 %v4207_v24 }
 0x12b   :  { %3308 = vmatprep.subr.mxu0 %v6494_v21  ;;  %3339 = vmatprep.subr.mxu1 %v6494_v21 }
 0x12c   :  { %3309 = vmatpush3.msra.mxu0 %v4559_v26  ;;  %3340 = vmatpush3.msra.mxu1 %v4221_v27 }
 0x12d   :  { %3310 = vmatprep.subr.mxu0 %v6494_v21  ;;  %3341 = vmatprep.subr.mxu1 %v6494_v21 }
 0x12e   :  { %3311 = vmatpush3.msra.mxu0 %v4580_v35  ;;  %3342 = vmatpush3.msra.mxu1 %v4237_v30 }
 0x12f   :  { %3313 = vmatmul.mubr.f32.vlgmr.msra.gmra.mxu0 %v2740_v31  ;;  %3343 = vmatprep.subr.mxu1 %v6494_v21  ;;  %v458_v31 = vmax.f32 %v4676_v7, 0.0 }
 0x130   :  { %3344 = vmatpush3.msra.mxu1 %v4248_v33  ;;  %3347 = vmatprep.mubr.msk.f32.mxu1 %vm4010_vm0, %v6494_v21 }
 0x131   :  { %3345 = vmatprep.subr.mxu1 %v6494_v21  ;;  %794 = vmatprep.subr.mxu0 %v4268_v38 }
 0x132   :  { %3346 = vmatpush3.msra.mxu1 %v4261_v37  ;;  %795 = vmatpush1.msra.mxu0 %v4276_v40  ;;  %v459_v37 = vmin.f32 %v458_v31, 1.0 }
 0x133   :  { %3350 = vmatprep.subr.mxu1 %v6494_v21  ;;  %796 = vmatprep.subr.mxu0 %v4289_v42 }
 0x134   :  { %797 = vmatpush1.msra.mxu0 %v4295_v43  ;;  %858 = vmatprep.mubr.f32.mxu0 %v6494_v21 }
 0x135   :  { %798 = vmatprep.subr.mxu0 %v4307_v45 }
 0x136   :  { %799 = vmatpush1.msra.mxu0 %v4314_v46 }
 0x137   :  { %800 = vmatprep.subr.mxu0 %v4326_v48 }
 0x138   :  { %801 = vmatpush1.msra.mxu0 %v4333_v49 }
 0x139   :  { %802 = vmatprep.subr.mxu0 %v4345_v51 }
 0x13a   :  { %803 = vmatpush1.msra.mxu0 %v4352_v52 }
 0x13b   :  { %804 = vmatprep.subr.mxu0 %v4364_v54 }
 0x13c   :  { %805 = vmatpush1.msra.mxu0 %v4371_v55 }
 0x13d   :  { %806 = vmatprep.subr.mxu0 %v4383_v57 }
 0x13e   :  { %807 = vmatpush1.msra.mxu0 %v4390_v58 }
 0x13f   :  { %808 = vmatprep.subr.mxu0 %v4402_v60 }
 0x140   :  { %809 = vmatpush1.msra.mxu0 %v4409_v61 }
 0x141   :  { %810 = vmatprep.subr.mxu0 %v6507_v32 }
 0x142   :  { %811 = vmatpush1.msra.mxu0 %v6508_v34 }
 0x143   :  { %812 = vmatprep.subr.mxu0 %v6509_v36 }
 0x144   :  { %813 = vmatpush1.msra.mxu0 %v6510_v0 }
 0x145   :  { %814 = vmatprep.subr.mxu0 %v6511_v62 }
 0x146   :  { %815 = vmatpush1.msra.mxu0 %v6512_v59 }
 0x147   :  { %816 = vmatprep.subr.mxu0 %v6513_v39 }
 0x148   :  { %817 = vmatpush1.msra.mxu0 %v6514_v17 }
 0x149   :  { %818 = vmatprep.subr.mxu0 %v6515_v28 }
 0x14a   :  { %819 = vmatpush1.msra.mxu0 %v6516_v63  ;;  %v615_v63 = vsub.f32 0.0, %v459_v37 }
 0x14b   :  { %820 = vmatprep.subr.mxu0 %v6517_v2 }
 0x14c   :  { %821 = vmatpush1.msra.mxu0 %v6518_v5 }
 0x14d   :  { %822 = vmatprep.subr.mxu0 %v6519_v6 }
 0x14e   :  { %823 = vmatpush1.msra.mxu0 %v6520_v11 }
 0x14f   :  { %824 = vmatprep.subr.mxu0 %v6521_v10  ;;  %v466_v10 = vmax.f32 %v4742_v25, 0.0 }
 0x150   :  { %825 = vmatpush1.msra.mxu0 %v6522_v23 }
 0x151   :  { %3385 = vmatprep.subr.mxu0 %v6494_v21 }
 0x1cf   :  { %v540_v33 = vpop.f32.mrf.mxu0 }
 0x1d1   :  { %v3279_v30 = vpop.f32.mrf.mxu0 }
 0x1d2   :  { %v467_v30 = vmin.f32 %v466_v10, 1.0 }
 0x1d3   :  { %v610_v28 = vpop.f32.mrf.mxu1 }
 0x1d4   :  { %v616_v2 = vadd.f32 %v615_v63, %v610_v28  ;;  %vm698_vm7 = vcmp.ge.f32.partialorder %v467_v30, 0.0  ;;  %vm699_vm8 = vcmp.le.f32.partialorder %v467_v30, 1.0  ;;  %v697_v63 = vsub.f32 0.0, %v467_v30 }
 0x1d5   :  { %vm700_vm9 = vmand %vm698_vm7, %vm699_vm8 }
 0x1d6   :  { %v617_v5 = vadd.f32 %v4669_v3, %v616_v2 }
 0x1d8   :  { %v706_v27 = vmul.f32 0.2, %v617_v5 }
 0x1da   :  { %v4800_v6 = vadd.f32 %v706_v27, %v459_v37  ;;  %v462_v27 = vmax.f32 %v4680_v15, 0.0  ;;  %v612_v37 = vpop.f32.mrf.mxu1  ;;  %v2742_v15 = vsel %vm700_vm9, 1.0, %v6494_v21 }
 0x1db   :  { %v703_v7 = vadd.f32 %v612_v37, %v4700_v1 }
 0x1dc   :  { %v2743_v11 = vclamp-gez-f32 %v4800_v6, 1.0  ;;  %v463_v25 = vmin.f32 %v462_v27, 1.0 }
 0x1dd   :  { %v704_v28 = vmul.f32 %v2742_v15, %v703_v7 }
 0x1de   :  { %3348 = vmatmul.mubr.f32.vlgmr.msra.gmra.mxu1 %v2743_v11  ;;  %vm619_vm10 = vcmp.ge.f32.partialorder %v463_v25, 0.0  ;;  %vm620_vm11 = vcmp.le.f32.partialorder %v463_v25, 1.0  ;;  %v618_v7 = vsub.f32 0.0, %v463_v25 }
 0x1df   :  { %3351 = vmatpush3.msra.mxu1 %v4281_v41  ;;  %3382 = vmatprep.mubr.msk.f32.mxu1 %vm4010_vm0, %v6494_v21  ;;  %v705_v5 = vadd.f32 %v704_v28, %v697_v63  ;;  %vm621_vm12 = vmand %vm619_vm10, %vm620_vm11 }
 0x1e0   :  { %3352 = vmatprep.subr.mxu1 %v6494_v21  ;;  %v2741_v27 = vsel %vm621_vm12, 1.0, %v6494_v21 }
 0x1e1   :  { %3353 = vmatpush3.msra.mxu1 %v4300_v44  ;;  %v714_v37 = vmul.f32 0.2, %v705_v5 }
 0x1e2   :  { %3354 = vmatprep.subr.mxu1 %v6494_v21 }
 0x1e3   :  { %3355 = vmatpush3.msra.mxu1 %v4319_v47  ;;  %v4836_v63 = vadd.f32 %v714_v37, %v467_v30  ;;  %v4851_v30 = vld [vmem:[%s6343_s4 + $0x78] sm:$0xff] }
 0x1e4   :  { %3356 = vmatprep.subr.mxu1 %v6494_v21 }
 0x1e5   :  { %3357 = vmatpush3.msra.mxu1 %v4338_v50 }
 0x1e6   :  { %3358 = vmatprep.subr.mxu1 %v6494_v21 }
 0x1e7   :  { %3359 = vmatpush3.msra.mxu1 %v4357_v53 }
 0x1e8   :  { %3360 = vmatprep.subr.mxu1 %v6494_v21 }
 0x1e9   :  { %3361 = vmatpush3.msra.mxu1 %v4376_v56 }
 0x1ea   :  { %3362 = vmatprep.subr.mxu1 %v6494_v21 }
 0x1eb   :  { %3363 = vmatpush3.msra.mxu1 %v6499_v4 }
 0x1ec   :  { %3364 = vmatprep.subr.mxu1 %v6494_v21 }
 0x1ed   :  { %3365 = vmatpush3.msra.mxu1 %v6500_v13 }
 0x1ee   :  { %3366 = vmatprep.subr.mxu1 %v6494_v21 }
 0x1ef   :  { %v690_v2 = vpop.f32.mrf.mxu0  ;;  %3367 = vmatpush3.msra.mxu1 %v6501_v8 }
 0x1f0   :  { %v691_v11 = vadd.f32 %v4664_v9, %v690_v2  ;;  %3368 = vmatprep.subr.mxu1 %v6494_v21 }
 0x1f1   :  { %v3314_v10 = vpop.f32.mrf.mxu0  ;;  %3369 = vmatpush3.msra.mxu1 %v6502_v19 }
 0x1f2   :  { %v694_v31 = vadd.f32 %v691_v11, %v540_v33  ;;  %3370 = vmatprep.subr.mxu1 %v6494_v21  ;;  %v2745_v11 = vclamp-gez-f32 %v4836_v63, 1.0 }
 0x1f3   :  { %3371 = vmatpush3.msra.mxu1 %v6503_v12 }
 0x1f4   :  { %v695_v15 = vmul.f32 %v2741_v27, %v694_v31  ;;  %3372 = vmatprep.subr.mxu1 %v6494_v21 }
 0x1f5   :  { %3373 = vmatpush3.msra.mxu1 %v6504_v14 }
 0x1f6   :  { %v696_v28 = vadd.f32 %v695_v15, %v618_v7  ;;  %3374 = vmatprep.subr.mxu1 %v6494_v21 }
 0x1f7   :  { %3375 = vmatpush3.msra.mxu1 %v6505_v16 }
 0x1f8   :  { %v710_v33 = vmul.f32 0.2, %v696_v28  ;;  %3376 = vmatprep.subr.mxu1 %v6494_v21 }
 0x1f9   :  { %3377 = vmatpush3.msra.mxu1 %v6506_v29 }
 0x1fa   :  { %v4840_v2 = vadd.f32 %v710_v33, %v463_v25  ;;  %3378 = vmatprep.subr.mxu1 %v6494_v21  ;;  %v4860_v25 = vld [vmem:[%s6343_s4 + $0x70] sm:$0xff] }
 0x1fb   :  { %3379 = vmatpush3.msra.mxu1 %v4559_v26 }
 0x1fc   :  { %3380 = vmatprep.subr.mxu1 %v6494_v21  ;;  %v2744_v5 = vclamp-gez-f32 %v4840_v2, 1.0 }
 0x1fd   :  { %3381 = vmatpush3.msra.mxu1 %v4580_v35 }
 0x1fe   :  { %859 = vmatmul.mubr.f32.vlgmr.msra.gmra.mxu0 %v2744_v5  ;;  %3383 = vmatmul.mubr.f32.vlgmr.msra.gmra.mxu1 %v2745_v11  ;;  %v716_v5 = vmax.f32 %v4836_v63, 0.0  ;;  %v5060_v63 = vld [vmem:[%s6343_s4 + $0x10] sm:$0xff] }
 0x1ff   :  { %3386 = vmatpush3.msra.mxu0 %v4851_v30  ;;  %1044 = vmatprep.subr.mxu1 %v4268_v38  ;;  %v4869_v38 = vld [vmem:[%s6343_s4 + $0x68] sm:$0xff]  ;;  %6534 = vst [vmem:[#allocation6_spill] sm:$0xff] %v5060_v63 }
 0x200   :  { %3387 = vmatprep.subr.mxu0 %v6494_v21  ;;  %1045 = vmatpush1.msra.mxu1 %v4276_v40  ;;  %v4878_v40 = vld [vmem:[%s6343_s4 + $0x60] sm:$0xff] }
 0x201   :  { %3388 = vmatpush3.msra.mxu0 %v4860_v25  ;;  %1046 = vmatprep.subr.mxu1 %v4289_v42  ;;  %v4887_v42 = vld [vmem:[%s6343_s4 + $0x58] sm:$0xff] }
 0x202   :  { %3389 = vmatprep.subr.mxu0 %v6494_v21  ;;  %1047 = vmatpush1.msra.mxu1 %v4295_v43  ;;  %v4896_v43 = vld [vmem:[%s6343_s4 + $0x50] sm:$0xff] }
 0x203   :  { %3390 = vmatpush3.msra.mxu0 %v4869_v38  ;;  %1048 = vmatprep.subr.mxu1 %v4307_v45  ;;  %v4905_v45 = vld [vmem:[%s6343_s4 + $0x48] sm:$0xff] }
 0x204   :  { %3391 = vmatprep.subr.mxu0 %v6494_v21  ;;  %1049 = vmatpush1.msra.mxu1 %v4314_v46  ;;  %v4914_v46 = vld [vmem:[%s6343_s4 + $0x40] sm:$0xff] }
 0x205   :  { %3392 = vmatpush3.msra.mxu0 %v4878_v40  ;;  %1050 = vmatprep.subr.mxu1 %v4326_v48  ;;  %v6526_v48 = vld [vmem:[#allocation3_spill] sm:$0xff] }
 0x206   :  { %3393 = vmatprep.subr.mxu0 %v6494_v21  ;;  %1051 = vmatpush1.msra.mxu1 %v4333_v49  ;;  %v6527_v49 = vld [vmem:[#allocation23_spill] sm:$0xff] }
 0x207   :  { %3394 = vmatpush3.msra.mxu0 %v4887_v42  ;;  %1052 = vmatprep.subr.mxu1 %v4345_v51  ;;  %v6529_v51 = vld [vmem:[#allocation24_spill] sm:$0xff] }
 0x208   :  { %3395 = vmatprep.subr.mxu0 %v6494_v21  ;;  %1053 = vmatpush1.msra.mxu1 %v4352_v52  ;;  %v6530_v52 = vld [vmem:[#allocation26_spill] sm:$0xff] }
 0x209   :  { %3396 = vmatpush3.msra.mxu0 %v4896_v43  ;;  %1054 = vmatprep.subr.mxu1 %v4364_v54  ;;  %v6531_v54 = vld [vmem:[#allocation5_spill] sm:$0xff] }
 0x20a   :  { %3397 = vmatprep.subr.mxu0 %v6494_v21  ;;  %1055 = vmatpush1.msra.mxu1 %v4371_v55  ;;  %v6532_v55 = vld [vmem:[#allocation27_spill] sm:$0xff] }
 0x20b   :  { %3398 = vmatpush3.msra.mxu0 %v4905_v45  ;;  %1056 = vmatprep.subr.mxu1 %v4383_v57  ;;  %v6533_v57 = vld [vmem:[#allocation28_spill] sm:$0xff] }
 0x20c   :  { %3399 = vmatprep.subr.mxu0 %v6494_v21  ;;  %1057 = vmatpush1.msra.mxu1 %v4390_v58 }
 0x20d   :  { %3400 = vmatpush3.msra.mxu0 %v4914_v46  ;;  %1058 = vmatprep.subr.mxu1 %v4402_v60 }
 0x20e   :  { %3401 = vmatprep.subr.mxu0 %v6494_v21  ;;  %1059 = vmatpush1.msra.mxu1 %v4409_v61  ;;  %v712_v61 = vmax.f32 %v4840_v2, 0.0 }
 0x20f   :  { %3402 = vmatpush3.msra.mxu0 %v4174_v18  ;;  %1060 = vmatprep.subr.mxu1 %v6507_v32  ;;  %v6523_v18 = vld [vmem:[#allocation2_spill] sm:$0xff]  ;;  %v708_v32 = vmax.f32 %v4800_v6, 0.0 }
 0x210   :  { %3403 = vmatprep.subr.mxu0 %v6494_v21  ;;  %1061 = vmatpush1.msra.mxu1 %v6508_v34  ;;  %v713_v34 = vmin.f32 %v712_v61, 1.0  ;;  %v5150_v61 = vld [vmem:[%s6346_s5 + $0xa0] sm:$0xff] }
 0x211   :  { %3404 = vmatpush3.msra.mxu0 %v4185_v20  ;;  %1062 = vmatprep.subr.mxu1 %v6509_v36  ;;  %v6524_v20 = vld [vmem:[#allocation20_spill] sm:$0xff]  ;;  %v709_v36 = vmin.f32 %v708_v32, 1.0  ;;  %v5156_v32 = vld [vmem:[%s6346_s5 + $0x98] sm:$0xff] }
 0x212   :  { %3405 = vmatprep.subr.mxu0 %v6494_v21  ;;  %1063 = vmatpush1.msra.mxu1 %v6510_v0  ;;  %vm869_vm13 = vcmp.ge.f32.partialorder %v713_v34, 0.0  ;;  %vm870_vm14 = vcmp.le.f32.partialorder %v713_v34, 1.0  ;;  %v868_v7 = vsub.f32 0.0, %v713_v34 }
 0x213   :  { %3406 = vmatpush3.msra.mxu0 %v4196_v22  ;;  %1064 = vmatprep.subr.mxu1 %v6511_v62  ;;  %v6525_v22 = vld [vmem:[#allocation21_spill] sm:$0xff]  ;;  %v865_v0 = vsub.f32 0.0, %v709_v36  ;;  %vm871_vm15 = vmand %vm869_vm13, %vm870_vm14 }
 0x214   :  { %3407 = vmatprep.subr.mxu0 %v6494_v21  ;;  %1065 = vmatpush1.msra.mxu1 %v6512_v59  ;;  %v2746_v27 = vsel %vm871_vm15, 1.0, %v6494_v21 }
 0x215   :  { %3408 = vmatpush3.msra.mxu0 %v4207_v24  ;;  %1066 = vmatprep.subr.mxu1 %v6513_v39  ;;  %v6528_v24 = vld [vmem:[#allocation4_spill] sm:$0xff] }
 0x216   :  { %3409 = vmatprep.subr.mxu0 %v6494_v21  ;;  %1067 = vmatpush1.msra.mxu1 %v6514_v17 }
 0x217   :  { %3410 = vmatpush3.msra.mxu0 %v6523_v18  ;;  %1068 = vmatprep.subr.mxu1 %v6524_v20  ;;  %v717_v20 = vmin.f32 %v716_v5, 1.0  ;;  %v5264_v5 = vld [vmem:[%s6346_s5 + $0x8] sm:$0xff] }
 0x218   :  { %3411 = vmatprep.subr.mxu0 %v6494_v21  ;;  %1069 = vmatpush1.msra.mxu1 %v6525_v22  ;;  %v5082_v22 = vld [vmem:[%s6343_s4] sm:$0xff]  ;;  %6550 = vst [vmem:[#allocation29_spill] sm:$0xff] %v5264_v5 }
 0x219   :  { %3412 = vmatpush3.msra.mxu0 %v6526_v48  ;;  %1070 = vmatprep.subr.mxu1 %v6527_v49  ;;  %vm948_vm1 = vcmp.ge.f32.partialorder %v717_v20, 0.0  ;;  %vm949_vm2 = vcmp.le.f32.partialorder %v717_v20, 1.0  ;;  %6536 = vst [vmem:[#allocation10_spill] sm:$0xff] %v5082_v22  ;;  %v5088_v48 = vld [vmem:[%s6346_s5 + $0xf0] sm:$0xff]  ;;  %v5095_v49 = vld [vmem:[%s6346_s5 + $0xe8] sm:$0xff] }
 0x21a   :  { %3413 = vmatprep.subr.mxu0 %v6494_v21  ;;  %3417 = vmatprep.mubr.msk.f32.mxu0 %vm4010_vm0, %v6494_v21  ;;  %vm950_vm3 = vmand %vm948_vm1, %vm949_vm2 }
 0x21b   :  { %3414 = vmatpush3.msra.mxu0 %v6528_v24  ;;  %1071 = vmatpush1.msra.mxu1 %v6529_v51  ;;  %v5101_v24 = vld [vmem:[%s6346_s5 + $0xe0] sm:$0xff]  ;;  %v5108_v51 = vld [vmem:[%s6346_s5 + $0xd8] sm:$0xff] }
 0x21c   :  { %3415 = vmatprep.subr.mxu0 %v6494_v21  ;;  %1072 = vmatprep.subr.mxu1 %v6530_v52  ;;  %v5114_v52 = vld [vmem:[%s6346_s5 + $0xd0] sm:$0xff] }
 0x21d   :  { %3416 = vmatpush3.msra.mxu0 %v6531_v54  ;;  %1073 = vmatpush1.msra.mxu1 %v6532_v55  ;;  %v5120_v54 = vld [vmem:[%s6346_s5 + $0xc8] sm:$0xff]  ;;  %v5126_v55 = vld [vmem:[%s6346_s5 + $0xc0] sm:$0xff] }
 0x21e   :  { %3420 = vmatprep.subr.mxu0 %v6494_v21  ;;  %1074 = vmatprep.subr.mxu1 %v6533_v57  ;;  %v5132_v57 = vld [vmem:[%s6346_s5 + $0xb8] sm:$0xff] }
 0x21f   :  { %1075 = vmatpush1.msra.mxu1 %v6522_v23  ;;  %1108 = vmatprep.mubr.f32.mxu1 %v6494_v21 }
 0x220   :  { %3455 = vmatprep.subr.mxu1 %v6494_v21 }
 0x29e   :  { %v790_v58 = vpop.f32.mrf.mxu1 }
 0x2a0   :  { %v3349_v60 = vpop.f32.mrf.mxu1 }
 0x2a1   :  { %v5144_v60 = vld [vmem:[%s6346_s5 + $0xa8] sm:$0xff] }
 0x2be   :  { %v860_v62 = vpop.f32.mrf.mxu0  ;;  %v940_v59 = vpop.f32.mrf.mxu1 }
 0x2bf   :  { %v866_v39 = vadd.f32 %v865_v0, %v860_v62  ;;  %v941_v17 = vadd.f32 %v4664_v9, %v940_v59  ;;  %v5174_v0 = vld [vmem:[%s6346_s5 + $0x80] sm:$0xff]  ;;  %v5180_v62 = vld [vmem:[%s6346_s5 + $0x78] sm:$0xff]  ;;  %v5186_v59 = vld [vmem:[%s6346_s5 + $0x70] sm:$0xff] }
 0x2c0   :  { %v3384_v23 = vpop.f32.mrf.mxu1  ;;  %6537 = vst [vmem:[#allocation13_spill] sm:$0xff] %v5186_v59 }
 0x2c1   :  { %v867_v10 = vadd.f32 %v4669_v3, %v866_v39  ;;  %v944_v31 = vadd.f32 %v941_v17, %v790_v58  ;;  %v5138_v58 = vld [vmem:[%s6346_s5 + $0xb0] sm:$0xff]  ;;  %v5192_v39 = vld [vmem:[%s6346_s5 + $0x68] sm:$0xff]  ;;  %v5198_v17 = vld [vmem:[%s6346_s5 + $0x60] sm:$0xff] }
 0x2c2   :  { %6538 = vst [vmem:[#allocation16_spill] sm:$0xff] %v5192_v39  ;;  %6539 = vst [vmem:[#allocation19_spill] sm:$0xff] %v5198_v17  ;;  %v5204_v23 = vld [vmem:[%s6346_s5 + $0x58] sm:$0xff] }
 0x2c3   :  { %v956_v37 = vmul.f32 0.2, %v867_v10  ;;  %v945_v6 = vmul.f32 %v2746_v27, %v944_v31  ;;  %6540 = vst [vmem:[#allocation22_spill] sm:$0xff] %v5204_v23  ;;  %v5210_v10 = vld [vmem:[%s6346_s5 + $0x50] sm:$0xff]  ;;  %v5216_v31 = vld [vmem:[%s6346_s5 + $0x48] sm:$0xff]  ;;  %v5222_v27 = vld [vmem:[%s6346_s5 + $0x40] sm:$0xff] }
 0x2c4   :  { %6541 = vst [vmem:[#allocation25_spill] sm:$0xff] %v5210_v10  ;;  %6542 = vst [vmem:[#allocation8_spill] sm:$0xff] %v5216_v31 }
 0x2c5   :  { %v4961_v15 = vadd.f32 %v956_v37, %v709_v36  ;;  %v946_v28 = vadd.f32 %v945_v6, %v868_v7  ;;  %v5168_v36 = vld [vmem:[%s6346_s5 + $0x88] sm:$0xff]  ;;  %6543 = vst [vmem:[#allocation9_spill] sm:$0xff] %v5222_v27  ;;  %v5228_v37 = vld [vmem:[%s6346_s5 + $0x38] sm:$0xff]  ;;  %v5234_v7 = vld [vmem:[%s6346_s5 + $0x30] sm:$0xff] }
 0x2c6   :  { %6544 = vst [vmem:[#allocation11_spill] sm:$0xff] %v5228_v37  ;;  %6545 = vst [vmem:[#allocation12_spill] sm:$0xff] %v5234_v7  ;;  %v5240_v6 = vld [vmem:[%s6346_s5 + $0x28] sm:$0xff] }
 0x2c7   :  { %v2748_v33 = vclamp-gez-f32 %v4961_v15, 1.0  ;;  %v960_v2 = vmul.f32 0.2, %v946_v28  ;;  %6546 = vst [vmem:[#allocation14_spill] sm:$0xff] %v5240_v6  ;;  %v5246_v28 = vld [vmem:[%s6346_s5 + $0x20] sm:$0xff] }
 0x2c8   :  { %6547 = vst [vmem:[#allocation15_spill] sm:$0xff] %v5246_v28 }
 0x2c9   :  { %v4965_v11 = vadd.f32 %v960_v2, %v713_v34  ;;  %3418 = vmatmul.mubr.f32.vlgmr.msra.gmra.mxu0 %v2748_v33  ;;  %v5162_v34 = vld [vmem:[%s6346_s5 + $0x90] sm:$0xff]  ;;  %v5252_v33 = vld [vmem:[%s6346_s5 + $0x18] sm:$0xff] }
 0x2ca   :  { %3421 = vmatpush3.msra.mxu0 %v4281_v41  ;;  %3452 = vmatprep.mubr.msk.f32.mxu0 %vm4010_vm0, %v6494_v21  ;;  %v862_v41 = vpop.f32.mrf.mxu0  ;;  %6548 = vst [vmem:[#allocation17_spill] sm:$0xff] %v5252_v33  ;;  %v5258_v2 = vld [vmem:[%s6346_s5 + $0x10] sm:$0xff] }
 0x2cb   :  { %3422 = vmatprep.subr.mxu0 %v6494_v21  ;;  %v2749_v18 = vclamp-gez-f32 %v4965_v11, 1.0  ;;  %6549 = vst [vmem:[#allocation18_spill] sm:$0xff] %v5258_v2 }
 0x2cc   :  { %3423 = vmatpush3.msra.mxu0 %v4300_v44  ;;  %v953_v44 = vadd.f32 %v862_v41, %v4700_v1 }
 0x2cd   :  { %3424 = vmatprep.subr.mxu0 %v6494_v21  ;;  %1109 = vmatmul.mubr.f32.vlgmr.msra.gmra.mxu1 %v2749_v18  ;;  %v5270_v18 = vld [vmem:[%s6346_s5] sm:$0xff] }
 0x2ce   :  { %3425 = vmatpush3.msra.mxu0 %v4319_v47  ;;  %3456 = vmatpush3.msra.mxu1 %v4851_v30  ;;  %v2747_v47 = vsel %vm950_vm3, 1.0, %v6494_v21  ;;  %6551 = vst [vmem:[#allocation2_spill] sm:$0xff] %v5270_v18 }
 0x2cf   :  { %3426 = vmatprep.subr.mxu0 %v6494_v21  ;;  %3457 = vmatprep.subr.mxu1 %v6494_v21 }
 0x2d0   :  { %3427 = vmatpush3.msra.mxu0 %v4338_v50  ;;  %3458 = vmatpush3.msra.mxu1 %v4860_v25  ;;  %v954_v50 = vmul.f32 %v2747_v47, %v953_v44 }
 0x2d1   :  { %3428 = vmatprep.subr.mxu0 %v6494_v21  ;;  %3459 = vmatprep.subr.mxu1 %v6494_v21 }
 0x2d2   :  { %3429 = vmatpush3.msra.mxu0 %v4357_v53  ;;  %3460 = vmatpush3.msra.mxu1 %v4869_v38  ;;  %v947_v53 = vsub.f32 0.0, %v717_v20 }
 0x2d3   :  { %3430 = vmatprep.subr.mxu0 %v6494_v21  ;;  %3461 = vmatprep.subr.mxu1 %v6494_v21 }
 0x2d4   :  { %3431 = vmatpush3.msra.mxu0 %v4376_v56  ;;  %3462 = vmatpush3.msra.mxu1 %v4878_v40  ;;  %v955_v56 = vadd.f32 %v954_v50, %v947_v53 }
 0x2d5   :  { %3432 = vmatprep.subr.mxu0 %v6494_v21  ;;  %3463 = vmatprep.subr.mxu1 %v6494_v21 }
 0x2d6   :  { %3433 = vmatpush3.msra.mxu0 %v6499_v4  ;;  %3464 = vmatpush3.msra.mxu1 %v4887_v42  ;;  %v5012_v4 = vld [vmem:[%s6343_s4 + $0x38] sm:$0xff] }
 0x2d7   :  { %3434 = vmatprep.subr.mxu0 %v6494_v21  ;;  %3465 = vmatprep.subr.mxu1 %v6494_v21 }
 0x2d8   :  { %3435 = vmatpush3.msra.mxu0 %v6500_v13  ;;  %3466 = vmatpush3.msra.mxu1 %v4896_v43  ;;  %v964_v13 = vmul.f32 0.2, %v955_v56 }
 0x2d9   :  { %3436 = vmatprep.subr.mxu0 %v6494_v21  ;;  %3467 = vmatprep.subr.mxu1 %v6494_v21 }
 0x2da   :  { %3437 = vmatpush3.msra.mxu0 %v6501_v8  ;;  %3468 = vmatpush3.msra.mxu1 %v4905_v45  ;;  %v5021_v8 = vld [vmem:[%s6343_s4 + $0x30] sm:$0xff] }
 0x2db   :  { %3438 = vmatprep.subr.mxu0 %v6494_v21  ;;  %3469 = vmatprep.subr.mxu1 %v6494_v21 }
 0x2dc   :  { %3439 = vmatpush3.msra.mxu0 %v6502_v19  ;;  %3470 = vmatpush3.msra.mxu1 %v4914_v46  ;;  %v5030_v19 = vld [vmem:[%s6343_s4 + $0x28] sm:$0xff] }
 0x2dd   :  { %3440 = vmatprep.subr.mxu0 %v6494_v21  ;;  %3471 = vmatprep.subr.mxu1 %v6494_v21 }
 0x2de   :  { %3441 = vmatpush3.msra.mxu0 %v6503_v12  ;;  %3472 = vmatpush3.msra.mxu1 %v5012_v4  ;;  %v5033_v12 = vadd.f32 %v964_v13, %v717_v20  ;;  %v958_v20 = vmax.f32 %v4961_v15, 0.0  ;;  %v5283_v15 = vld [vmem:[%s6347_s6 + $0x78] sm:$0xff] }
 0x2df   :  { %3442 = vmatprep.subr.mxu0 %v6494_v21  ;;  %3473 = vmatprep.subr.mxu1 %v6494_v21 }
 0x2e0   :  { %3443 = vmatpush3.msra.mxu0 %v6504_v14  ;;  %3474 = vmatpush3.msra.mxu1 %v5021_v8  ;;  %v5041_v14 = vld [vmem:[%s6343_s4 + $0x20] sm:$0xff]  ;;  %v959_v41 = vmin.f32 %v958_v20, 1.0  ;;  %v5292_v20 = vld [vmem:[%s6347_s6 + $0x70] sm:$0xff] }
 0x2e1   :  { %3444 = vmatprep.subr.mxu0 %v6494_v21  ;;  %3475 = vmatprep.subr.mxu1 %v6494_v21 }
 0x2e2   :  { %3445 = vmatpush3.msra.mxu0 %v6505_v16  ;;  %3476 = vmatpush3.msra.mxu1 %v5030_v19  ;;  %v5050_v16 = vld [vmem:[%s6343_s4 + $0x18] sm:$0xff]  ;;  %v1115_v50 = vsub.f32 0.0, %v959_v41 }
 0x2e3   :  { %3446 = vmatprep.subr.mxu0 %v6494_v21  ;;  %3477 = vmatprep.subr.mxu1 %v6494_v21 }
 0x2e4   :  { %3447 = vmatpush3.msra.mxu0 %v6506_v29  ;;  %3478 = vmatpush3.msra.mxu1 %v5041_v14  ;;  %v2750_v29 = vclamp-gez-f32 %v5033_v12, 1.0 }
 0x2e5   :  { %3448 = vmatprep.subr.mxu0 %v6494_v21  ;;  %3479 = vmatprep.subr.mxu1 %v6494_v21 }
 0x2e6   :  { %3449 = vmatpush3.msra.mxu0 %v4559_v26  ;;  %3480 = vmatpush3.msra.mxu1 %v5050_v16  ;;  %v5067_v26 = vld [vmem:[%s6343_s4 + $0x8] sm:$0xff] }
 0x2e7   :  { %3450 = vmatprep.subr.mxu0 %v6494_v21  ;;  %3481 = vmatprep.subr.mxu1 %v6494_v21  ;;  %6535 = vst [vmem:[#allocation7_spill] sm:$0xff] %v5067_v26 }
 0x2e8   :  { %3451 = vmatpush3.msra.mxu0 %v4580_v35  ;;  %3482 = vmatpush3.msra.mxu1 %v5060_v63  ;;  %v5076_v35 = vld [vmem:[%s6346_s5 + $0xf8] sm:$0xff] }
 0x2e9   :  { %3453 = vmatmul.mubr.f32.vlgmr.msra.gmra.mxu0 %v2750_v29  ;;  %3483 = vmatprep.subr.mxu1 %v6494_v21 }
 0x2ea   :  { %3484 = vmatpush3.msra.mxu1 %v5067_v26  ;;  %3487 = vmatprep.mubr.msk.f32.mxu1 %vm4010_vm0, %v6494_v21 }
 0x2eb   :  { %3485 = vmatprep.subr.mxu1 %v6494_v21  ;;  %1294 = vmatprep.subr.mxu0 %v5076_v35 }
 0x2ec   :  { %3486 = vmatpush3.msra.mxu1 %v5082_v22  ;;  %1295 = vmatpush1.msra.mxu0 %v5088_v48  ;;  %v966_v22 = vmax.f32 %v5033_v12, 0.0  ;;  %v5299_v12 = vld [vmem:[%s6347_s6 + $0x68] sm:$0xff] }
 0x2ed   :  { %3490 = vmatprep.subr.mxu1 %v6494_v21  ;;  %1296 = vmatprep.subr.mxu0 %v5095_v49 }
 0x2ee   :  { %1297 = vmatpush1.msra.mxu0 %v5101_v24  ;;  %1358 = vmatprep.mubr.f32.mxu0 %v6494_v21 }
 0x2ef   :  { %1298 = vmatprep.subr.mxu0 %v5108_v51 }
 0x2f0   :  { %1299 = vmatpush1.msra.mxu0 %v5114_v52 }
 0x2f1   :  { %1300 = vmatprep.subr.mxu0 %v5120_v54 }
 0x2f2   :  { %1301 = vmatpush1.msra.mxu0 %v5126_v55 }
 0x2f3   :  { %1302 = vmatprep.subr.mxu0 %v5132_v57 }
 0x2f4   :  { %1303 = vmatpush1.msra.mxu0 %v5138_v58 }
 0x2f5   :  { %1304 = vmatprep.subr.mxu0 %v5144_v60 }
 0x2f6   :  { %1305 = vmatpush1.msra.mxu0 %v5150_v61 }
 0x2f7   :  { %1306 = vmatprep.subr.mxu0 %v5156_v32 }
 0x2f8   :  { %1307 = vmatpush1.msra.mxu0 %v5162_v34 }
 0x2f9   :  { %1308 = vmatprep.subr.mxu0 %v5168_v36 }
 0x2fa   :  { %1309 = vmatpush1.msra.mxu0 %v5174_v0 }
 0x2fb   :  { %1310 = vmatprep.subr.mxu0 %v5180_v62 }
 0x2fc   :  { %1311 = vmatpush1.msra.mxu0 %v5186_v59 }
 0x2fd   :  { %1312 = vmatprep.subr.mxu0 %v5192_v39 }
 0x2fe   :  { %1313 = vmatpush1.msra.mxu0 %v5198_v17 }
 0x2ff   :  { %1314 = vmatprep.subr.mxu0 %v5204_v23 }
 0x300   :  { %1315 = vmatpush1.msra.mxu0 %v5210_v10 }
 0x301   :  { %1316 = vmatprep.subr.mxu0 %v5216_v31 }
 0x302   :  { %1317 = vmatpush1.msra.mxu0 %v5222_v27 }
 0x303   :  { %1318 = vmatprep.subr.mxu0 %v5228_v37 }
 0x304   :  { %1319 = vmatpush1.msra.mxu0 %v5234_v7 }
 0x305   :  { %1320 = vmatprep.subr.mxu0 %v5240_v6 }
 0x306   :  { %1321 = vmatpush1.msra.mxu0 %v5246_v28 }
 0x307   :  { %1322 = vmatprep.subr.mxu0 %v5252_v33 }
 0x308   :  { %1323 = vmatpush1.msra.mxu0 %v5258_v2 }
 0x309   :  { %1324 = vmatprep.subr.mxu0 %v5264_v5 }
 0x30a   :  { %1325 = vmatpush1.msra.mxu0 %v5270_v18 }
 0x30b   :  { %3525 = vmatprep.subr.mxu0 %v6494_v21 }
 0x389   :  { %v1040_v44 = vpop.f32.mrf.mxu0 }
 0x38b   :  { %v3419_v47 = vpop.f32.mrf.mxu0 }
 0x38c   :  { %v5314_v47 = vld [vmem:[%s6347_s6 + $0x58] sm:$0xff] }
 0x38d   :  { %v1110_v53 = vpop.f32.mrf.mxu1  ;;  %6553 = vst [vmem:[#allocation21_spill] sm:$0xff] %v5314_v47 }
 0x38e   :  { %v1116_v56 = vadd.f32 %v1115_v50, %v1110_v53  ;;  %v5322_v53 = vld [vmem:[%s6347_s6 + $0x50] sm:$0xff] }
 0x38f   :  { %6554 = vst [vmem:[#allocation3_spill] sm:$0xff] %v5322_v53 }
 0x390   :  { %v1117_v13 = vadd.f32 %v4669_v3, %v1116_v56  ;;  %v967_v3 = vmin.f32 %v966_v22, 1.0  ;;  %v962_v22 = vmax.f32 %v4965_v11, 0.0 }
 0x392   :  { %v1206_v29 = vmul.f32 0.2, %v1117_v13  ;;  %vm1198_vm4 = vcmp.ge.f32.partialorder %v967_v3, 0.0  ;;  %vm1199_vm5 = vcmp.le.f32.partialorder %v967_v3, 1.0  ;;  %v963_v50 = vmin.f32 %v962_v22, 1.0  ;;  %v5330_v13 = vld [vmem:[%s6347_s6 + $0x48] sm:$0xff] }
 0x393   :  { %vm1200_vm6 = vmand %vm1198_vm4, %vm1199_vm5  ;;  %6555 = vst [vmem:[#allocation23_spill] sm:$0xff] %v5330_v13  ;;  %v5337_v22 = vld [vmem:[%s6347_s6 + $0x40] sm:$0xff] }
 0x394   :  { %v5276_v5 = vadd.f32 %v1206_v29, %v959_v41  ;;  %v5307_v41 = vld [vmem:[%s6347_s6 + $0x60] sm:$0xff]  ;;  %v2752_v56 = vsel %vm1200_vm6, 1.0, %v6494_v21  ;;  %6556 = vst [vmem:[#allocation4_spill] sm:$0xff] %v5337_v22  ;;  %vm1119_vm7 = vcmp.ge.f32.partialorder %v963_v50, 0.0  ;;  %vm1120_vm8 = vcmp.le.f32.partialorder %v963_v50, 1.0 }
 0x395   :  { %6552 = vst [vmem:[#allocation20_spill] sm:$0xff] %v5307_v41  ;;  %vm1121_vm9 = vmand %vm1119_vm7, %vm1120_vm8 }
 0x396   :  { %v2753_v2 = vclamp-gez-f32 %v5276_v5, 1.0 }
 0x398   :  { %3488 = vmatmul.mubr.f32.vlgmr.msra.gmra.mxu1 %v2753_v2  ;;  %v1112_v2 = vpop.f32.mrf.mxu1 }
 0x399   :  { %3491 = vmatpush3.msra.mxu1 %v5283_v15  ;;  %3522 = vmatprep.mubr.msk.f32.mxu1 %vm4010_vm0, %v6494_v21  ;;  %v1203_v11 = vadd.f32 %v1112_v2, %v4700_v1  ;;  %v1197_v2 = vsub.f32 0.0, %v967_v3  ;;  %v5352_v1 = vld [vmem:[%s6347_s6 + $0x30] sm:$0xff] }
 0x39a   :  { %3492 = vmatprep.subr.mxu1 %v6494_v21 }
 0x39b   :  { %3493 = vmatpush3.msra.mxu1 %v5292_v20  ;;  %v1204_v29 = vmul.f32 %v2752_v56, %v1203_v11 }
 0x39c   :  { %3494 = vmatprep.subr.mxu1 %v6494_v21 }
 0x39d   :  { %3495 = vmatpush3.msra.mxu1 %v5299_v12  ;;  %v1205_v11 = vadd.f32 %v1204_v29, %v1197_v2  ;;  %v5360_v29 = vld [vmem:[%s6347_s6 + $0x28] sm:$0xff] }
 0x39e   :  { %3496 = vmatprep.subr.mxu1 %v6494_v21 }
 0x39f   :  { %3497 = vmatpush3.msra.mxu1 %v5307_v41  ;;  %v2751_v41 = vsel %vm1121_vm9, 1.0, %v6494_v21 }
 0x3a0   :  { %3498 = vmatprep.subr.mxu1 %v6494_v21 }
 0x3a1   :  { %3499 = vmatpush3.msra.mxu1 %v5314_v47 }
 0x3a2   :  { %3500 = vmatprep.subr.mxu1 %v6494_v21 }
 0x3a3   :  { %3501 = vmatpush3.msra.mxu1 %v5322_v53 }
 0x3a4   :  { %3502 = vmatprep.subr.mxu1 %v6494_v21 }
 0x3a5   :  { %3503 = vmatpush3.msra.mxu1 %v5330_v13  ;;  %v5344_v13 = vld [vmem:[%s6347_s6 + $0x38] sm:$0xff] }
 0x3a6   :  { %3504 = vmatprep.subr.mxu1 %v6494_v21 }
 0x3a7   :  { %3505 = vmatpush3.msra.mxu1 %v5337_v22 }
 0x3a8   :  { %3506 = vmatprep.subr.mxu1 %v6494_v21 }
 0x3a9   :  { %v1190_v53 = vpop.f32.mrf.mxu0  ;;  %3507 = vmatpush3.msra.mxu1 %v5344_v13 }
 0x3aa   :  { %v1191_v56 = vadd.f32 %v4664_v9, %v1190_v53  ;;  %3508 = vmatprep.subr.mxu1 %v6494_v21  ;;  %v1214_v9 = vmul.f32 0.2, %v1205_v11  ;;  %v1118_v53 = vsub.f32 0.0, %v963_v50  ;;  %v5383_v11 = vld [vmem:[%s6347_s6 + $0x10] sm:$0xff] }
 0x3ab   :  { %v3454_v22 = vpop.f32.mrf.mxu0  ;;  %3509 = vmatpush3.msra.mxu1 %v5352_v1 }
 0x3ac   :  { %v1194_v47 = vadd.f32 %v1191_v56, %v1040_v44  ;;  %3510 = vmatprep.subr.mxu1 %v6494_v21  ;;  %v5367_v44 = vld [vmem:[%s6347_s6 + $0x20] sm:$0xff]  ;;  %v5374_v56 = vld [vmem:[%s6347_s6 + $0x18] sm:$0xff] }
 0x3ad   :  { %3511 = vmatpush3.msra.mxu1 %v5360_v29 }
 0x3ae   :  { %v1195_v22 = vmul.f32 %v2751_v41, %v1194_v47  ;;  %3512 = vmatprep.subr.mxu1 %v6494_v21  ;;  %v5377_v41 = vadd.f32 %v1214_v9, %v967_v3 }
 0x3af   :  { %3513 = vmatpush3.msra.mxu1 %v5367_v44 }
 0x3b0   :  { %v1196_v2 = vadd.f32 %v1195_v22, %v1118_v53  ;;  %3514 = vmatprep.subr.mxu1 %v6494_v21  ;;  %v5392_v22 = vld [vmem:[%s6347_s6 + $0x8] sm:$0xff]  ;;  %v2755_v9 = vclamp-gez-f32 %v5377_v41, 1.0 }
 0x3b1   :  { %3515 = vmatpush3.msra.mxu1 %v5374_v56 }
 0x3b2   :  { %v1210_v47 = vmul.f32 0.2, %v1196_v2  ;;  %3516 = vmatprep.subr.mxu1 %v6494_v21  ;;  %v6557_v2 = vld [vmem:[#allocation10_spill] sm:$0xff] }
 0x3b3   :  { %3517 = vmatpush3.msra.mxu1 %v5383_v11 }
 0x3b4   :  { %v5386_v53 = vadd.f32 %v1210_v47, %v963_v50  ;;  %3518 = vmatprep.subr.mxu1 %v6494_v21  ;;  %v5401_v50 = vld [vmem:[%s6347_s6] sm:$0xff] }
 0x3b5   :  { %3519 = vmatpush3.msra.mxu1 %v5392_v22  ;;  %v6558_v47 = vld [vmem:[#allocation18_spill] sm:$0xff] }
 0x3b6   :  { %3520 = vmatprep.subr.mxu1 %v6494_v21  ;;  %v2754_v3 = vclamp-gez-f32 %v5386_v53, 1.0 }
 0x3b7   :  { %3521 = vmatpush3.msra.mxu1 %v5401_v50 }
 0x3b8   :  { %1359 = vmatmul.mubr.f32.vlgmr.msra.gmra.mxu0 %v2754_v3  ;;  %3523 = vmatmul.mubr.f32.vlgmr.msra.gmra.mxu1 %v2755_v9  ;;  %v6559_v3 = vld [vmem:[#allocation29_spill] sm:$0xff] }
 0x3b9   :  { %3526 = vmatpush3.msra.mxu0 %v4851_v30  ;;  %1544 = vmatprep.subr.mxu1 %v5076_v35 }
 0x3ba   :  { %3527 = vmatprep.subr.mxu0 %v6494_v21  ;;  %1545 = vmatpush1.msra.mxu1 %v5088_v48 }
 0x3bb   :  { %3528 = vmatpush3.msra.mxu0 %v4860_v25  ;;  %1546 = vmatprep.subr.mxu1 %v5095_v49 }
 0x3bc   :  { %3529 = vmatprep.subr.mxu0 %v6494_v21  ;;  %1547 = vmatpush1.msra.mxu1 %v5101_v24 }
 0x3bd   :  { %3530 = vmatpush3.msra.mxu0 %v4869_v38  ;;  %1548 = vmatprep.subr.mxu1 %v5108_v51 }
 0x3be   :  { %3531 = vmatprep.subr.mxu0 %v6494_v21  ;;  %1549 = vmatpush1.msra.mxu1 %v5114_v52 }
 0x3bf   :  { %3532 = vmatpush3.msra.mxu0 %v4878_v40  ;;  %1550 = vmatprep.subr.mxu1 %v5120_v54 }
 0x3c0   :  { %3533 = vmatprep.subr.mxu0 %v6494_v21  ;;  %1551 = vmatpush1.msra.mxu1 %v5126_v55 }
 0x3c1   :  { %3534 = vmatpush3.msra.mxu0 %v4887_v42  ;;  %1552 = vmatprep.subr.mxu1 %v5132_v57 }
 0x3c2   :  { %3535 = vmatprep.subr.mxu0 %v6494_v21  ;;  %1553 = vmatpush1.msra.mxu1 %v5138_v58 }
 0x3c3   :  { %3536 = vmatpush3.msra.mxu0 %v4896_v43  ;;  %1554 = vmatprep.subr.mxu1 %v5144_v60 }
 0x3c4   :  { %3537 = vmatprep.subr.mxu0 %v6494_v21  ;;  %1555 = vmatpush1.msra.mxu1 %v5150_v61 }
 0x3c5   :  { %3538 = vmatpush3.msra.mxu0 %v4905_v45  ;;  %1556 = vmatprep.subr.mxu1 %v5156_v32 }
 0x3c6   :  { %3539 = vmatprep.subr.mxu0 %v6494_v21  ;;  %1557 = vmatpush1.msra.mxu1 %v5162_v34 }
 0x3c7   :  { %3540 = vmatpush3.msra.mxu0 %v4914_v46  ;;  %1558 = vmatprep.subr.mxu1 %v5168_v36 }
 0x3c8   :  { %3541 = vmatprep.subr.mxu0 %v6494_v21  ;;  %1559 = vmatpush1.msra.mxu1 %v5174_v0 }
 0x3c9   :  { %3542 = vmatpush3.msra.mxu0 %v5012_v4  ;;  %1560 = vmatprep.subr.mxu1 %v5180_v62 }
 0x3ca   :  { %3543 = vmatprep.subr.mxu0 %v6494_v21  ;;  %1561 = vmatpush1.msra.mxu1 %v5186_v59 }
 0x3cb   :  { %3544 = vmatpush3.msra.mxu0 %v5021_v8  ;;  %1562 = vmatprep.subr.mxu1 %v5192_v39 }
 0x3cc   :  { %3545 = vmatprep.subr.mxu0 %v6494_v21  ;;  %1563 = vmatpush1.msra.mxu1 %v5198_v17 }
 0x3cd   :  { %3546 = vmatpush3.msra.mxu0 %v5030_v19  ;;  %1564 = vmatprep.subr.mxu1 %v5204_v23 }
 0x3ce   :  { %3547 = vmatprep.subr.mxu0 %v6494_v21  ;;  %1565 = vmatpush1.msra.mxu1 %v5210_v10 }
 0x3cf   :  { %3548 = vmatpush3.msra.mxu0 %v5041_v14  ;;  %1566 = vmatprep.subr.mxu1 %v5216_v31 }
 0x3d0   :  { %3549 = vmatprep.subr.mxu0 %v6494_v21  ;;  %1567 = vmatpush1.msra.mxu1 %v5222_v27 }
 0x3d1   :  { %3550 = vmatpush3.msra.mxu0 %v5050_v16  ;;  %1568 = vmatprep.subr.mxu1 %v5228_v37 }
 0x3d2   :  { %3551 = vmatprep.subr.mxu0 %v6494_v21  ;;  %1569 = vmatpush1.msra.mxu1 %v5234_v7 }
 0x3d3   :  { %3552 = vmatpush3.msra.mxu0 %v5060_v63  ;;  %1570 = vmatprep.subr.mxu1 %v5240_v6  ;;  %v1212_v6 = vmax.f32 %v5386_v53, 0.0 }
 0x3d4   :  { %3553 = vmatprep.subr.mxu0 %v6494_v21  ;;  %3557 = vmatprep.mubr.msk.f32.mxu0 %vm4010_vm0, %v6494_v21 }
 0x3d5   :  { %3554 = vmatpush3.msra.mxu0 %v5067_v26  ;;  %1571 = vmatpush1.msra.mxu1 %v5246_v28  ;;  %v1213_v7 = vmin.f32 %v1212_v6, 1.0  ;;  %v5483_v6 = vld [vmem:[%s6351_s8] ss:$0 sm:$0xff] }
 0x3d6   :  { %3555 = vmatprep.subr.mxu0 %v6494_v21  ;;  %1572 = vmatprep.subr.mxu1 %v5252_v33  ;;  %v1208_v33 = vmax.f32 %v5276_v5, 0.0 }
 0x3d7   :  { %3556 = vmatpush3.msra.mxu0 %v6557_v2  ;;  %1573 = vmatpush1.msra.mxu1 %v6558_v47  ;;  %vm1369_vm10 = vcmp.ge.f32.partialorder %v1213_v7, 0.0  ;;  %vm1370_vm11 = vcmp.le.f32.partialorder %v1213_v7, 1.0 }
 0x3d8   :  { %3560 = vmatprep.subr.mxu0 %v6494_v21  ;;  %1574 = vmatprep.subr.mxu1 %v6559_v3  ;;  %v1209_v37 = vmin.f32 %v1208_v33, 1.0  ;;  %vm1371_vm12 = vmand %vm1369_vm10, %vm1370_vm11 }
 0x3d9   :  { %1575 = vmatpush1.msra.mxu1 %v5270_v18  ;;  %1608 = vmatprep.mubr.f32.mxu1 %v6494_v21  ;;  %v5477_v18 = vld [vmem:[%s6350_s9] ss:$0 sm:$0xff]  ;;  %v2756_v53 = vsel %vm1371_vm12, 1.0, %v6494_v21 }
 0x3da   :  { %3595 = vmatprep.subr.mxu1 %v6494_v21  ;;  %v1365_v47 = vsub.f32 0.0, %v1209_v37  ;;  %6560 = vst [vmem:[#allocation24_spill] sm:$0xff] %v5477_v18 }
 0x458   :  { %v1290_v9 = vpop.f32.mrf.mxu1 }
 0x45a   :  { %v3489_v28 = vpop.f32.mrf.mxu1 }
 0x478   :  { %v1360_v27 = vpop.f32.mrf.mxu0  ;;  %v1440_v31 = vpop.f32.mrf.mxu1 }
 0x479   :  { %v1366_v3 = vadd.f32 %v1365_v47, %v1360_v27  ;;  %v1441_v28 = vadd.f32 %v5477_v18, %v1440_v31  ;;  %v1368_v47 = vsub.f32 0.0, %v1213_v7 }
 0x47a   :  { %v3524_v10 = vpop.f32.mrf.mxu1 }
 0x47b   :  { %v1367_v33 = vadd.f32 %v5483_v6, %v1366_v3  ;;  %v1444_v5 = vadd.f32 %v1441_v28, %v1290_v9  ;;  %v1216_v10 = vmax.f32 %v5377_v41, 0.0  ;;  %v6564_v41 = vld [vmem:[#allocation3_spill] sm:$0xff]  ;;  %v6566_v28 = vld [vmem:[#allocation4_spill] sm:$0xff] }
 0x47c   :  { %v6565_v9 = vld [vmem:[#allocation23_spill] sm:$0xff] }
 0x47d   :  { %v1456_v27 = vmul.f32 0.2, %v1367_v33  ;;  %v1445_v23 = vmul.f32 %v2756_v53, %v1444_v5  ;;  %v6568_v5 = vld [vmem:[#allocation16_spill] sm:$0xff]  ;;  %v6569_v53 = vld [vmem:[#allocation19_spill] sm:$0xff] }
 0x47f   :  { %v5487_v17 = vadd.f32 %v1456_v27, %v1209_v37  ;;  %v1446_v39 = vadd.f32 %v1445_v23, %v1368_v47  ;;  %v1217_v37 = vmin.f32 %v1216_v10, 1.0  ;;  %v6562_v23 = vld [vmem:[#allocation21_spill] sm:$0xff]  ;;  %v6570_v27 = vld [vmem:[#allocation22_spill] sm:$0xff] }
 0x480   :  { %v6571_v47 = vld [vmem:[#allocation25_spill] sm:$0xff] }
 0x481   :  { %v2758_v59 = vclamp-gez-f32 %v5487_v17, 1.0  ;;  %v1460_v31 = vmul.f32 0.2, %v1446_v39  ;;  %vm1448_vm13 = vcmp.ge.f32.partialorder %v1217_v37, 0.0  ;;  %vm1449_vm14 = vcmp.le.f32.partialorder %v1217_v37, 1.0  ;;  %v6561_v39 = vld [vmem:[#allocation20_spill] sm:$0xff] }
 0x482   :  { %vm1450_vm15 = vmand %vm1448_vm13, %vm1449_vm14  ;;  %v6573_v10 = vld [vmem:[#allocation9_spill] sm:$0xff] }
 0x483   :  { %v5491_v18 = vadd.f32 %v1460_v31, %v1213_v7  ;;  %3558 = vmatmul.mubr.f32.vlgmr.msra.gmra.mxu0 %v2758_v59  ;;  %v1362_v59 = vpop.f32.mrf.mxu0  ;;  %v6572_v31 = vld [vmem:[#allocation8_spill] sm:$0xff] }
 0x484   :  { %3561 = vmatpush3.msra.mxu0 %v5283_v15  ;;  %3592 = vmatprep.mubr.msk.f32.mxu0 %vm4010_vm0, %v6494_v21 }
 0x485   :  { %3562 = vmatprep.subr.mxu0 %v6494_v21  ;;  %v2759_v3 = vclamp-gez-f32 %v5491_v18, 1.0 }
 0x486   :  { %3563 = vmatpush3.msra.mxu0 %v5292_v20 }
 0x487   :  { %3564 = vmatprep.subr.mxu0 %v6494_v21  ;;  %1609 = vmatmul.mubr.f32.vlgmr.msra.gmra.mxu1 %v2759_v3  ;;  %v6574_v3 = vld [vmem:[#allocation11_spill] sm:$0xff] }
 0x488   :  { %3565 = vmatpush3.msra.mxu0 %v5299_v12  ;;  %3596 = vmatpush3.msra.mxu1 %v4851_v30  ;;  %v6563_v30 = vld [vmem:[#allocation30_spill] sm:$0xff] }
 0x489   :  { %3566 = vmatprep.subr.mxu0 %v6494_v21  ;;  %3597 = vmatprep.subr.mxu1 %v6494_v21  ;;  %v1453_v7 = vadd.f32 %v1362_v59, %v6563_v30  ;;  %v6576_v59 = vld [vmem:[#allocation14_spill] sm:$0xff] }
 0x48a   :  { %3567 = vmatpush3.msra.mxu0 %v6561_v39  ;;  %3598 = vmatpush3.msra.mxu1 %v4860_v25  ;;  %v2757_v25 = vsel %vm1450_vm15, 1.0, %v6494_v21 }
 0x48b   :  { %3568 = vmatprep.subr.mxu0 %v6494_v21  ;;  %3599 = vmatprep.subr.mxu1 %v6494_v21 }
 0x48c   :  { %3569 = vmatpush3.msra.mxu0 %v6562_v23  ;;  %3600 = vmatpush3.msra.mxu1 %v4869_v38  ;;  %v1454_v38 = vmul.f32 %v2757_v25, %v1453_v7  ;;  %v6577_v7 = vld [vmem:[#allocation15_spill] sm:$0xff]  ;;  %v6578_v25 = vld [vmem:[#allocation17_spill] sm:$0xff] }
 0x48d   :  { %3570 = vmatprep.subr.mxu0 %v6494_v21  ;;  %3601 = vmatprep.subr.mxu1 %v6494_v21 }
 0x48e   :  { %3571 = vmatpush3.msra.mxu0 %v6564_v41  ;;  %3602 = vmatpush3.msra.mxu1 %v4878_v40  ;;  %v1447_v40 = vsub.f32 0.0, %v1217_v37 }
 0x48f   :  { %3572 = vmatprep.subr.mxu0 %v6494_v21  ;;  %3603 = vmatprep.subr.mxu1 %v6494_v21 }
 0x490   :  { %3573 = vmatpush3.msra.mxu0 %v6565_v9  ;;  %3604 = vmatpush3.msra.mxu1 %v4887_v42  ;;  %v1455_v33 = vadd.f32 %v1454_v38, %v1447_v40  ;;  %v6579_v38 = vld [vmem:[#allocation18_spill] sm:$0xff]  ;;  %v6580_v40 = vld [vmem:[#allocation29_spill] sm:$0xff] }
 0x491   :  { %3574 = vmatprep.subr.mxu0 %v6494_v21  ;;  %3605 = vmatprep.subr.mxu1 %v6494_v21 }
 0x492   :  { %3575 = vmatpush3.msra.mxu0 %v6566_v28  ;;  %3606 = vmatpush3.msra.mxu1 %v4896_v43  ;;  %v1464_v42 = vmul.f32 0.2, %v1455_v33  ;;  %v6581_v33 = vld [vmem:[#allocation2_spill] sm:$0xff] }
 0x493   :  { %3576 = vmatprep.subr.mxu0 %v6494_v21  ;;  %3607 = vmatprep.subr.mxu1 %v6494_v21 }
 0x494   :  { %3577 = vmatpush3.msra.mxu0 %v5344_v13  ;;  %3608 = vmatpush3.msra.mxu1 %v4905_v45  ;;  %v5544_v43 = vadd.f32 %v1464_v42, %v1217_v37  ;;  %v6575_v37 = vld [vmem:[#allocation12_spill] sm:$0xff]  ;;  %v1458_v42 = vmax.f32 %v5487_v17, 0.0 }
 0x495   :  { %3578 = vmatprep.subr.mxu0 %v6494_v21  ;;  %3609 = vmatprep.subr.mxu1 %v6494_v21 }
 0x496   :  { %3579 = vmatpush3.msra.mxu0 %v5352_v1  ;;  %3610 = vmatpush3.msra.mxu1 %v4914_v46  ;;  %v2760_v45 = vclamp-gez-f32 %v5544_v43, 1.0  ;;  %v6567_v46 = vld [vmem:[#allocation13_spill] sm:$0xff] }
 0x497   :  { %3580 = vmatprep.subr.mxu0 %v6494_v21  ;;  %3611 = vmatprep.subr.mxu1 %v6494_v21 }
 0x498   :  { %3581 = vmatpush3.msra.mxu0 %v5360_v29  ;;  %3612 = vmatpush3.msra.mxu1 %v5012_v4 }
 0x499   :  { %3582 = vmatprep.subr.mxu0 %v6494_v21  ;;  %3613 = vmatprep.subr.mxu1 %v6494_v21 }
 0x49a   :  { %3583 = vmatpush3.msra.mxu0 %v5367_v44  ;;  %3614 = vmatpush3.msra.mxu1 %v5021_v8 }
 0x49b   :  { %3584 = vmatprep.subr.mxu0 %v6494_v21  ;;  %3615 = vmatprep.subr.mxu1 %v6494_v21 }
 0x49c   :  { %3585 = vmatpush3.msra.mxu0 %v5374_v56  ;;  %3616 = vmatpush3.msra.mxu1 %v5030_v19 }
 0x49d   :  { %3586 = vmatprep.subr.mxu0 %v6494_v21  ;;  %3617 = vmatprep.subr.mxu1 %v6494_v21 }
 0x49e   :  { %3587 = vmatpush3.msra.mxu0 %v5383_v11  ;;  %3618 = vmatpush3.msra.mxu1 %v5041_v14 }
 0x49f   :  { %3588 = vmatprep.subr.mxu0 %v6494_v21  ;;  %3619 = vmatprep.subr.mxu1 %v6494_v21 }
 0x4a0   :  { %3589 = vmatpush3.msra.mxu0 %v5392_v22  ;;  %3620 = vmatpush3.msra.mxu1 %v5050_v16 }
 0x4a1   :  { %3590 = vmatprep.subr.mxu0 %v6494_v21  ;;  %3621 = vmatprep.subr.mxu1 %v6494_v21 }
 0x4a2   :  { %3591 = vmatpush3.msra.mxu0 %v5401_v50  ;;  %3622 = vmatpush3.msra.mxu1 %v5060_v63 }
 0x4a3   :  { %3593 = vmatmul.mubr.f32.vlgmr.msra.gmra.mxu0 %v2760_v45  ;;  %3623 = vmatprep.subr.mxu1 %v6494_v21  ;;  %v1459_v45 = vmin.f32 %v1458_v42, 1.0 }
 0x4a4   :  { %3624 = vmatpush3.msra.mxu1 %v5067_v26  ;;  %3627 = vmatprep.mubr.msk.f32.mxu1 %vm4010_vm0, %v6494_v21 }
 0x4a5   :  { %3625 = vmatprep.subr.mxu1 %v6494_v21  ;;  %1794 = vmatprep.subr.mxu0 %v5076_v35  ;;  %v1615_v63 = vsub.f32 0.0, %v1459_v45 }
 0x4a6   :  { %3626 = vmatpush3.msra.mxu1 %v6557_v2  ;;  %1795 = vmatpush1.msra.mxu0 %v5088_v48 }
 0x4a7   :  { %3630 = vmatprep.subr.mxu1 %v6494_v21  ;;  %1796 = vmatprep.subr.mxu0 %v5095_v49 }
 0x4a8   :  { %1797 = vmatpush1.msra.mxu0 %v5101_v24  ;;  %1858 = vmatprep.mubr.f32.mxu0 %v6494_v21 }
 0x4a9   :  { %1798 = vmatprep.subr.mxu0 %v5108_v51 }
 0x4aa   :  { %1799 = vmatpush1.msra.mxu0 %v5114_v52 }
 0x4ab   :  { %1800 = vmatprep.subr.mxu0 %v5120_v54 }
 0x4ac   :  { %1801 = vmatpush1.msra.mxu0 %v5126_v55 }
 0x4ad   :  { %1802 = vmatprep.subr.mxu0 %v5132_v57 }
 0x4ae   :  { %1803 = vmatpush1.msra.mxu0 %v5138_v58 }
 0x4af   :  { %1804 = vmatprep.subr.mxu0 %v5144_v60 }
 0x4b0   :  { %1805 = vmatpush1.msra.mxu0 %v5150_v61 }
 0x4b1   :  { %1806 = vmatprep.subr.mxu0 %v5156_v32 }
 0x4b2   :  { %1807 = vmatpush1.msra.mxu0 %v5162_v34 }
 0x4b3   :  { %1808 = vmatprep.subr.mxu0 %v5168_v36 }
 0x4b4   :  { %1809 = vmatpush1.msra.mxu0 %v5174_v0 }
 0x4b5   :  { %1810 = vmatprep.subr.mxu0 %v5180_v62 }
 0x4b6   :  { %1811 = vmatpush1.msra.mxu0 %v6567_v46 }
 0x4b7   :  { %1812 = vmatprep.subr.mxu0 %v6568_v5 }
 0x4b8   :  { %1813 = vmatpush1.msra.mxu0 %v6569_v53 }
 0x4b9   :  { %1814 = vmatprep.subr.mxu0 %v6570_v27 }
 0x4ba   :  { %1815 = vmatpush1.msra.mxu0 %v6571_v47 }
 0x4bb   :  { %1816 = vmatprep.subr.mxu0 %v6572_v31 }
 0x4bc   :  { %1817 = vmatpush1.msra.mxu0 %v6573_v10 }
 0x4bd   :  { %1818 = vmatprep.subr.mxu0 %v6574_v3 }
 0x4be   :  { %1819 = vmatpush1.msra.mxu0 %v6575_v37 }
 0x4bf   :  { %1820 = vmatprep.subr.mxu0 %v6576_v59 }
 0x4c0   :  { %1821 = vmatpush1.msra.mxu0 %v6577_v7 }
 0x4c1   :  { %1822 = vmatprep.subr.mxu0 %v6578_v25 }
 0x4c2   :  { %1823 = vmatpush1.msra.mxu0 %v6579_v38 }
 0x4c3   :  { %1824 = vmatprep.subr.mxu0 %v6580_v40  ;;  %v1466_v40 = vmax.f32 %v5544_v43, 0.0 }
 0x4c4   :  { %1825 = vmatpush1.msra.mxu0 %v6581_v33 }
 0x4c5   :  { %3665 = vmatprep.subr.mxu0 %v6494_v21 }
 0x543   :  { %v1540_v2 = vpop.f32.mrf.mxu0 }
 0x545   :  { %v3559_v26 = vpop.f32.mrf.mxu0 }
 0x546   :  { %v1467_v26 = vmin.f32 %v1466_v40, 1.0  ;;  %v6582_v40 = vld [vmem:[#allocation24_spill] sm:$0xff] }
 0x547   :  { %v1610_v37 = vpop.f32.mrf.mxu1 }
 0x548   :  { %v1616_v59 = vadd.f32 %v1615_v63, %v1610_v37  ;;  %v1462_v63 = vmax.f32 %v5491_v18, 0.0  ;;  %vm1698_vm1 = vcmp.ge.f32.partialorder %v1467_v26, 0.0  ;;  %vm1699_vm2 = vcmp.le.f32.partialorder %v1467_v26, 1.0 }
 0x549   :  { %v1612_v17 = vpop.f32.mrf.mxu1  ;;  %vm1700_vm3 = vmand %vm1698_vm1, %vm1699_vm2 }
 0x54a   :  { %v1617_v7 = vadd.f32 %v5483_v6, %v1616_v59  ;;  %v1703_v43 = vadd.f32 %v1612_v17, %v6563_v30  ;;  %v2762_v18 = vsel %vm1700_vm3, 1.0, %v6494_v21  ;;  %v1697_v59 = vsub.f32 0.0, %v1467_v26 }
 0x54c   :  { %v1706_v3 = vmul.f32 0.2, %v1617_v7  ;;  %v1704_v37 = vmul.f32 %v2762_v18, %v1703_v43 }
 0x54e   :  { %v5602_v25 = vadd.f32 %v1706_v3, %v1459_v45  ;;  %v1463_v3 = vmin.f32 %v1462_v63, 1.0 }
 0x550   :  { %v2763_v38 = vclamp-gez-f32 %v5602_v25, 1.0  ;;  %vm1619_vm4 = vcmp.ge.f32.partialorder %v1463_v3, 0.0  ;;  %vm1620_vm5 = vcmp.le.f32.partialorder %v1463_v3, 1.0  ;;  %v1618_v18 = vsub.f32 0.0, %v1463_v3 }
 0x551   :  { %vm1621_vm6 = vmand %vm1619_vm4, %vm1620_vm5 }
 0x552   :  { %3628 = vmatmul.mubr.f32.vlgmr.msra.gmra.mxu1 %v2763_v38  ;;  %v1705_v38 = vadd.f32 %v1704_v37, %v1697_v59  ;;  %v2761_v17 = vsel %vm1621_vm6, 1.0, %v6494_v21 }
 0x553   :  { %3631 = vmatpush3.msra.mxu1 %v5283_v15  ;;  %3662 = vmatprep.mubr.msk.f32.mxu1 %vm4010_vm0, %v6494_v21 }
 0x554   :  { %3632 = vmatprep.subr.mxu1 %v6494_v21  ;;  %v1714_v43 = vmul.f32 0.2, %v1705_v38 }
 0x555   :  { %3633 = vmatpush3.msra.mxu1 %v5292_v20 }
 0x556   :  { %3634 = vmatprep.subr.mxu1 %v6494_v21  ;;  %v5638_v59 = vadd.f32 %v1714_v43, %v1467_v26  ;;  %v5653_v26 = vld [vmem:[%s6343_s4 + $0x78] sm:$0xff] }
 0x557   :  { %3635 = vmatpush3.msra.mxu1 %v5299_v12 }
 0x558   :  { %3636 = vmatprep.subr.mxu1 %v6494_v21  ;;  %v2765_v38 = vclamp-gez-f32 %v5638_v59, 1.0 }
 0x559   :  { %3637 = vmatpush3.msra.mxu1 %v6561_v39 }
 0x55a   :  { %3638 = vmatprep.subr.mxu1 %v6494_v21 }
 0x55b   :  { %3639 = vmatpush3.msra.mxu1 %v6562_v23 }
 0x55c   :  { %3640 = vmatprep.subr.mxu1 %v6494_v21 }
 0x55d   :  { %3641 = vmatpush3.msra.mxu1 %v6564_v41 }
 0x55e   :  { %3642 = vmatprep.subr.mxu1 %v6494_v21 }
 0x55f   :  { %3643 = vmatpush3.msra.mxu1 %v6565_v9 }
 0x560   :  { %3644 = vmatprep.subr.mxu1 %v6494_v21 }
 0x561   :  { %3645 = vmatpush3.msra.mxu1 %v6566_v28 }
 0x562   :  { %3646 = vmatprep.subr.mxu1 %v6494_v21 }
 0x563   :  { %v1690_v7 = vpop.f32.mrf.mxu0  ;;  %3647 = vmatpush3.msra.mxu1 %v5344_v13 }
 0x564   :  { %v1691_v42 = vadd.f32 %v6582_v40, %v1690_v7  ;;  %3648 = vmatprep.subr.mxu1 %v6494_v21 }
 0x565   :  { %v3594_v45 = vpop.f32.mrf.mxu0  ;;  %3649 = vmatpush3.msra.mxu1 %v5352_v1 }
 0x566   :  { %v1694_v63 = vadd.f32 %v1691_v42, %v1540_v2  ;;  %3650 = vmatprep.subr.mxu1 %v6494_v21 }
 0x567   :  { %3651 = vmatpush3.msra.mxu1 %v5360_v29 }
 0x568   :  { %v1695_v28 = vmul.f32 %v2761_v17, %v1694_v63  ;;  %3652 = vmatprep.subr.mxu1 %v6494_v21 }
 0x569   :  { %3653 = vmatpush3.msra.mxu1 %v5367_v44 }
 0x56a   :  { %v1696_v37 = vadd.f32 %v1695_v28, %v1618_v18  ;;  %3654 = vmatprep.subr.mxu1 %v6494_v21 }
 0x56b   :  { %3655 = vmatpush3.msra.mxu1 %v5374_v56 }
 0x56c   :  { %v1710_v2 = vmul.f32 0.2, %v1696_v37  ;;  %3656 = vmatprep.subr.mxu1 %v6494_v21 }
 0x56d   :  { %3657 = vmatpush3.msra.mxu1 %v5383_v11 }
 0x56e   :  { %v5642_v7 = vadd.f32 %v1710_v2, %v1463_v3  ;;  %3658 = vmatprep.subr.mxu1 %v6494_v21  ;;  %v5662_v3 = vld [vmem:[%s6343_s4 + $0x70] sm:$0xff]  ;;  %v1716_v2 = vmax.f32 %v5638_v59, 0.0 }
 0x56f   :  { %3659 = vmatpush3.msra.mxu1 %v5392_v22 }
 0x570   :  { %3660 = vmatprep.subr.mxu1 %v6494_v21  ;;  %v2764_v28 = vclamp-gez-f32 %v5642_v7, 1.0 }
 0x571   :  { %3661 = vmatpush3.msra.mxu1 %v5401_v50 }
 0x572   :  { %1859 = vmatmul.mubr.f32.vlgmr.msra.gmra.mxu0 %v2764_v28  ;;  %3663 = vmatmul.mubr.f32.vlgmr.msra.gmra.mxu1 %v2765_v38  ;;  %v1717_v38 = vmin.f32 %v1716_v2, 1.0  ;;  %v6060_v2 = vld [vmem:[%s6346_s5 + $0x10] sm:$0xff] }
 0x573   :  { %3666 = vmatpush3.msra.mxu0 %v5653_v26  ;;  %2044 = vmatprep.subr.mxu1 %v5076_v35  ;;  %v5671_v35 = vld [vmem:[%s6343_s4 + $0x68] sm:$0xff]  ;;  %6595 = vst [vmem:[#allocation5_spill] sm:$0xff] %v6060_v2 }
 0x574   :  { %3667 = vmatprep.subr.mxu0 %v6494_v21  ;;  %2045 = vmatpush1.msra.mxu1 %v5088_v48  ;;  %v5680_v48 = vld [vmem:[%s6343_s4 + $0x60] sm:$0xff]  ;;  %vm1948_vm10 = vcmp.ge.f32.partialorder %v1717_v38, 0.0  ;;  %vm1949_vm11 = vcmp.le.f32.partialorder %v1717_v38, 1.0 }
 0x575   :  { %3668 = vmatpush3.msra.mxu0 %v5662_v3  ;;  %2046 = vmatprep.subr.mxu1 %v5095_v49  ;;  %v5689_v49 = vld [vmem:[%s6343_s4 + $0x58] sm:$0xff]  ;;  %vm1950_vm12 = vmand %vm1948_vm10, %vm1949_vm11 }
 0x576   :  { %3669 = vmatprep.subr.mxu0 %v6494_v21  ;;  %2047 = vmatpush1.msra.mxu1 %v5101_v24  ;;  %v5698_v24 = vld [vmem:[%s6343_s4 + $0x50] sm:$0xff] }
 0x577   :  { %3670 = vmatpush3.msra.mxu0 %v5671_v35  ;;  %2048 = vmatprep.subr.mxu1 %v5108_v51  ;;  %v5707_v51 = vld [vmem:[%s6343_s4 + $0x48] sm:$0xff] }
 0x578   :  { %3671 = vmatprep.subr.mxu0 %v6494_v21  ;;  %2049 = vmatpush1.msra.mxu1 %v5114_v52  ;;  %v5716_v52 = vld [vmem:[%s6343_s4 + $0x40] sm:$0xff] }
 0x579   :  { %3672 = vmatpush3.msra.mxu0 %v5680_v48  ;;  %2050 = vmatprep.subr.mxu1 %v5120_v54  ;;  %v6586_v54 = vld [vmem:[#allocation14_spill] sm:$0xff] }
 0x57a   :  { %3673 = vmatprep.subr.mxu0 %v6494_v21  ;;  %2051 = vmatpush1.msra.mxu1 %v5126_v55  ;;  %v6588_v55 = vld [vmem:[#allocation15_spill] sm:$0xff] }
 0x57b   :  { %3674 = vmatpush3.msra.mxu0 %v5689_v49  ;;  %2052 = vmatprep.subr.mxu1 %v5132_v57  ;;  %v6590_v57 = vld [vmem:[#allocation10_spill] sm:$0xff] }
 0x57c   :  { %3675 = vmatprep.subr.mxu0 %v6494_v21  ;;  %2053 = vmatpush1.msra.mxu1 %v5138_v58  ;;  %v6591_v58 = vld [vmem:[#allocation18_spill] sm:$0xff] }
 0x57d   :  { %3676 = vmatpush3.msra.mxu0 %v5698_v24  ;;  %2054 = vmatprep.subr.mxu1 %v5144_v60  ;;  %v6592_v60 = vld [vmem:[#allocation29_spill] sm:$0xff] }
 0x57e   :  { %3677 = vmatprep.subr.mxu0 %v6494_v21  ;;  %2055 = vmatpush1.msra.mxu1 %v5150_v61 }
 0x57f   :  { %3678 = vmatpush3.msra.mxu0 %v5707_v51  ;;  %2056 = vmatprep.subr.mxu1 %v5156_v32 }
 0x580   :  { %3679 = vmatprep.subr.mxu0 %v6494_v21  ;;  %2057 = vmatpush1.msra.mxu1 %v5162_v34  ;;  %v1712_v34 = vmax.f32 %v5642_v7, 0.0 }
 0x581   :  { %3680 = vmatpush3.msra.mxu0 %v5716_v52  ;;  %2058 = vmatprep.subr.mxu1 %v5168_v36  ;;  %v1708_v36 = vmax.f32 %v5602_v25, 0.0 }
 0x582   :  { %3681 = vmatprep.subr.mxu0 %v6494_v21  ;;  %2059 = vmatpush1.msra.mxu1 %v5174_v0  ;;  %v1713_v0 = vmin.f32 %v1712_v34, 1.0  ;;  %v5946_v34 = vld [vmem:[%s6346_s5 + $0xa8] sm:$0xff] }
 0x583   :  { %3682 = vmatpush3.msra.mxu0 %v5012_v4  ;;  %2060 = vmatprep.subr.mxu1 %v5180_v62  ;;  %v6583_v4 = vld [vmem:[#allocation11_spill] sm:$0xff]  ;;  %v1709_v62 = vmin.f32 %v1708_v36, 1.0  ;;  %v5952_v36 = vld [vmem:[%s6346_s5 + $0xa0] sm:$0xff] }
 0x584   :  { %3683 = vmatprep.subr.mxu0 %v6494_v21  ;;  %2061 = vmatpush1.msra.mxu1 %v6567_v46  ;;  %vm1869_vm7 = vcmp.ge.f32.partialorder %v1713_v0, 0.0  ;;  %vm1870_vm8 = vcmp.le.f32.partialorder %v1713_v0, 1.0  ;;  %v1868_v63 = vsub.f32 0.0, %v1713_v0 }
 0x585   :  { %3684 = vmatpush3.msra.mxu0 %v5021_v8  ;;  %2062 = vmatprep.subr.mxu1 %v6568_v5  ;;  %v6584_v8 = vld [vmem:[#allocation12_spill] sm:$0xff]  ;;  %v1865_v46 = vsub.f32 0.0, %v1709_v62  ;;  %vm1871_vm9 = vmand %vm1869_vm7, %vm1870_vm8 }
 0x586   :  { %3685 = vmatprep.subr.mxu0 %v6494_v21  ;;  %2063 = vmatpush1.msra.mxu1 %v6569_v53  ;;  %v2766_v42 = vsel %vm1871_vm9, 1.0, %v6494_v21 }
 0x587   :  { %3686 = vmatpush3.msra.mxu0 %v5030_v19  ;;  %2064 = vmatprep.subr.mxu1 %v6570_v27  ;;  %v6585_v19 = vld [vmem:[#allocation6_spill] sm:$0xff] }
 0x588   :  { %3687 = vmatprep.subr.mxu0 %v6494_v21  ;;  %2065 = vmatpush1.msra.mxu1 %v6571_v47 }
 0x589   :  { %3688 = vmatpush3.msra.mxu0 %v5041_v14  ;;  %2066 = vmatprep.subr.mxu1 %v6572_v31  ;;  %v6587_v14 = vld [vmem:[#allocation7_spill] sm:$0xff] }
 0x58a   :  { %3689 = vmatprep.subr.mxu0 %v6494_v21  ;;  %2067 = vmatpush1.msra.mxu1 %v6573_v10 }
 0x58b   :  { %3690 = vmatpush3.msra.mxu0 %v5050_v16  ;;  %2068 = vmatprep.subr.mxu1 %v6583_v4  ;;  %v6589_v16 = vld [vmem:[#allocation17_spill] sm:$0xff]  ;;  %v5843_v4 = vld [vmem:[%s6343_s4 + $0x20] sm:$0xff] }
 0x58c   :  { %3691 = vmatprep.subr.mxu0 %v6494_v21  ;;  %2069 = vmatpush1.msra.mxu1 %v6584_v8  ;;  %v5862_v8 = vld [vmem:[%s6343_s4 + $0x10] sm:$0xff] }
 0x58d   :  { %3692 = vmatpush3.msra.mxu0 %v6585_v19  ;;  %2070 = vmatprep.subr.mxu1 %v6586_v54  ;;  %v5884_v19 = vld [vmem:[%s6343_s4] sm:$0xff]  ;;  %v5890_v54 = vld [vmem:[%s6346_s5 + $0xf0] sm:$0xff] }
 0x58e   :  { %3693 = vmatprep.subr.mxu0 %v6494_v21  ;;  %3697 = vmatprep.mubr.msk.f32.mxu0 %vm4010_vm0, %v6494_v21  ;;  %6594 = vst [vmem:[#allocation26_spill] sm:$0xff] %v5884_v19 }
 0x58f   :  { %3694 = vmatpush3.msra.mxu0 %v6587_v14  ;;  %2071 = vmatpush1.msra.mxu1 %v6588_v55  ;;  %v5897_v14 = vld [vmem:[%s6346_s5 + $0xe8] sm:$0xff]  ;;  %v5903_v55 = vld [vmem:[%s6346_s5 + $0xe0] sm:$0xff] }
 0x590   :  { %3695 = vmatprep.subr.mxu0 %v6494_v21  ;;  %2072 = vmatprep.subr.mxu1 %v6589_v16  ;;  %v5910_v16 = vld [vmem:[%s6346_s5 + $0xd8] sm:$0xff] }
 0x591   :  { %3696 = vmatpush3.msra.mxu0 %v6590_v57  ;;  %2073 = vmatpush1.msra.mxu1 %v6591_v58  ;;  %v5916_v57 = vld [vmem:[%s6346_s5 + $0xd0] sm:$0xff]  ;;  %v5922_v58 = vld [vmem:[%s6346_s5 + $0xc8] sm:$0xff] }
 0x592   :  { %3700 = vmatprep.subr.mxu0 %v6494_v21  ;;  %2074 = vmatprep.subr.mxu1 %v6592_v60  ;;  %v5928_v60 = vld [vmem:[%s6346_s5 + $0xc0] sm:$0xff] }
 0x593   :  { %2075 = vmatpush1.msra.mxu1 %v6581_v33  ;;  %2108 = vmatprep.mubr.f32.mxu1 %v6494_v21 }
 0x594   :  { %3735 = vmatprep.subr.mxu1 %v6494_v21 }
 0x612   :  { %v1790_v61 = vpop.f32.mrf.mxu1 }
 0x614   :  { %v3629_v32 = vpop.f32.mrf.mxu1 }
 0x615   :  { %v5940_v32 = vld [vmem:[%s6346_s5 + $0xb0] sm:$0xff] }
 0x632   :  { %v1860_v5 = vpop.f32.mrf.mxu0  ;;  %v1940_v53 = vpop.f32.mrf.mxu1 }
 0x633   :  { %v1866_v27 = vadd.f32 %v1865_v46, %v1860_v5  ;;  %v1941_v47 = vadd.f32 %v6582_v40, %v1940_v53  ;;  %v5970_v46 = vld [vmem:[%s6346_s5 + $0x88] sm:$0xff]  ;;  %v5976_v5 = vld [vmem:[%s6346_s5 + $0x80] sm:$0xff]  ;;  %v5982_v53 = vld [vmem:[%s6346_s5 + $0x78] sm:$0xff] }
 0x634   :  { %v3664_v31 = vpop.f32.mrf.mxu1 }
 0x635   :  { %v1867_v10 = vadd.f32 %v5483_v6, %v1866_v27  ;;  %v1944_v33 = vadd.f32 %v1941_v47, %v1790_v61  ;;  %v5934_v61 = vld [vmem:[%s6346_s5 + $0xb8] sm:$0xff]  ;;  %v5988_v27 = vld [vmem:[%s6346_s5 + $0x70] sm:$0xff]  ;;  %v5994_v47 = vld [vmem:[%s6346_s5 + $0x68] sm:$0xff] }
 0x636   :  { %v6000_v31 = vld [vmem:[%s6346_s5 + $0x60] sm:$0xff] }
 0x637   :  { %v1956_v45 = vmul.f32 0.2, %v1867_v10  ;;  %v1945_v25 = vmul.f32 %v2766_v42, %v1944_v33  ;;  %v6006_v10 = vld [vmem:[%s6346_s5 + $0x58] sm:$0xff]  ;;  %v6012_v33 = vld [vmem:[%s6346_s5 + $0x50] sm:$0xff]  ;;  %v6018_v42 = vld [vmem:[%s6346_s5 + $0x48] sm:$0xff] }
 0x639   :  { %v5763_v17 = vadd.f32 %v1956_v45, %v1709_v62  ;;  %v1946_v43 = vadd.f32 %v1945_v25, %v1868_v63  ;;  %v5964_v62 = vld [vmem:[%s6346_s5 + $0x90] sm:$0xff]  ;;  %v6024_v45 = vld [vmem:[%s6346_s5 + $0x40] sm:$0xff]  ;;  %v6030_v63 = vld [vmem:[%s6346_s5 + $0x38] sm:$0xff] }
 0x63a   :  { %v6036_v25 = vld [vmem:[%s6346_s5 + $0x30] sm:$0xff] }
 0x63b   :  { %v2768_v18 = vclamp-gez-f32 %v5763_v17, 1.0  ;;  %v1960_v37 = vmul.f32 0.2, %v1946_v43  ;;  %v6042_v43 = vld [vmem:[%s6346_s5 + $0x28] sm:$0xff] }
 0x63d   :  { %v5767_v7 = vadd.f32 %v1960_v37, %v1713_v0  ;;  %3698 = vmatmul.mubr.f32.vlgmr.msra.gmra.mxu0 %v2768_v18  ;;  %v5958_v0 = vld [vmem:[%s6346_s5 + $0x98] sm:$0xff]  ;;  %v6048_v18 = vld [vmem:[%s6346_s5 + $0x20] sm:$0xff] }
 0x63e   :  { %3701 = vmatpush3.msra.mxu0 %v5283_v15  ;;  %3732 = vmatprep.mubr.msk.f32.mxu0 %vm4010_vm0, %v6494_v21  ;;  %v1862_v15 = vpop.f32.mrf.mxu0  ;;  %v6054_v37 = vld [vmem:[%s6346_s5 + $0x18] sm:$0xff] }
 0x63f   :  { %3702 = vmatprep.subr.mxu0 %v6494_v21  ;;  %v2769_v28 = vclamp-gez-f32 %v5767_v7, 1.0 }
 0x640   :  { %3703 = vmatpush3.msra.mxu0 %v5292_v20  ;;  %v1953_v20 = vadd.f32 %v1862_v15, %v6563_v30  ;;  %v1958_v15 = vmax.f32 %v5763_v17, 0.0  ;;  %v6085_v17 = vld [vmem:[%s6347_s6 + $0x78] sm:$0xff] }
 0x641   :  { %3704 = vmatprep.subr.mxu0 %v6494_v21  ;;  %2109 = vmatmul.mubr.f32.vlgmr.msra.gmra.mxu1 %v2769_v28  ;;  %v6066_v28 = vld [vmem:[%s6346_s5 + $0x8] sm:$0xff] }
 0x642   :  { %3705 = vmatpush3.msra.mxu0 %v5299_v12  ;;  %3736 = vmatpush3.msra.mxu1 %v5653_v26  ;;  %v2767_v12 = vsel %vm1950_vm12, 1.0, %v6494_v21  ;;  %6596 = vst [vmem:[#allocation27_spill] sm:$0xff] %v6066_v28 }
 0x643   :  { %3706 = vmatprep.subr.mxu0 %v6494_v21  ;;  %3737 = vmatprep.subr.mxu1 %v6494_v21 }
 0x644   :  { %3707 = vmatpush3.msra.mxu0 %v6561_v39  ;;  %3738 = vmatpush3.msra.mxu1 %v5662_v3  ;;  %v1954_v39 = vmul.f32 %v2767_v12, %v1953_v20  ;;  %v1959_v20 = vmin.f32 %v1958_v15, 1.0  ;;  %v6094_v15 = vld [vmem:[%s6347_s6 + $0x70] sm:$0xff] }
 0x645   :  { %3708 = vmatprep.subr.mxu0 %v6494_v21  ;;  %3739 = vmatprep.subr.mxu1 %v6494_v21 }
 0x646   :  { %3709 = vmatpush3.msra.mxu0 %v6562_v23  ;;  %3740 = vmatpush3.msra.mxu1 %v5671_v35  ;;  %v6593_v23 = vld [vmem:[#allocation4_spill] sm:$0xff] }
 0x647   :  { %3710 = vmatprep.subr.mxu0 %v6494_v21  ;;  %3741 = vmatprep.subr.mxu1 %v6494_v21 }
 0x648   :  { %3711 = vmatpush3.msra.mxu0 %v6564_v41  ;;  %3742 = vmatpush3.msra.mxu1 %v5680_v48  ;;  %v1947_v41 = vsub.f32 0.0, %v1717_v38 }
 0x649   :  { %3712 = vmatprep.subr.mxu0 %v6494_v21  ;;  %3743 = vmatprep.subr.mxu1 %v6494_v21 }
 0x64a   :  { %3713 = vmatpush3.msra.mxu0 %v6565_v9  ;;  %3744 = vmatpush3.msra.mxu1 %v5689_v49  ;;  %v1955_v9 = vadd.f32 %v1954_v39, %v1947_v41 }
 0x64b   :  { %3714 = vmatprep.subr.mxu0 %v6494_v21  ;;  %3745 = vmatprep.subr.mxu1 %v6494_v21 }
 0x64c   :  { %3715 = vmatpush3.msra.mxu0 %v6593_v23  ;;  %3746 = vmatpush3.msra.mxu1 %v5698_v24  ;;  %v1964_v59 = vmul.f32 0.2, %v1955_v9  ;;  %v2115_v23 = vsub.f32 0.0, %v1959_v20 }
 0x64d   :  { %3716 = vmatprep.subr.mxu0 %v6494_v21  ;;  %3747 = vmatprep.subr.mxu1 %v6494_v21 }
 0x64e   :  { %3717 = vmatpush3.msra.mxu0 %v5344_v13  ;;  %3748 = vmatpush3.msra.mxu1 %v5707_v51  ;;  %v5814_v13 = vld [vmem:[%s6343_s4 + $0x38] sm:$0xff] }
 0x64f   :  { %3718 = vmatprep.subr.mxu0 %v6494_v21  ;;  %3749 = vmatprep.subr.mxu1 %v6494_v21 }
 0x650   :  { %3719 = vmatpush3.msra.mxu0 %v5352_v1  ;;  %3750 = vmatpush3.msra.mxu1 %v5716_v52  ;;  %v5823_v1 = vld [vmem:[%s6343_s4 + $0x30] sm:$0xff] }
 0x651   :  { %3720 = vmatprep.subr.mxu0 %v6494_v21  ;;  %3751 = vmatprep.subr.mxu1 %v6494_v21 }
 0x652   :  { %3721 = vmatpush3.msra.mxu0 %v5360_v29  ;;  %3752 = vmatpush3.msra.mxu1 %v5814_v13  ;;  %v5832_v29 = vld [vmem:[%s6343_s4 + $0x28] sm:$0xff] }
 0x653   :  { %3722 = vmatprep.subr.mxu0 %v6494_v21  ;;  %3753 = vmatprep.subr.mxu1 %v6494_v21 }
 0x654   :  { %3723 = vmatpush3.msra.mxu0 %v5367_v44  ;;  %3754 = vmatpush3.msra.mxu1 %v5823_v1  ;;  %v5835_v44 = vadd.f32 %v1964_v59, %v1717_v38  ;;  %v6072_v38 = vld [vmem:[%s6346_s5] sm:$0xff] }
 0x655   :  { %3724 = vmatprep.subr.mxu0 %v6494_v21  ;;  %3755 = vmatprep.subr.mxu1 %v6494_v21 }
 0x656   :  { %3725 = vmatpush3.msra.mxu0 %v5374_v56  ;;  %3756 = vmatpush3.msra.mxu1 %v5832_v29  ;;  %v5852_v56 = vld [vmem:[%s6343_s4 + $0x18] sm:$0xff] }
 0x657   :  { %3726 = vmatprep.subr.mxu0 %v6494_v21  ;;  %3757 = vmatprep.subr.mxu1 %v6494_v21 }
 0x658   :  { %3727 = vmatpush3.msra.mxu0 %v5383_v11  ;;  %3758 = vmatpush3.msra.mxu1 %v5843_v4  ;;  %v2770_v11 = vclamp-gez-f32 %v5835_v44, 1.0 }
 0x659   :  { %3728 = vmatprep.subr.mxu0 %v6494_v21  ;;  %3759 = vmatprep.subr.mxu1 %v6494_v21 }
 0x65a   :  { %3729 = vmatpush3.msra.mxu0 %v5392_v22  ;;  %3760 = vmatpush3.msra.mxu1 %v5852_v56  ;;  %v5869_v22 = vld [vmem:[%s6343_s4 + $0x8] sm:$0xff] }
 0x65b   :  { %3730 = vmatprep.subr.mxu0 %v6494_v21  ;;  %3761 = vmatprep.subr.mxu1 %v6494_v21 }
 0x65c   :  { %3731 = vmatpush3.msra.mxu0 %v5401_v50  ;;  %3762 = vmatpush3.msra.mxu1 %v5862_v8  ;;  %v5878_v50 = vld [vmem:[%s6346_s5 + $0xf8] sm:$0xff] }
 0x65d   :  { %3733 = vmatmul.mubr.f32.vlgmr.msra.gmra.mxu0 %v2770_v11  ;;  %3763 = vmatprep.subr.mxu1 %v6494_v21 }
 0x65e   :  { %3764 = vmatpush3.msra.mxu1 %v5869_v22  ;;  %3767 = vmatprep.mubr.msk.f32.mxu1 %vm4010_vm0, %v6494_v21 }
 0x65f   :  { %3765 = vmatprep.subr.mxu1 %v6494_v21  ;;  %2294 = vmatprep.subr.mxu0 %v5878_v50 }
 0x660   :  { %3766 = vmatpush3.msra.mxu1 %v5884_v19  ;;  %2295 = vmatpush1.msra.mxu0 %v5890_v54  ;;  %v1966_v19 = vmax.f32 %v5835_v44, 0.0  ;;  %v6101_v44 = vld [vmem:[%s6347_s6 + $0x68] sm:$0xff] }
 0x661   :  { %3770 = vmatprep.subr.mxu1 %v6494_v21  ;;  %2296 = vmatprep.subr.mxu0 %v5897_v14 }
 0x662   :  { %2297 = vmatpush1.msra.mxu0 %v5903_v55  ;;  %2358 = vmatprep.mubr.f32.mxu0 %v6494_v21 }
 0x663   :  { %2298 = vmatprep.subr.mxu0 %v5910_v16 }
 0x664   :  { %2299 = vmatpush1.msra.mxu0 %v5916_v57 }
 0x665   :  { %2300 = vmatprep.subr.mxu0 %v5922_v58 }
 0x666   :  { %2301 = vmatpush1.msra.mxu0 %v5928_v60 }
 0x667   :  { %2302 = vmatprep.subr.mxu0 %v5934_v61 }
 0x668   :  { %2303 = vmatpush1.msra.mxu0 %v5940_v32 }
 0x669   :  { %2304 = vmatprep.subr.mxu0 %v5946_v34 }
 0x66a   :  { %2305 = vmatpush1.msra.mxu0 %v5952_v36 }
 0x66b   :  { %2306 = vmatprep.subr.mxu0 %v5958_v0 }
 0x66c   :  { %2307 = vmatpush1.msra.mxu0 %v5964_v62 }
 0x66d   :  { %2308 = vmatprep.subr.mxu0 %v5970_v46 }
 0x66e   :  { %2309 = vmatpush1.msra.mxu0 %v5976_v5 }
 0x66f   :  { %2310 = vmatprep.subr.mxu0 %v5982_v53 }
 0x670   :  { %2311 = vmatpush1.msra.mxu0 %v5988_v27 }
 0x671   :  { %2312 = vmatprep.subr.mxu0 %v5994_v47 }
 0x672   :  { %2313 = vmatpush1.msra.mxu0 %v6000_v31 }
 0x673   :  { %2314 = vmatprep.subr.mxu0 %v6006_v10 }
 0x674   :  { %2315 = vmatpush1.msra.mxu0 %v6012_v33 }
 0x675   :  { %2316 = vmatprep.subr.mxu0 %v6018_v42 }
 0x676   :  { %2317 = vmatpush1.msra.mxu0 %v6024_v45 }
 0x677   :  { %2318 = vmatprep.subr.mxu0 %v6030_v63 }
 0x678   :  { %2319 = vmatpush1.msra.mxu0 %v6036_v25 }
 0x679   :  { %2320 = vmatprep.subr.mxu0 %v6042_v43 }
 0x67a   :  { %2321 = vmatpush1.msra.mxu0 %v6048_v18 }
 0x67b   :  { %2322 = vmatprep.subr.mxu0 %v6054_v37 }
 0x67c   :  { %2323 = vmatpush1.msra.mxu0 %v6060_v2 }
 0x67d   :  { %2324 = vmatprep.subr.mxu0 %v6066_v28 }
 0x67e   :  { %2325 = vmatpush1.msra.mxu0 %v6072_v38 }
 0x67f   :  { %3805 = vmatprep.subr.mxu0 %v6494_v21 }
 0x6fd   :  { %v2040_v12 = vpop.f32.mrf.mxu0 }
 0x6ff   :  { %v3699_v39 = vpop.f32.mrf.mxu0 }
 0x700   :  { %v6116_v39 = vld [vmem:[%s6347_s6 + $0x58] sm:$0xff] }
 0x701   :  { %v2110_v41 = vpop.f32.mrf.mxu1  ;;  %6598 = vst [vmem:[#allocation20_spill] sm:$0xff] %v6116_v39 }
 0x702   :  { %v2116_v9 = vadd.f32 %v2115_v23, %v2110_v41  ;;  %v6124_v41 = vld [vmem:[%s6347_s6 + $0x50] sm:$0xff] }
 0x703   :  { %6599 = vst [vmem:[#allocation21_spill] sm:$0xff] %v6124_v41 }
 0x704   :  { %v2117_v59 = vadd.f32 %v5483_v6, %v2116_v9  ;;  %v1967_v6 = vmin.f32 %v1966_v19, 1.0  ;;  %v1962_v19 = vmax.f32 %v5767_v7, 0.0 }
 0x706   :  { %v2206_v11 = vmul.f32 0.2, %v2117_v59  ;;  %vm2198_vm13 = vcmp.ge.f32.partialorder %v1967_v6, 0.0  ;;  %vm2199_vm14 = vcmp.le.f32.partialorder %v1967_v6, 1.0  ;;  %v1963_v23 = vmin.f32 %v1962_v19, 1.0  ;;  %v6132_v59 = vld [vmem:[%s6347_s6 + $0x48] sm:$0xff] }
 0x707   :  { %vm2200_vm15 = vmand %vm2198_vm13, %vm2199_vm14  ;;  %6600 = vst [vmem:[#allocation3_spill] sm:$0xff] %v6132_v59  ;;  %v6139_v19 = vld [vmem:[%s6347_s6 + $0x40] sm:$0xff] }
 0x708   :  { %v6078_v28 = vadd.f32 %v2206_v11, %v1959_v20  ;;  %v6109_v20 = vld [vmem:[%s6347_s6 + $0x60] sm:$0xff]  ;;  %v2772_v9 = vsel %vm2200_vm15, 1.0, %v6494_v21  ;;  %6601 = vst [vmem:[#allocation23_spill] sm:$0xff] %v6139_v19  ;;  %vm2119_vm1 = vcmp.ge.f32.partialorder %v1963_v23, 0.0  ;;  %vm2120_vm2 = vcmp.le.f32.partialorder %v1963_v23, 1.0 }
 0x709   :  { %6597 = vst [vmem:[#allocation28_spill] sm:$0xff] %v6109_v20  ;;  %vm2121_vm3 = vmand %vm2119_vm1, %vm2120_vm2 }
 0x70a   :  { %v2773_v2 = vclamp-gez-f32 %v6078_v28, 1.0 }
 0x70c   :  { %3768 = vmatmul.mubr.f32.vlgmr.msra.gmra.mxu1 %v2773_v2  ;;  %v2112_v2 = vpop.f32.mrf.mxu1 }
 0x70d   :  { %3771 = vmatpush3.msra.mxu1 %v6085_v17  ;;  %3802 = vmatprep.mubr.msk.f32.mxu1 %vm4010_vm0, %v6494_v21  ;;  %v2203_v7 = vadd.f32 %v2112_v2, %v6563_v30  ;;  %v2197_v2 = vsub.f32 0.0, %v1967_v6  ;;  %v6154_v30 = vld [vmem:[%s6347_s6 + $0x30] sm:$0xff] }
 0x70e   :  { %3772 = vmatprep.subr.mxu1 %v6494_v21 }
 0x70f   :  { %3773 = vmatpush3.msra.mxu1 %v6094_v15  ;;  %v2204_v11 = vmul.f32 %v2772_v9, %v2203_v7 }
 0x710   :  { %3774 = vmatprep.subr.mxu1 %v6494_v21 }
 0x711   :  { %3775 = vmatpush3.msra.mxu1 %v6101_v44  ;;  %v2205_v7 = vadd.f32 %v2204_v11, %v2197_v2  ;;  %v6162_v11 = vld [vmem:[%s6347_s6 + $0x28] sm:$0xff] }
 0x712   :  { %3776 = vmatprep.subr.mxu1 %v6494_v21 }
 0x713   :  { %3777 = vmatpush3.msra.mxu1 %v6109_v20  ;;  %v2771_v20 = vsel %vm2121_vm3, 1.0, %v6494_v21 }
 0x714   :  { %3778 = vmatprep.subr.mxu1 %v6494_v21 }
 0x715   :  { %3779 = vmatpush3.msra.mxu1 %v6116_v39 }
 0x716   :  { %3780 = vmatprep.subr.mxu1 %v6494_v21 }
 0x717   :  { %3781 = vmatpush3.msra.mxu1 %v6124_v41 }
 0x718   :  { %3782 = vmatprep.subr.mxu1 %v6494_v21 }
 0x719   :  { %3783 = vmatpush3.msra.mxu1 %v6132_v59  ;;  %v6146_v59 = vld [vmem:[%s6347_s6 + $0x38] sm:$0xff] }
 0x71a   :  { %3784 = vmatprep.subr.mxu1 %v6494_v21 }
 0x71b   :  { %3785 = vmatpush3.msra.mxu1 %v6139_v19 }
 0x71c   :  { %3786 = vmatprep.subr.mxu1 %v6494_v21 }
 0x71d   :  { %v2190_v41 = vpop.f32.mrf.mxu0  ;;  %3787 = vmatpush3.msra.mxu1 %v6146_v59 }
 0x71e   :  { %v2191_v9 = vadd.f32 %v6582_v40, %v2190_v41  ;;  %3788 = vmatprep.subr.mxu1 %v6494_v21  ;;  %v2214_v40 = vmul.f32 0.2, %v2205_v7  ;;  %v2118_v41 = vsub.f32 0.0, %v1963_v23  ;;  %v6185_v7 = vld [vmem:[%s6347_s6 + $0x10] sm:$0xff] }
 0x71f   :  { %v3734_v19 = vpop.f32.mrf.mxu0  ;;  %3789 = vmatpush3.msra.mxu1 %v6154_v30 }
 0x720   :  { %v2194_v39 = vadd.f32 %v2191_v9, %v2040_v12  ;;  %3790 = vmatprep.subr.mxu1 %v6494_v21  ;;  %v6169_v12 = vld [vmem:[%s6347_s6 + $0x20] sm:$0xff]  ;;  %v6176_v9 = vld [vmem:[%s6347_s6 + $0x18] sm:$0xff] }
 0x721   :  { %3791 = vmatpush3.msra.mxu1 %v6162_v11 }
 0x722   :  { %v2195_v19 = vmul.f32 %v2771_v20, %v2194_v39  ;;  %3792 = vmatprep.subr.mxu1 %v6494_v21  ;;  %v6179_v20 = vadd.f32 %v2214_v40, %v1967_v6 }
 0x723   :  { %3793 = vmatpush3.msra.mxu1 %v6169_v12 }
 0x724   :  { %v2196_v2 = vadd.f32 %v2195_v19, %v2118_v41  ;;  %3794 = vmatprep.subr.mxu1 %v6494_v21  ;;  %v6194_v19 = vld [vmem:[%s6347_s6 + $0x8] sm:$0xff]  ;;  %v2775_v40 = vclamp-gez-f32 %v6179_v20, 1.0 }
 0x725   :  { %3795 = vmatpush3.msra.mxu1 %v6176_v9 }
 0x726   :  { %v2210_v39 = vmul.f32 0.2, %v2196_v2  ;;  %3796 = vmatprep.subr.mxu1 %v6494_v21 }
 0x727   :  { %3797 = vmatpush3.msra.mxu1 %v6185_v7 }
 0x728   :  { %v6188_v41 = vadd.f32 %v2210_v39, %v1963_v23  ;;  %3798 = vmatprep.subr.mxu1 %v6494_v21  ;;  %v6203_v23 = vld [vmem:[%s6347_s6] sm:$0xff] }
 0x729   :  { %3799 = vmatpush3.msra.mxu1 %v6194_v19 }
 0x72a   :  { %3800 = vmatprep.subr.mxu1 %v6494_v21  ;;  %v2774_v6 = vclamp-gez-f32 %v6188_v41, 1.0 }
 0x72b   :  { %3801 = vmatpush3.msra.mxu1 %v6203_v23 }
 0x72c   :  { %2359 = vmatmul.mubr.f32.vlgmr.msra.gmra.mxu0 %v2774_v6  ;;  %3803 = vmatmul.mubr.f32.vlgmr.msra.gmra.mxu1 %v2775_v40 }
 0x72d   :  { %3806 = vmatpush3.msra.mxu0 %v5653_v26  ;;  %2544 = vmatprep.subr.mxu1 %v5878_v50  ;;  %v6602_v26 = vld [vmem:[#allocation26_spill] sm:$0xff] }
 0x72e   :  { %3807 = vmatprep.subr.mxu0 %v6494_v21  ;;  %2545 = vmatpush1.msra.mxu1 %v5890_v54  ;;  %v6284_v54 = vld [vmem:[%s6351_s8] ss:$0 sm:$0xff] }
 0x72f   :  { %3808 = vmatpush3.msra.mxu0 %v5662_v3  ;;  %2546 = vmatprep.subr.mxu1 %v5897_v14  ;;  %v6603_v3 = vld [vmem:[#allocation5_spill] sm:$0xff] }
 0x730   :  { %3809 = vmatprep.subr.mxu0 %v6494_v21  ;;  %2547 = vmatpush1.msra.mxu1 %v5903_v55 }
 0x731   :  { %3810 = vmatpush3.msra.mxu0 %v5671_v35  ;;  %2548 = vmatprep.subr.mxu1 %v5910_v16  ;;  %v6604_v35 = vld [vmem:[#allocation27_spill] sm:$0xff] }
 0x732   :  { %3811 = vmatprep.subr.mxu0 %v6494_v21  ;;  %2549 = vmatpush1.msra.mxu1 %v5916_v57 }
 0x733   :  { %3812 = vmatpush3.msra.mxu0 %v5680_v48  ;;  %2550 = vmatprep.subr.mxu1 %v5922_v58 }
 0x734   :  { %3813 = vmatprep.subr.mxu0 %v6494_v21  ;;  %2551 = vmatpush1.msra.mxu1 %v5928_v60 }
 0x735   :  { %3814 = vmatpush3.msra.mxu0 %v5689_v49  ;;  %2552 = vmatprep.subr.mxu1 %v5934_v61 }
 0x736   :  { %3815 = vmatprep.subr.mxu0 %v6494_v21  ;;  %2553 = vmatpush1.msra.mxu1 %v5940_v32 }
 0x737   :  { %3816 = vmatpush3.msra.mxu0 %v5698_v24  ;;  %2554 = vmatprep.subr.mxu1 %v5946_v34  ;;  %v2212_v24 = vmax.f32 %v6188_v41, 0.0 }
 0x738   :  { %3817 = vmatprep.subr.mxu0 %v6494_v21  ;;  %2555 = vmatpush1.msra.mxu1 %v5952_v36 }
 0x739   :  { %3818 = vmatpush3.msra.mxu0 %v5707_v51  ;;  %2556 = vmatprep.subr.mxu1 %v5958_v0  ;;  %v2208_v51 = vmax.f32 %v6078_v28, 0.0  ;;  %v2216_v0 = vmax.f32 %v6179_v20, 0.0 }
 0x73a   :  { %3819 = vmatprep.subr.mxu0 %v6494_v21  ;;  %2557 = vmatpush1.msra.mxu1 %v5964_v62 }
 0x73b   :  { %3820 = vmatpush3.msra.mxu0 %v5716_v52  ;;  %2558 = vmatprep.subr.mxu1 %v5970_v46  ;;  %v2213_v52 = vmin.f32 %v2212_v24, 1.0 }
 0x73c   :  { %3821 = vmatprep.subr.mxu0 %v6494_v21  ;;  %2559 = vmatpush1.msra.mxu1 %v5976_v5  ;;  %v2217_v5 = vmin.f32 %v2216_v0, 1.0 }
 0x73d   :  { %3822 = vmatpush3.msra.mxu0 %v5814_v13  ;;  %2560 = vmatprep.subr.mxu1 %v5982_v53  ;;  %v2209_v13 = vmin.f32 %v2208_v51, 1.0  ;;  %vm2369_vm4 = vcmp.ge.f32.partialorder %v2213_v52, 0.0  ;;  %vm2370_vm5 = vcmp.le.f32.partialorder %v2213_v52, 1.0  ;;  %v2368_v58 = vsub.f32 0.0, %v2213_v52 }
 0x73e   :  { %3823 = vmatprep.subr.mxu0 %v6494_v21  ;;  %2561 = vmatpush1.msra.mxu1 %v5988_v27  ;;  %vm2371_vm6 = vmand %vm2369_vm4, %vm2370_vm5  ;;  %vm2448_vm7 = vcmp.ge.f32.partialorder %v2217_v5, 0.0  ;;  %vm2449_vm8 = vcmp.le.f32.partialorder %v2217_v5, 1.0  ;;  %v6605_v27 = vld [vmem:[#allocation28_spill] sm:$0xff] }
 0x73f   :  { %3824 = vmatpush3.msra.mxu0 %v5823_v1  ;;  %2562 = vmatprep.subr.mxu1 %v5994_v47  ;;  %v2365_v1 = vsub.f32 0.0, %v2209_v13  ;;  %v2776_v16 = vsel %vm2371_vm6, 1.0, %v6494_v21  ;;  %v6606_v47 = vld [vmem:[#allocation20_spill] sm:$0xff] }
 0x740   :  { %3825 = vmatprep.subr.mxu0 %v6494_v21  ;;  %2563 = vmatpush1.msra.mxu1 %v6000_v31  ;;  %v6607_v31 = vld [vmem:[#allocation30_spill] sm:$0xff] }
 0x741   :  { %3826 = vmatpush3.msra.mxu0 %v5832_v29  ;;  %2564 = vmatprep.subr.mxu1 %v6006_v10 }
 0x742   :  { %3827 = vmatprep.subr.mxu0 %v6494_v21  ;;  %2565 = vmatpush1.msra.mxu1 %v6012_v33  ;;  %v6608_v33 = vld [vmem:[#allocation21_spill] sm:$0xff] }
 0x743   :  { %3828 = vmatpush3.msra.mxu0 %v5843_v4  ;;  %2566 = vmatprep.subr.mxu1 %v6018_v42 }
 0x744   :  { %3829 = vmatprep.subr.mxu0 %v6494_v21  ;;  %2567 = vmatpush1.msra.mxu1 %v6024_v45  ;;  %v6609_v45 = vld [vmem:[#allocation3_spill] sm:$0xff] }
 0x745   :  { %3830 = vmatpush3.msra.mxu0 %v5852_v56  ;;  %2568 = vmatprep.subr.mxu1 %v6030_v63 }
 0x746   :  { %3831 = vmatprep.subr.mxu0 %v6494_v21  ;;  %2569 = vmatpush1.msra.mxu1 %v6036_v25  ;;  %v6610_v25 = vld [vmem:[#allocation23_spill] sm:$0xff] }
 0x747   :  { %3832 = vmatpush3.msra.mxu0 %v5862_v8  ;;  %2570 = vmatprep.subr.mxu1 %v6042_v43  ;;  %v6278_v8 = vld [vmem:[%s6350_s9] ss:$0 sm:$0xff]  ;;  %v2447_v43 = vsub.f32 0.0, %v2217_v5 }
 0x748   :  { %3833 = vmatprep.subr.mxu0 %v6494_v21  ;;  %3837 = vmatprep.mubr.msk.f32.mxu0 %vm4010_vm0, %v6494_v21 }
 0x749   :  { %3834 = vmatpush3.msra.mxu0 %v5869_v22  ;;  %2571 = vmatpush1.msra.mxu1 %v6048_v18 }
 0x74a   :  { %3835 = vmatprep.subr.mxu0 %v6494_v21  ;;  %2572 = vmatprep.subr.mxu1 %v6054_v37 }
 0x74b   :  { %3836 = vmatpush3.msra.mxu0 %v6602_v26  ;;  %2573 = vmatpush1.msra.mxu1 %v6603_v3 }
 0x74c   :  { %3840 = vmatprep.subr.mxu0 %v6494_v21  ;;  %2574 = vmatprep.subr.mxu1 %v6604_v35 }
 0x74d   :  { %2575 = vmatpush1.msra.mxu1 %v6072_v38  ;;  %2608 = vmatprep.mubr.f32.mxu1 %v6494_v21 }
 0x7cc   :  { %v2290_v48 = vpop.f32.mrf.mxu1 }
 0x7ce   :  { %v3769_v49 = vpop.f32.mrf.mxu1 }
 0x7ec   :  { %v2360_v29 = vpop.f32.mrf.mxu0  ;;  %v2440_v4 = vpop.f32.mrf.mxu1 }
 0x7ed   :  { %v2366_v56 = vadd.f32 %v2365_v1, %v2360_v29  ;;  %v2441_v22 = vadd.f32 %v6278_v8, %v2440_v4 }
 0x7ee   :  { %v3804_v50 = vpop.f32.mrf.mxu1  ;;  %v2362_v53 = vpop.f32.mrf.mxu0 }
 0x7ef   :  { %v2367_v14 = vadd.f32 %v6284_v54, %v2366_v56  ;;  %v2444_v55 = vadd.f32 %v2441_v22, %v2290_v48  ;;  %v2453_v10 = vadd.f32 %v2362_v53, %v6607_v31 }
 0x7f1   :  { %v2456_v57 = vmul.f32 0.2, %v2367_v14  ;;  %v2445_v60 = vmul.f32 %v2776_v16, %v2444_v55 }
 0x7f3   :  { %v2457_v61 = vadd.f32 %v2456_v57, %v2209_v13  ;;  %v2446_v32 = vadd.f32 %v2445_v60, %v2368_v58 }
 0x7f5   :  { %v2778_v34 = vclamp-gez-f32 %v2457_v61, 1.0  ;;  %v2460_v36 = vmul.f32 0.2, %v2446_v32 }
 0x7f7   :  { %v6289_v62 = vadd.f32 %v2460_v36, %v2213_v52  ;;  %3838 = vmatmul.mubr.f32.vlgmr.msra.gmra.mxu0 %v2778_v34 }
 0x7f8   :  { %3841 = vmatpush3.msra.mxu0 %v6085_v17  ;;  %3872 = vmatprep.mubr.msk.f32.mxu0 %vm4010_vm0, %v6494_v21  ;;  %vm2450_vm0 = vmand %vm2448_vm7, %vm2449_vm8  ;;  %v2458_v17 = vmax.f32 %v2457_v61, 0.0 }
 0x7f9   :  { %3842 = vmatprep.subr.mxu0 %v6494_v21  ;;  %v2779_v46 = vclamp-gez-f32 %v6289_v62, 1.0  ;;  %v2777_v42 = vsel %vm2450_vm0, 1.0, %v6494_v21  ;;  %v2462_v52 = vmax.f32 %v6289_v62, 0.0 }
 0x7fa   :  { %3843 = vmatpush3.msra.mxu0 %v6094_v15  ;;  %v2454_v63 = vmul.f32 %v2777_v42, %v2453_v10 }
 0x7fb   :  { %3844 = vmatprep.subr.mxu0 %v6494_v21  ;;  %2609 = vmatmul.mubr.f32.vlgmr.msra.gmra.mxu1 %v2779_v46  ;;  %v2463_v13 = vmin.f32 %v2462_v52, 1.0 }
 0x7fc   :  { %3845 = vmatpush3.msra.mxu0 %v6101_v44  ;;  %v2455_v18 = vadd.f32 %v2454_v63, %v2447_v43  ;;  %v2459_v44 = vmin.f32 %v2458_v17, 1.0 }
 0x7fd   :  { %3846 = vmatprep.subr.mxu0 %v6494_v21  ;;  %vm2619_vm12 = vcmp.ge.f32.partialorder %v2463_v13, 0.0  ;;  %vm2620_vm13 = vcmp.le.f32.partialorder %v2463_v13, 1.0  ;;  %v2618_v50 = vsub.f32 0.0, %v2463_v13 }
 0x7fe   :  { %3847 = vmatpush3.msra.mxu0 %v6605_v27  ;;  %v2464_v37 = vmul.f32 0.2, %v2455_v18  ;;  %vm2621_vm14 = vmand %vm2619_vm12, %vm2620_vm13 }
 0x7ff   :  { %3848 = vmatprep.subr.mxu0 %v6494_v21  ;;  %v2781_v22 = vsel %vm2621_vm14, 1.0, %v6494_v21 }
 0x800   :  { %3849 = vmatpush3.msra.mxu0 %v6606_v47  ;;  %v2465_v28 = vadd.f32 %v2464_v37, %v2217_v5 }
 0x801   :  { %3850 = vmatprep.subr.mxu0 %v6494_v21 }
 0x802   :  { %3851 = vmatpush3.msra.mxu0 %v6608_v33  ;;  %v2466_v38 = vmax.f32 %v2465_v28, 0.0 }
 0x803   :  { %3852 = vmatprep.subr.mxu0 %v6494_v21 }
 0x804   :  { %3853 = vmatpush3.msra.mxu0 %v6609_v45  ;;  %v2467_v15 = vmin.f32 %v2466_v38, 1.0 }
 0x805   :  { %3854 = vmatprep.subr.mxu0 %v6494_v21 }
 0x806   :  { %3855 = vmatpush3.msra.mxu0 %v6610_v25  ;;  %vm2698_vm9 = vcmp.ge.f32.partialorder %v2467_v15, 0.0  ;;  %vm2699_vm10 = vcmp.le.f32.partialorder %v2467_v15, 1.0  ;;  %v2697_v6 = vsub.f32 0.0, %v2467_v15 }
 0x807   :  { %3856 = vmatprep.subr.mxu0 %v6494_v21  ;;  %vm2700_vm11 = vmand %vm2698_vm9, %vm2699_vm10 }
 0x808   :  { %3857 = vmatpush3.msra.mxu0 %v6146_v59  ;;  %v2782_v41 = vsel %vm2700_vm11, 1.0, %v6494_v21 }
 0x809   :  { %3858 = vmatprep.subr.mxu0 %v6494_v21 }
 0x80a   :  { %3859 = vmatpush3.msra.mxu0 %v6154_v30  ;;  %v2780_v30 = vclamp-gez-f32 %v2465_v28, 1.0 }
 0x80b   :  { %3860 = vmatprep.subr.mxu0 %v6494_v21 }
 0x80c   :  { %3861 = vmatpush3.msra.mxu0 %v6162_v11 }
 0x80d   :  { %3862 = vmatprep.subr.mxu0 %v6494_v21 }
 0x80e   :  { %3863 = vmatpush3.msra.mxu0 %v6169_v12  ;;  %v2615_v12 = vsub.f32 0.0, %v2459_v44 }
 0x80f   :  { %3864 = vmatprep.subr.mxu0 %v6494_v21 }
 0x810   :  { %3865 = vmatpush3.msra.mxu0 %v6176_v9 }
 0x811   :  { %3866 = vmatprep.subr.mxu0 %v6494_v21 }
 0x812   :  { %3867 = vmatpush3.msra.mxu0 %v6185_v7 }
 0x813   :  { %3868 = vmatprep.subr.mxu0 %v6494_v21 }
 0x814   :  { %3869 = vmatpush3.msra.mxu0 %v6194_v19 }
 0x815   :  { %3870 = vmatprep.subr.mxu0 %v6494_v21 }
 0x816   :  { %3871 = vmatpush3.msra.mxu0 %v6203_v23 }
 0x817   :  { %3873 = vmatmul.mubr.f32.vlgmr.msra.gmra.mxu0 %v2780_v30 }
 0x8b7   :  { %v2540_v59 = vpop.f32.mrf.mxu0 }
 0x8b9   :  { %v3839_v11 = vpop.f32.mrf.mxu0 }
 0x8bb   :  { %v2610_v2 = vpop.f32.mrf.mxu1 }
 0x8bc   :  { %v2616_v9 = vadd.f32 %v2615_v12, %v2610_v2 }
 0x8bd   :  { %v2612_v20 = vpop.f32.mrf.mxu1 }
 0x8be   :  { %v2617_v39 = vadd.f32 %v6284_v54, %v2616_v9  ;;  %v2703_v7 = vadd.f32 %v2612_v20, %v6607_v31 }
 0x8c0   :  { %v2706_v19 = vmul.f32 0.2, %v2617_v39  ;;  %v2704_v40 = vmul.f32 %v2782_v41, %v2703_v7 }
 0x8c2   :  { %v2707_v23 = vadd.f32 %v2706_v19, %v2459_v44  ;;  %v2705_v26 = vadd.f32 %v2704_v40, %v2697_v6 }
 0x8c4   :  { %v2708_v3 = vmax.f32 %v2707_v23, 0.0  ;;  %v2714_v35 = vmul.f32 0.2, %v2705_v26 }
 0x8c6   :  { %v2709_v48 = vmin.f32 %v2708_v3, 1.0  ;;  %v2715_v49 = vadd.f32 %v2714_v35, %v2467_v15 }
 0x8c8   :  { %2718 = vst [vmem:[%s6353_s11] sm:$0xff] %v2709_v48  ;;  %v2716_v24 = vmax.f32 %v2715_v49, 0.0 }
 0x8ca   :  { %v2717_v51 = vmin.f32 %v2716_v24, 1.0 }
 0x8cc   :  { %2720 = vst [vmem:[%s6354_s13] sm:$0xff] %v2717_v51 }
 0x8d7   :  { %v2690_v1 = vpop.f32.mrf.mxu0 }
 0x8d8   :  { %v2691_v29 = vadd.f32 %v6278_v8, %v2690_v1 }
 0x8d9   :  { %v3874_v4 = vpop.f32.mrf.mxu0 }
 0x8da   :  { %v2694_v56 = vadd.f32 %v2691_v29, %v2540_v59 }
 0x8dc   :  { %v2695_v54 = vmul.f32 %v2781_v22, %v2694_v56 }
 0x8de   :  { %v2696_v14 = vadd.f32 %v2695_v54, %v2618_v50 }
 0x8e0   :  { %v2710_v55 = vmul.f32 0.2, %v2696_v14 }
 0x8e2   :  { %v2711_v16 = vadd.f32 %v2710_v55, %v2463_v13 }
 0x8e4   :  { %v2712_v57 = vmax.f32 %v2711_v16, 0.0 }
 0x8e6   :  { %v2713_v58 = vmin.f32 %v2712_v57, 1.0 }
 0x8e8   :  { %2719 = vst [vmem:[%s6355_s12] sm:$0xff] %v2713_v58 }

</bundles_post_ra>
